<compile_context>
chip_gen: v7x
topology: tpu7x:2x2x1
jax: 0.10.0
libtpu: 0.0.40
codegen_flags: <defaults>
</compile_context>

<pallas_src>
import functools

import jax
import jax.numpy as jnp
from jax.experimental import pallas as pl
from jax.experimental.pallas import tpu as pltpu

F32 = jnp.float32

_PARALLEL = pltpu.CompilerParams(dimension_semantics=("parallel",))
_ARBITRARY = pltpu.CompilerParams(dimension_semantics=("arbitrary",))


# ----------------------------------------------------------------------------
# 3x3 conv (pad=1) + bias + ReLU  --  wrapped-flat tap slices, lane-dense out
# ----------------------------------------------------------------------------
def _conv3x3_kernel(x_ref, w_ref, b_ref, o_ref, *, wp, lout, relu):
    # x_ref: (1, C, Lpad) zero-padded, per-sample-flattened input
    # w_ref: (9, Cout, C)   b_ref: (Cout, 1)   o_ref: (1, Cout, lout)
    cout = o_ref.shape[1]
    acc = jnp.zeros((cout, lout), jnp.float32)
    for ky in range(3):
        for kx in range(3):
            tap = x_ref[0, :, pl.ds(ky * wp + kx, lout)]          # (C, lout)
            acc = acc + jnp.dot(w_ref[ky * 3 + kx], tap,
                                preferred_element_type=jnp.float32)
    acc = acc + b_ref[...]
    if relu:
        acc = jnp.maximum(acc, 0.0)
    o_ref[0] = acc


def conv3x3(x, w, b, relu=True):
    N, C, H, W = x.shape
    Cout = w.shape[0]
    Hp, Wp = H + 2, W + 2
    lout, lpad = H * Wp, Hp * Wp + 2
    xp = jnp.pad(x, ((0, 0), (0, 0), (1, 1), (1, 1)))
    xf = jnp.pad(xp.reshape(N, C, Hp * Wp), ((0, 0), (0, 0), (0, 2)))
    wt = jnp.transpose(w, (2, 3, 0, 1)).reshape(9, Cout, C)
    out = pl.pallas_call(
        functools.partial(_conv3x3_kernel, wp=Wp, lout=lout, relu=relu),
        out_shape=jax.ShapeDtypeStruct((N, Cout, lout), F32),
        grid=(N,),
        in_specs=[
            pl.BlockSpec((1, C, lpad), lambda n: (n, 0, 0)),
            pl.BlockSpec((9, Cout, C), lambda n: (0, 0, 0)),
            pl.BlockSpec((Cout, 1), lambda n: (0, 0)),
        ],
        out_specs=pl.BlockSpec((1, Cout, lout), lambda n: (n, 0, 0)),
        compiler_params=_PARALLEL,
    )(xf, wt, b.reshape(Cout, 1))
    # strip the 2 wrapped (padding) columns of each output row
    return out.reshape(N, Cout, H, Wp)[:, :, :, :W]
    # TODO(synk): tile the per-sample spatial extent too for very large H*W.


# ----------------------------------------------------------------------------
# BatchNorm2d (batch stats) + ReLU, optional fused residual add
# ----------------------------------------------------------------------------
def _bn_stats_kernel(x_ref, s_ref, q_ref):
    @pl.when(pl.program_id(0) == 0)
    def _():
        s_ref[...] = jnp.zeros_like(s_ref)
        q_ref[...] = jnp.zeros_like(q_ref)
    x = x_ref[0]                                              # (C, HW)
    s_ref[...] += jnp.sum(x, axis=1, keepdims=True)
    q_ref[...] += jnp.sum(x * x, axis=1, keepdims=True)


def _bn_stats_res_kernel(x_ref, r_ref, s_ref, q_ref):
    @pl.when(pl.program_id(0) == 0)
    def _():
        s_ref[...] = jnp.zeros_like(s_ref)
        q_ref[...] = jnp.zeros_like(q_ref)
    x = x_ref[0] + r_ref[0]
    s_ref[...] += jnp.sum(x, axis=1, keepdims=True)
    q_ref[...] += jnp.sum(x * x, axis=1, keepdims=True)


def _bn_norm_kernel(x_ref, sc_ref, sh_ref, o_ref):
    o_ref[0] = jnp.maximum(x_ref[0] * sc_ref[...] + sh_ref[...], 0.0)


def _bn_norm_res_kernel(x_ref, r_ref, sc_ref, sh_ref, o_ref):
    o_ref[0] = jnp.maximum((x_ref[0] + r_ref[0]) * sc_ref[...] + sh_ref[...],
                           0.0)


def bn_relu(x, residual, gamma, beta, eps=1e-5):
    """ReLU(BatchNorm2d(x [+ residual])) with per-channel batch statistics."""
    N, C, H, W = x.shape
    HW = H * W
    ins = [x.reshape(N, C, HW)]
    if residual is not None:
        ins.append(residual.reshape(N, C, HW))
    x_spec = pl.BlockSpec((1, C, HW), lambda n: (n, 0, 0))
    c_spec = pl.BlockSpec((C, 1), lambda n: (0, 0))

    stats_kernel = _bn_stats_kernel if residual is None else _bn_stats_res_kernel
    s, q = pl.pallas_call(
        stats_kernel,
        out_shape=(jax.ShapeDtypeStruct((C, 1), F32),
                   jax.ShapeDtypeStruct((C, 1), F32)),
        grid=(N,),
        in_specs=[x_spec] * len(ins),
        out_specs=(c_spec, c_spec),
        compiler_params=_ARBITRARY,
    )(*ins)

    inv = 1.0 / float(N * HW)
    mean = s * inv
    var = q * inv - mean * mean
    scale = gamma.reshape(C, 1) * jax.lax.rsqrt(var + eps)
    shift = beta.reshape(C, 1) - mean * scale

    norm_kernel = _bn_norm_kernel if residual is None else _bn_norm_res_kernel
    y = pl.pallas_call(
        norm_kernel,
        out_shape=jax.ShapeDtypeStruct((N, C, HW), F32),
        grid=(N,),
        in_specs=[x_spec] * len(ins) + [c_spec, c_spec],
        out_specs=x_spec,
        compiler_params=_PARALLEL,
    )(*ins, scale, shift)
    return y.reshape(N, C, H, W)
    # TODO(synk): nn.BatchNorm2d running-stat buffer updates (training-mode
    # side effect) are not modeled; they do not affect this forward output.


# ----------------------------------------------------------------------------
# Fused Spatial_Attention / Channel_Attention (applied in `variant` order)
# ----------------------------------------------------------------------------
def _attn_kernel(x_ref, sw1, sb1, sw2, sb2, cw1, cb1, cw2, cb2, o_ref, *,
                 variant, inv_hw):
    x = x_ref[0]                                              # (C, HW)
    for ch in variant:
        if ch == "s":
            h = jnp.maximum(
                jnp.dot(sw1[...], x, preferred_element_type=jnp.float32)
                + sb1[...], 0.0)                              # (Cr, HW)
            att = jax.nn.sigmoid(
                jnp.dot(sw2[...], h, preferred_element_type=jnp.float32)
                + sb2[...])                                   # (1, HW)
            x = x * att
        else:
            pooled = jnp.sum(x, axis=1, keepdims=True) * inv_hw       # (C, 1)
            h = jnp.maximum(
                jnp.dot(cw1[...], pooled, preferred_element_type=jnp.float32)
                + cb1[...], 0.0)                              # (Cr, 1)
            att = jax.nn.sigmoid(
                jnp.dot(cw2[...], h, preferred_element_type=jnp.float32)
                + cb2[...])                                   # (C, 1)
            x = x * att
    o_ref[0] = x


def attention(x, sa, ca, variant):
    N, C, H, W = x.shape
    HW = H * W
    Cr = sa["w1"].shape[0]
    x_spec = pl.BlockSpec((1, C, HW), lambda n: (n, 0, 0))

    def const(shape):
        return pl.BlockSpec(shape, lambda n: (0, 0))

    out = pl.pallas_call(
        functools.partial(_attn_kernel, variant=variant, inv_hw=1.0 / HW),
        out_shape=jax.ShapeDtypeStruct((N, C, HW), F32),
        grid=(N,),
        in_specs=[x_spec,
                  const((Cr, C)), const((Cr, 1)), const((1, Cr)), const((1, 1)),
                  const((Cr, C)), const((Cr, 1)), const((C, Cr)), const((C, 1))],
        out_specs=x_spec,
        compiler_params=_PARALLEL,
    )(x.reshape(N, C, HW),
      sa["w1"], sa["b1"].reshape(Cr, 1), sa["w2"], sa["b2"].reshape(1, 1),
      ca["w1"], ca["b1"].reshape(Cr, 1), ca["w2"], ca["b2"].reshape(C, 1))
    return out.reshape(N, C, H, W)


# ----------------------------------------------------------------------------
# MaxPool2d(3, stride=2, padding=1)
# ----------------------------------------------------------------------------
def _maxpool_kernel(x_ref, o_ref, *, wp, lout):
    m = x_ref[0, :, pl.ds(0, lout)]
    for ky in range(3):
        for kx in range(3):
            if ky == 0 and kx == 0:
                continue
            m = jnp.maximum(m, x_ref[0, :, pl.ds(ky * wp + kx, lout)])
    o_ref[0] = m


def maxpool2d_3x3_s2_p1(x):
    N, C, H, W = x.shape
    Hp, Wp = H + 2, W + 2
    lout, lpad = H * Wp, Hp * Wp + 2
    xp = jnp.pad(x, ((0, 0), (0, 0), (1, 1), (1, 1)),
                 constant_values=-jnp.inf)
    xf = jnp.pad(xp.reshape(N, C, Hp * Wp), ((0, 0), (0, 0), (0, 2)),
                 constant_values=-jnp.inf)
    full = pl.pallas_call(
        functools.partial(_maxpool_kernel, wp=Wp, lout=lout),
        out_shape=jax.ShapeDtypeStruct((N, C, lout), F32),
        grid=(N,),
        in_specs=[pl.BlockSpec((1, C, lpad), lambda n: (n, 0, 0))],
        out_specs=pl.BlockSpec((1, C, lout), lambda n: (n, 0, 0)),
        compiler_params=_PARALLEL,
    )(xf)
    # stride-2 subsample of the stride-1 window maxima == MaxPool2d(3, 2, 1)
    # TODO(synk): compute the stride-2 output directly in-kernel to drop the
    # 4x extra VPU work and the XLA subsample pass at large sizes.
    return full.reshape(N, C, H, Wp)[:, :, ::2, 0:W:2]


# ----------------------------------------------------------------------------
# Upsample(scale=2, bilinear, align_corners=False) as a 4-phase 2x2 stencil
# ----------------------------------------------------------------------------
_UP_W = ((0.25, 0.75), (0.75, 0.25))


def _upsample2x_kernel(x_ref, o_ref, *, wp, lout):
    # x_ref: (1, C, Lpad) edge-padded flattened sample; o_ref: (1, 4, C, lout)
    for a in range(2):
        for b in range(2):
            acc = None
            for da in range(2):
                for db in range(2):
                    coef = _UP_W[a][da] * _UP_W[b][db]
                    tap = x_ref[0, :, pl.ds((a + da) * wp + (b + db), lout)]
                    term = coef * tap
                    acc = term if acc is None else acc + term
            o_ref[0, 2 * a + b, :, :] = acc


def upsample_bilinear_2x(x):
    N, C, H, W = x.shape
    Hp, Wp = H + 2, W + 2
    lout, lpad = H * Wp, Hp * Wp + 2
    xp = jnp.pad(x, ((0, 0), (0, 0), (1, 1), (1, 1)), mode="edge")
    xf = jnp.pad(xp.reshape(N, C, Hp * Wp), ((0, 0), (0, 0), (0, 2)))
    ph = pl.pallas_call(
        functools.partial(_upsample2x_kernel, wp=Wp, lout=lout),
        out_shape=jax.ShapeDtypeStruct((N, 4, C, lout), F32),
        grid=(N,),
        in_specs=[pl.BlockSpec((1, C, lpad), lambda n: (n, 0, 0))],
        out_specs=pl.BlockSpec((1, 4, C, lout), lambda n: (n, 0, 0, 0)),
        compiler_params=_PARALLEL,
    )(xf)
    ph = ph.reshape(N, 2, 2, C, H, Wp)[:, :, :, :, :, :W]      # (N,2,2,C,H,W)
    return ph.transpose(0, 3, 4, 1, 5, 2).reshape(N, C, 2 * H, 2 * W)


# ----------------------------------------------------------------------------
# Elementwise add (out_side + down_up)
# ----------------------------------------------------------------------------
def _add_kernel(a_ref, b_ref, o_ref):
    o_ref[0] = a_ref[0] + b_ref[0]


def add_nchw(a, b):
    N, C, H, W = a.shape
    HW = H * W
    spec = pl.BlockSpec((1, C, HW), lambda n: (n, 0, 0))
    out = pl.pallas_call(
        _add_kernel,
        out_shape=jax.ShapeDtypeStruct((N, C, HW), F32),
        grid=(N,),
        in_specs=[spec, spec],
        out_specs=spec,
        compiler_params=_PARALLEL,
    )(a.reshape(N, C, HW), b.reshape(N, C, HW))
    return out.reshape(N, C, H, W)


# ----------------------------------------------------------------------------
# Fused epilogue: 1x1conv -> ReLU -> 1x1conv -> sigmoid -> trunk * (1 + s)
# ----------------------------------------------------------------------------
def _mask_gate_kernel(x_ref, t_ref, w1, b1, w2, b2, o_ref):
    x = x_ref[0]                                              # (C, HW)
    h = jnp.maximum(
        jnp.dot(w1[...], x, preferred_element_type=jnp.float32) + b1[...], 0.0)
    s = jax.nn.sigmoid(
        jnp.dot(w2[...], h, preferred_element_type=jnp.float32) + b2[...])
    o_ref[0] = t_ref[0] * (1.0 + s)


def mask_gate(out_trunk, soft, w1, b1, w2, b2):
    N, C, H, W = out_trunk.shape
    HW = H * W
    x_spec = pl.BlockSpec((1, C, HW), lambda n: (n, 0, 0))
    w_spec = pl.BlockSpec((C, C), lambda n: (0, 0))
    b_spec = pl.BlockSpec((C, 1), lambda n: (0, 0))
    out = pl.pallas_call(
        _mask_gate_kernel,
        out_shape=jax.ShapeDtypeStruct((N, C, HW), F32),
        grid=(N,),
        in_specs=[x_spec, x_spec, w_spec, b_spec, w_spec, b_spec],
        out_specs=x_spec,
        compiler_params=_PARALLEL,
    )(soft.reshape(N, C, HW), out_trunk.reshape(N, C, HW),
      w1, b1.reshape(C, 1), w2, b2.reshape(C, 1))
    return out.reshape(N, C, H, W)


# ----------------------------------------------------------------------------
# Module-level composition (mirrors the PyTorch forward graph)
# ----------------------------------------------------------------------------
def residual_block(x, p):
    t = conv3x3(x, p["w1"], p["b1"])                 # conv1 + act1
    t = bn_relu(t, None, p["g1"], p["be1"])          # norm1 + normact
    t = conv3x3(t, p["w2"], p["b2"])                 # conv2 + act2
    return bn_relu(t, x, p["g2"], p["be2"])          # norm(shortcut+out2)+act3


def ra_block(x, p, variant):
    x = residual_block(x, p["rb"])
    return attention(x, p["sa"], p["ca"], variant)


def residual_attention_forward(x, p, variant):
    x = ra_block(x, p["top"], variant)
    out_trunk = x
    for tp in p["trunk"]:
        out_trunk = ra_block(out_trunk, tp, variant)
    out1 = ra_block(maxpool2d_3x3_s2_p1(x), p["ra1"], variant)
    out_side = ra_block(out1, p["side"], variant)
    d = out1
    for dp in p["down"]:
        d = ra_block(maxpool2d_3x3_s2_p1(d), dp, variant)
    if p["mid"] is not None:
        d = ra_block(d, p["mid"], variant)
    for up_ in p["up"]:
        d = ra_block(d, up_, variant)
        d = upsample_bilinear_2x(d)
    out_soft = ra_block(add_nchw(out_side, d), p["ra2"], variant)
    out_soft = upsample_bilinear_2x(out_soft)
    # convs (1x1, ReLU, 1x1, Sigmoid) + out_trunk * (1 + out_soft), fused
    return mask_gate(out_trunk, out_soft, p["cw1"], p["cb1"], p["cw2"], p["cb2"])


# ----------------------------------------------------------------------------
# Deterministic parameter construction
# ----------------------------------------------------------------------------
class _KeyGen:
    def __init__(self, key):
        self._key = key

    def __call__(self):
        self._key, sub = jax.random.split(self._key)
        return sub


def _init_ra(kg, C, red, scale=0.3):
    Cr = max(1, C // red)

    def w(shape):
        return scale * jax.random.normal(kg(), shape, F32)

    return {
        "rb": dict(w1=w((C, C, 3, 3)), b1=w((C,)),
                   g1=jnp.ones((C,), F32), be1=jnp.zeros((C,), F32),
                   w2=w((C, C, 3, 3)), b2=w((C,)),
                   g2=jnp.ones((C,), F32), be2=jnp.zeros((C,), F32)),
        "sa": dict(w1=w((Cr, C)), b1=w((Cr,)), w2=w((1, Cr)), b2=w((1,))),
        "ca": dict(w1=w((Cr, C)), b1=w((Cr,)), w2=w((C, Cr)), b2=w((C,))),
    }


def init_residual_attention(kg, C, red, n, scale=0.3):
    return {
        "top": _init_ra(kg, C, red, scale),
        "trunk": [_init_ra(kg, C, red, scale) for _ in range(2)],
        "ra1": _init_ra(kg, C, red, scale),
        "side": _init_ra(kg, C, red, scale),
        "down": [_init_ra(kg, C, red, scale) for _ in range(n)],
        "mid": _init_ra(kg, C, red, scale) if n > 1 else None,
        "up": [_init_ra(kg, C, red, scale) for _ in range(n)],
        "ra2": _init_ra(kg, C, red, scale),
        "cw1": scale * jax.random.normal(kg(), (C, C), F32),
        "cb1": scale * jax.random.normal(kg(), (C,), F32),
        "cw2": scale * jax.random.normal(kg(), (C, C), F32),
        "cb2": scale * jax.random.normal(kg(), (C,), F32),
    }


if __name__ == "__main__":
    channels, height, width, n, red_ratio, variant = 4, 16, 16, 1, 2, "sc"
    kg = _KeyGen(jax.random.PRNGKey(0))
    params = init_residual_attention(kg, channels, red_ratio, n)
    x = jax.random.normal(kg(), (2, channels, height, width), F32)

    fwd = jax.jit(lambda inp: residual_attention_forward(inp, params, variant))
    out = fwd(x)
    jax.block_until_ready(out)

    assert out.shape == (2, channels, height, width), out.shape
    assert bool(jnp.all(jnp.isfinite(out)))
    print("KERNEL_OK")
</pallas_src>

<mosaic_0001>
module attributes {stable_mosaic.version = 11 : i64} {
  func.func @_conv3x3_kernel(%arg0: i32, %arg1: memref<1x4x326xf32, #tpu.memory_space<vmem>>, %arg2: memref<9x4x4xf32, #tpu.memory_space<vmem>>, %arg3: memref<4x1xf32, #tpu.memory_space<vmem>>, %arg4: memref<1x4x288xf32, #tpu.memory_space<vmem>>) attributes {dimension_semantics = [#tpu.dimension_semantics<parallel>], iteration_bounds = array<i64: 2>, scalar_prefetch = 0 : i64, scratch_operands = 0 : i64, tpu.core_type = #tpu.core_type<tc>, window_params = [{transform_indices = @transform_0, window_bounds = array<i64: 1, 4, 326>}, {pipeline_mode = #tpu.pipeline_mode<synchronous>, transform_indices = @transform_1, window_bounds = array<i64: 9, 4, 4>}, {pipeline_mode = #tpu.pipeline_mode<synchronous>, transform_indices = @transform_2, window_bounds = array<i64: 4, 1>}, {transform_indices = @transform_3, window_bounds = array<i64: 1, 4, 288>}]} {
    %cst = arith.constant 0.000000e+00 : f32
    %0 = vector.broadcast %cst : f32 to vector<4x288xf32>
    %c0 = arith.constant 0 : index
    %c0_0 = arith.constant 0 : index
    %c0_1 = arith.constant 0 : index
    %1 = vector.load %arg1[%c0, %c0_0, %c0_1] : memref<1x4x326xf32, #tpu.memory_space<vmem>>, vector<1x4x288xf32>
    %2 = vector.shape_cast %1 : vector<1x4x288xf32> to vector<4x288xf32>
    %c0_2 = arith.constant 0 : index
    %c0_3 = arith.constant 0 : index
    %c0_4 = arith.constant 0 : index
    %3 = vector.load %arg2[%c0_2, %c0_3, %c0_4] : memref<9x4x4xf32, #tpu.memory_space<vmem>>, vector<1x4x4xf32>
    %4 = vector.shape_cast %3 : vector<1x4x4xf32> to vector<4x4xf32>
    %cst_5 = arith.constant dense<0.000000e+00> : vector<4x288xf32>
    %5 = tpu.matmul %4, %2, %cst_5 {dimension_numbers = #tpu.dot_dimension_numbers<[1], [0], [0], [1], [0, 0, 1, 1], [], []>} : vector<4x4xf32>, vector<4x288xf32>, vector<4x288xf32> -> vector<4x288xf32>
    %6 = arith.addf %0, %5 : vector<4x288xf32>
    %c0_6 = arith.constant 0 : index
    %c0_7 = arith.constant 0 : index
    %c1 = arith.constant 1 : index
    %7 = vector.load %arg1[%c0_6, %c0_7, %c1] : memref<1x4x326xf32, #tpu.memory_space<vmem>>, vector<1x4x288xf32>
    %8 = vector.shape_cast %7 : vector<1x4x288xf32> to vector<4x288xf32>
    %c1_8 = arith.constant 1 : index
    %c0_9 = arith.constant 0 : index
    %c0_10 = arith.constant 0 : index
    %9 = vector.load %arg2[%c1_8, %c0_9, %c0_10] : memref<9x4x4xf32, #tpu.memory_space<vmem>>, vector<1x4x4xf32>
    %10 = vector.shape_cast %9 : vector<1x4x4xf32> to vector<4x4xf32>
    %cst_11 = arith.constant dense<0.000000e+00> : vector<4x288xf32>
    %11 = tpu.matmul %10, %8, %cst_11 {dimension_numbers = #tpu.dot_dimension_numbers<[1], [0], [0], [1], [0, 0, 1, 1], [], []>} : vector<4x4xf32>, vector<4x288xf32>, vector<4x288xf32> -> vector<4x288xf32>
    %12 = arith.addf %6, %11 : vector<4x288xf32>
    %c0_12 = arith.constant 0 : index
    %c0_13 = arith.constant 0 : index
    %c2 = arith.constant 2 : index
    %13 = vector.load %arg1[%c0_12, %c0_13, %c2] : memref<1x4x326xf32, #tpu.memory_space<vmem>>, vector<1x4x288xf32>
    %14 = vector.shape_cast %13 : vector<1x4x288xf32> to vector<4x288xf32>
    %c2_14 = arith.constant 2 : index
    %c0_15 = arith.constant 0 : index
    %c0_16 = arith.constant 0 : index
    %15 = vector.load %arg2[%c2_14, %c0_15, %c0_16] : memref<9x4x4xf32, #tpu.memory_space<vmem>>, vector<1x4x4xf32>
    %16 = vector.shape_cast %15 : vector<1x4x4xf32> to vector<4x4xf32>
    %cst_17 = arith.constant dense<0.000000e+00> : vector<4x288xf32>
    %17 = tpu.matmul %16, %14, %cst_17 {dimension_numbers = #tpu.dot_dimension_numbers<[1], [0], [0], [1], [0, 0, 1, 1], [], []>} : vector<4x4xf32>, vector<4x288xf32>, vector<4x288xf32> -> vector<4x288xf32>
    %18 = arith.addf %12, %17 : vector<4x288xf32>
    %c0_18 = arith.constant 0 : index
    %c0_19 = arith.constant 0 : index
    %c18 = arith.constant 18 : index
    %19 = vector.load %arg1[%c0_18, %c0_19, %c18] : memref<1x4x326xf32, #tpu.memory_space<vmem>>, vector<1x4x288xf32>
    %20 = vector.shape_cast %19 : vector<1x4x288xf32> to vector<4x288xf32>
    %c3 = arith.constant 3 : index
    %c0_20 = arith.constant 0 : index
    %c0_21 = arith.constant 0 : index
    %21 = vector.load %arg2[%c3, %c0_20, %c0_21] : memref<9x4x4xf32, #tpu.memory_space<vmem>>, vector<1x4x4xf32>
    %22 = vector.shape_cast %21 : vector<1x4x4xf32> to vector<4x4xf32>
    %cst_22 = arith.constant dense<0.000000e+00> : vector<4x288xf32>
    %23 = tpu.matmul %22, %20, %cst_22 {dimension_numbers = #tpu.dot_dimension_numbers<[1], [0], [0], [1], [0, 0, 1, 1], [], []>} : vector<4x4xf32>, vector<4x288xf32>, vector<4x288xf32> -> vector<4x288xf32>
    %24 = arith.addf %18, %23 : vector<4x288xf32>
    %c0_23 = arith.constant 0 : index
    %c0_24 = arith.constant 0 : index
    %c19 = arith.constant 19 : index
    %25 = vector.load %arg1[%c0_23, %c0_24, %c19] : memref<1x4x326xf32, #tpu.memory_space<vmem>>, vector<1x4x288xf32>
    %26 = vector.shape_cast %25 : vector<1x4x288xf32> to vector<4x288xf32>
    %c4 = arith.constant 4 : index
    %c0_25 = arith.constant 0 : index
    %c0_26 = arith.constant 0 : index
    %27 = vector.load %arg2[%c4, %c0_25, %c0_26] : memref<9x4x4xf32, #tpu.memory_space<vmem>>, vector<1x4x4xf32>
    %28 = vector.shape_cast %27 : vector<1x4x4xf32> to vector<4x4xf32>
    %cst_27 = arith.constant dense<0.000000e+00> : vector<4x288xf32>
    %29 = tpu.matmul %28, %26, %cst_27 {dimension_numbers = #tpu.dot_dimension_numbers<[1], [0], [0], [1], [0, 0, 1, 1], [], []>} : vector<4x4xf32>, vector<4x288xf32>, vector<4x288xf32> -> vector<4x288xf32>
    %30 = arith.addf %24, %29 : vector<4x288xf32>
    %c0_28 = arith.constant 0 : index
    %c0_29 = arith.constant 0 : index
    %c20 = arith.constant 20 : index
    %31 = vector.load %arg1[%c0_28, %c0_29, %c20] : memref<1x4x326xf32, #tpu.memory_space<vmem>>, vector<1x4x288xf32>
    %32 = vector.shape_cast %31 : vector<1x4x288xf32> to vector<4x288xf32>
    %c5 = arith.constant 5 : index
    %c0_30 = arith.constant 0 : index
    %c0_31 = arith.constant 0 : index
    %33 = vector.load %arg2[%c5, %c0_30, %c0_31] : memref<9x4x4xf32, #tpu.memory_space<vmem>>, vector<1x4x4xf32>
    %34 = vector.shape_cast %33 : vector<1x4x4xf32> to vector<4x4xf32>
    %cst_32 = arith.constant dense<0.000000e+00> : vector<4x288xf32>
    %35 = tpu.matmul %34, %32, %cst_32 {dimension_numbers = #tpu.dot_dimension_numbers<[1], [0], [0], [1], [0, 0, 1, 1], [], []>} : vector<4x4xf32>, vector<4x288xf32>, vector<4x288xf32> -> vector<4x288xf32>
    %36 = arith.addf %30, %35 : vector<4x288xf32>
    %c0_33 = arith.constant 0 : index
    %c0_34 = arith.constant 0 : index
    %c36 = arith.constant 36 : index
    %37 = vector.load %arg1[%c0_33, %c0_34, %c36] : memref<1x4x326xf32, #tpu.memory_space<vmem>>, vector<1x4x288xf32>
    %38 = vector.shape_cast %37 : vector<1x4x288xf32> to vector<4x288xf32>
    %c6 = arith.constant 6 : index
    %c0_35 = arith.constant 0 : index
    %c0_36 = arith.constant 0 : index
    %39 = vector.load %arg2[%c6, %c0_35, %c0_36] : memref<9x4x4xf32, #tpu.memory_space<vmem>>, vector<1x4x4xf32>
    %40 = vector.shape_cast %39 : vector<1x4x4xf32> to vector<4x4xf32>
    %cst_37 = arith.constant dense<0.000000e+00> : vector<4x288xf32>
    %41 = tpu.matmul %40, %38, %cst_37 {dimension_numbers = #tpu.dot_dimension_numbers<[1], [0], [0], [1], [0, 0, 1, 1], [], []>} : vector<4x4xf32>, vector<4x288xf32>, vector<4x288xf32> -> vector<4x288xf32>
    %42 = arith.addf %36, %41 : vector<4x288xf32>
    %c0_38 = arith.constant 0 : index
    %c0_39 = arith.constant 0 : index
    %c37 = arith.constant 37 : index
    %43 = vector.load %arg1[%c0_38, %c0_39, %c37] : memref<1x4x326xf32, #tpu.memory_space<vmem>>, vector<1x4x288xf32>
    %44 = vector.shape_cast %43 : vector<1x4x288xf32> to vector<4x288xf32>
    %c7 = arith.constant 7 : index
    %c0_40 = arith.constant 0 : index
    %c0_41 = arith.constant 0 : index
    %45 = vector.load %arg2[%c7, %c0_40, %c0_41] : memref<9x4x4xf32, #tpu.memory_space<vmem>>, vector<1x4x4xf32>
    %46 = vector.shape_cast %45 : vector<1x4x4xf32> to vector<4x4xf32>
    %cst_42 = arith.constant dense<0.000000e+00> : vector<4x288xf32>
    %47 = tpu.matmul %46, %44, %cst_42 {dimension_numbers = #tpu.dot_dimension_numbers<[1], [0], [0], [1], [0, 0, 1, 1], [], []>} : vector<4x4xf32>, vector<4x288xf32>, vector<4x288xf32> -> vector<4x288xf32>
    %48 = arith.addf %42, %47 : vector<4x288xf32>
    %c0_43 = arith.constant 0 : index
    %c0_44 = arith.constant 0 : index
    %c38 = arith.constant 38 : index
    %49 = vector.load %arg1[%c0_43, %c0_44, %c38] : memref<1x4x326xf32, #tpu.memory_space<vmem>>, vector<1x4x288xf32>
    %50 = vector.shape_cast %49 : vector<1x4x288xf32> to vector<4x288xf32>
    %c8 = arith.constant 8 : index
    %c0_45 = arith.constant 0 : index
    %c0_46 = arith.constant 0 : index
    %51 = vector.load %arg2[%c8, %c0_45, %c0_46] : memref<9x4x4xf32, #tpu.memory_space<vmem>>, vector<1x4x4xf32>
    %52 = vector.shape_cast %51 : vector<1x4x4xf32> to vector<4x4xf32>
    %cst_47 = arith.constant dense<0.000000e+00> : vector<4x288xf32>
    %53 = tpu.matmul %52, %50, %cst_47 {dimension_numbers = #tpu.dot_dimension_numbers<[1], [0], [0], [1], [0, 0, 1, 1], [], []>} : vector<4x4xf32>, vector<4x288xf32>, vector<4x288xf32> -> vector<4x288xf32>
    %54 = arith.addf %48, %53 : vector<4x288xf32>
    %c0_48 = arith.constant 0 : index
    %c0_49 = arith.constant 0 : index
    %55 = vector.load %arg3[%c0_48, %c0_49] : memref<4x1xf32, #tpu.memory_space<vmem>>, vector<4x1xf32>
    %56 = vector.broadcast %55 : vector<4x1xf32> to vector<4x288xf32>
    %57 = arith.addf %54, %56 : vector<4x288xf32>
    %cst_50 = arith.constant 0.000000e+00 : f32
    %58 = vector.broadcast %cst_50 : f32 to vector<4x288xf32>
    %59 = arith.maximumf %57, %58 : vector<4x288xf32>
    %c0_51 = arith.constant 0 : index
    %c0_52 = arith.constant 0 : index
    %c0_53 = arith.constant 0 : index
    %60 = vector.load %arg4[%c0_51, %c0_52, %c0_53] : memref<1x4x288xf32, #tpu.memory_space<vmem>>, vector<1x4x288xf32>
    %61 = vector.shape_cast %60 : vector<1x4x288xf32> to vector<4x288xf32>
    %62 = vector.shape_cast %59 : vector<4x288xf32> to vector<1x4x288xf32>
    tpu.vector_store %arg4[%c0_51, %c0_52, %c0_53], %62 {strides = array<i32>} : memref<1x4x288xf32, #tpu.memory_space<vmem>>, vector<1x4x288xf32>,
    return
  }
  func.func @transform_0(%arg0: i32) -> (i32, i32, i32) {
    %c0_i32 = arith.constant 0 : i32
    %c0_i32_0 = arith.constant 0 : i32
    %c0_i32_1 = arith.constant 0 : i32
    return %arg0, %c0_i32, %c0_i32_0 : i32, i32, i32
  }
  func.func @transform_1(%arg0: i32) -> (i32, i32, i32) {
    %c0_i32 = arith.constant 0 : i32
    %c0_i32_0 = arith.constant 0 : i32
    %c0_i32_1 = arith.constant 0 : i32
    %c0_i32_2 = arith.constant 0 : i32
    return %c0_i32, %c0_i32_0, %c0_i32_1 : i32, i32, i32
  }
  func.func @transform_2(%arg0: i32) -> (i32, i32) {
    %c0_i32 = arith.constant 0 : i32
    %c0_i32_0 = arith.constant 0 : i32
    %c0_i32_1 = arith.constant 0 : i32
    return %c0_i32, %c0_i32_0 : i32, i32
  }
  func.func @transform_3(%arg0: i32) -> (i32, i32, i32) {
    %c0_i32 = arith.constant 0 : i32
    %c0_i32_0 = arith.constant 0 : i32
    %c0_i32_1 = arith.constant 0 : i32
    return %arg0, %c0_i32, %c0_i32_0 : i32, i32, i32
  }
}

module attributes {stable_mosaic.version = 11 : i64} {
  func.func @_bn_stats_kernel(%arg0: i32, %arg1: memref<1x4x256xf32, #tpu.memory_space<vmem>>, %arg2: memref<4x1xf32, #tpu.memory_space<vmem>>, %arg3: memref<4x1xf32, #tpu.memory_space<vmem>>) attributes {dimension_semantics = [#tpu.dimension_semantics<arbitrary>], iteration_bounds = array<i64: 2>, scalar_prefetch = 0 : i64, scratch_operands = 0 : i64, tpu.core_type = #tpu.core_type<tc>, window_params = [{transform_indices = @transform_0, window_bounds = array<i64: 1, 4, 256>}, {pipeline_mode = #tpu.pipeline_mode<synchronous>, transform_indices = @transform_1, window_bounds = array<i64: 4, 1>}, {pipeline_mode = #tpu.pipeline_mode<synchronous>, transform_indices = @transform_2, window_bounds = array<i64: 4, 1>}]} {
    %c0_i32 = arith.constant 0 : i32
    %0 = arith.cmpi eq, %arg0, %c0_i32 : i32
    %1 = arith.extui %0 : i1 to i32
    %c0_i32_0 = arith.constant 0 : i32
    %2 = arith.cmpi ne, %1, %c0_i32_0 : i32
    scf.if %2 {
      %cst_12 = arith.constant 0.000000e+00 : f32
      %16 = vector.broadcast %cst_12 : f32 to vector<4x1xf32>
      %c0_13 = arith.constant 0 : index
      %c0_14 = arith.constant 0 : index
      %17 = vector.load %arg2[%c0_13, %c0_14] : memref<4x1xf32, #tpu.memory_space<vmem>>, vector<4x1xf32>
      tpu.vector_store %arg2[%c0_13, %c0_14], %16 {strides = array<i32>} : memref<4x1xf32, #tpu.memory_space<vmem>>, vector<4x1xf32>,
      %cst_15 = arith.constant 0.000000e+00 : f32
      %18 = vector.broadcast %cst_15 : f32 to vector<4x1xf32>
      %c0_16 = arith.constant 0 : index
      %c0_17 = arith.constant 0 : index
      %19 = vector.load %arg3[%c0_16, %c0_17] : memref<4x1xf32, #tpu.memory_space<vmem>>, vector<4x1xf32>
      tpu.vector_store %arg3[%c0_16, %c0_17], %18 {strides = array<i32>} : memref<4x1xf32, #tpu.memory_space<vmem>>, vector<4x1xf32>,
    } else {
    }
    %c0 = arith.constant 0 : index
    %c0_1 = arith.constant 0 : index
    %c0_2 = arith.constant 0 : index
    %3 = vector.load %arg1[%c0, %c0_1, %c0_2] : memref<1x4x256xf32, #tpu.memory_space<vmem>>, vector<1x4x256xf32>
    %4 = vector.shape_cast %3 : vector<1x4x256xf32> to vector<4x256xf32>
    %c0_3 = arith.constant 0 : index
    %c0_4 = arith.constant 0 : index
    %5 = vector.load %arg2[%c0_3, %c0_4] : memref<4x1xf32, #tpu.memory_space<vmem>>, vector<4x1xf32>
    %cst = arith.constant dense<0.000000e+00> : vector<4xf32>
    %6 = vector.multi_reduction <add>, %4, %cst [1] : vector<4x256xf32> to vector<4xf32>
    %7 = vector.shape_cast %6 : vector<4xf32> to vector<4x1xf32>
    %8 = arith.addf %5, %7 : vector<4x1xf32>
    %c0_5 = arith.constant 0 : index
    %c0_6 = arith.constant 0 : index
    %9 = vector.load %arg2[%c0_5, %c0_6] : memref<4x1xf32, #tpu.memory_space<vmem>>, vector<4x1xf32>
    tpu.vector_store %arg2[%c0_5, %c0_6], %8 {strides = array<i32>} : memref<4x1xf32, #tpu.memory_space<vmem>>, vector<4x1xf32>,
    %c0_7 = arith.constant 0 : index
    %c0_8 = arith.constant 0 : index
    %10 = vector.load %arg3[%c0_7, %c0_8] : memref<4x1xf32, #tpu.memory_space<vmem>>, vector<4x1xf32>
    %11 = arith.mulf %4, %4 : vector<4x256xf32>
    %cst_9 = arith.constant dense<0.000000e+00> : vector<4xf32>
    %12 = vector.multi_reduction <add>, %11, %cst_9 [1] : vector<4x256xf32> to vector<4xf32>
    %13 = vector.shape_cast %12 : vector<4xf32> to vector<4x1xf32>
    %14 = arith.addf %10, %13 : vector<4x1xf32>
    %c0_10 = arith.constant 0 : index
    %c0_11 = arith.constant 0 : index
    %15 = vector.load %arg3[%c0_10, %c0_11] : memref<4x1xf32, #tpu.memory_space<vmem>>, vector<4x1xf32>
    tpu.vector_store %arg3[%c0_10, %c0_11], %14 {strides = array<i32>} : memref<4x1xf32, #tpu.memory_space<vmem>>, vector<4x1xf32>,
    return
  }
  func.func @transform_0(%arg0: i32) -> (i32, i32, i32) {
    %c0_i32 = arith.constant 0 : i32
    %c0_i32_0 = arith.constant 0 : i32
    %c0_i32_1 = arith.constant 0 : i32
    return %arg0, %c0_i32, %c0_i32_0 : i32, i32, i32
  }
  func.func @transform_1(%arg0: i32) -> (i32, i32) {
    %c0_i32 = arith.constant 0 : i32
    %c0_i32_0 = arith.constant 0 : i32
    %c0_i32_1 = arith.constant 0 : i32
    return %c0_i32, %c0_i32_0 : i32, i32
  }
  func.func @transform_2(%arg0: i32) -> (i32, i32) {
    %c0_i32 = arith.constant 0 : i32
    %c0_i32_0 = arith.constant 0 : i32
    %c0_i32_1 = arith.constant 0 : i32
    return %c0_i32, %c0_i32_0 : i32, i32
  }
}

module attributes {stable_mosaic.version = 11 : i64} {
  func.func @_bn_norm_kernel(%arg0: i32, %arg1: memref<1x4x256xf32, #tpu.memory_space<vmem>>, %arg2: memref<4x1xf32, #tpu.memory_space<vmem>>, %arg3: memref<4x1xf32, #tpu.memory_space<vmem>>, %arg4: memref<1x4x256xf32, #tpu.memory_space<vmem>>) attributes {dimension_semantics = [#tpu.dimension_semantics<parallel>], iteration_bounds = array<i64: 2>, scalar_prefetch = 0 : i64, scratch_operands = 0 : i64, tpu.core_type = #tpu.core_type<tc>, window_params = [{transform_indices = @transform_0, window_bounds = array<i64: 1, 4, 256>}, {pipeline_mode = #tpu.pipeline_mode<synchronous>, transform_indices = @transform_1, window_bounds = array<i64: 4, 1>}, {pipeline_mode = #tpu.pipeline_mode<synchronous>, transform_indices = @transform_2, window_bounds = array<i64: 4, 1>}, {transform_indices = @transform_3, window_bounds = array<i64: 1, 4, 256>}]} {
    %c0 = arith.constant 0 : index
    %c0_0 = arith.constant 0 : index
    %c0_1 = arith.constant 0 : index
    %0 = vector.load %arg1[%c0, %c0_0, %c0_1] : memref<1x4x256xf32, #tpu.memory_space<vmem>>, vector<1x4x256xf32>
    %1 = vector.shape_cast %0 : vector<1x4x256xf32> to vector<4x256xf32>
    %c0_2 = arith.constant 0 : index
    %c0_3 = arith.constant 0 : index
    %2 = vector.load %arg2[%c0_2, %c0_3] : memref<4x1xf32, #tpu.memory_space<vmem>>, vector<4x1xf32>
    %3 = vector.broadcast %2 : vector<4x1xf32> to vector<4x256xf32>
    %4 = arith.mulf %1, %3 : vector<4x256xf32>
    %c0_4 = arith.constant 0 : index
    %c0_5 = arith.constant 0 : index
    %5 = vector.load %arg3[%c0_4, %c0_5] : memref<4x1xf32, #tpu.memory_space<vmem>>, vector<4x1xf32>
    %6 = vector.broadcast %5 : vector<4x1xf32> to vector<4x256xf32>
    %7 = arith.addf %4, %6 : vector<4x256xf32>
    %cst = arith.constant 0.000000e+00 : f32
    %8 = vector.broadcast %cst : f32 to vector<4x256xf32>
    %9 = arith.maximumf %7, %8 : vector<4x256xf32>
    %c0_6 = arith.constant 0 : index
    %c0_7 = arith.constant 0 : index
    %c0_8 = arith.constant 0 : index
    %10 = vector.load %arg4[%c0_6, %c0_7, %c0_8] : memref<1x4x256xf32, #tpu.memory_space<vmem>>, vector<1x4x256xf32>
    %11 = vector.shape_cast %10 : vector<1x4x256xf32> to vector<4x256xf32>
    %12 = vector.shape_cast %9 : vector<4x256xf32> to vector<1x4x256xf32>
    tpu.vector_store %arg4[%c0_6, %c0_7, %c0_8], %12 {strides = array<i32>} : memref<1x4x256xf32, #tpu.memory_space<vmem>>, vector<1x4x256xf32>,
    return
  }
  func.func @transform_0(%arg0: i32) -> (i32, i32, i32) {
    %c0_i32 = arith.constant 0 : i32
    %c0_i32_0 = arith.constant 0 : i32
    %c0_i32_1 = arith.constant 0 : i32
    return %arg0, %c0_i32, %c0_i32_0 : i32, i32, i32
  }
  func.func @transform_1(%arg0: i32) -> (i32, i32) {
    %c0_i32 = arith.constant 0 : i32
    %c0_i32_0 = arith.constant 0 : i32
    %c0_i32_1 = arith.constant 0 : i32
    return %c0_i32, %c0_i32_0 : i32, i32
  }
  func.func @transform_2(%arg0: i32) -> (i32, i32) {
    %c0_i32 = arith.constant 0 : i32
    %c0_i32_0 = arith.constant 0 : i32
    %c0_i32_1 = arith.constant 0 : i32
    return %c0_i32, %c0_i32_0 : i32, i32
  }
  func.func @transform_3(%arg0: i32) -> (i32, i32, i32) {
    %c0_i32 = arith.constant 0 : i32
    %c0_i32_0 = arith.constant 0 : i32
    %c0_i32_1 = arith.constant 0 : i32
    return %arg0, %c0_i32, %c0_i32_0 : i32, i32, i32
  }
}

module attributes {stable_mosaic.version = 11 : i64} {
  func.func @_bn_stats_res_kernel(%arg0: i32, %arg1: memref<1x4x256xf32, #tpu.memory_space<vmem>>, %arg2: memref<1x4x256xf32, #tpu.memory_space<vmem>>, %arg3: memref<4x1xf32, #tpu.memory_space<vmem>>, %arg4: memref<4x1xf32, #tpu.memory_space<vmem>>) attributes {dimension_semantics = [#tpu.dimension_semantics<arbitrary>], iteration_bounds = array<i64: 2>, scalar_prefetch = 0 : i64, scratch_operands = 0 : i64, tpu.core_type = #tpu.core_type<tc>, window_params = [{transform_indices = @transform_0, window_bounds = array<i64: 1, 4, 256>}, {transform_indices = @transform_1, window_bounds = array<i64: 1, 4, 256>}, {pipeline_mode = #tpu.pipeline_mode<synchronous>, transform_indices = @transform_2, window_bounds = array<i64: 4, 1>}, {pipeline_mode = #tpu.pipeline_mode<synchronous>, transform_indices = @transform_3, window_bounds = array<i64: 4, 1>}]} {
    %c0_i32 = arith.constant 0 : i32
    %0 = arith.cmpi eq, %arg0, %c0_i32 : i32
    %1 = arith.extui %0 : i1 to i32
    %c0_i32_0 = arith.constant 0 : i32
    %2 = arith.cmpi ne, %1, %c0_i32_0 : i32
    scf.if %2 {
      %cst_15 = arith.constant 0.000000e+00 : f32
      %19 = vector.broadcast %cst_15 : f32 to vector<4x1xf32>
      %c0_16 = arith.constant 0 : index
      %c0_17 = arith.constant 0 : index
      %20 = vector.load %arg3[%c0_16, %c0_17] : memref<4x1xf32, #tpu.memory_space<vmem>>, vector<4x1xf32>
      tpu.vector_store %arg3[%c0_16, %c0_17], %19 {strides = array<i32>} : memref<4x1xf32, #tpu.memory_space<vmem>>, vector<4x1xf32>,
      %cst_18 = arith.constant 0.000000e+00 : f32
      %21 = vector.broadcast %cst_18 : f32 to vector<4x1xf32>
      %c0_19 = arith.constant 0 : index
      %c0_20 = arith.constant 0 : index
      %22 = vector.load %arg4[%c0_19, %c0_20] : memref<4x1xf32, #tpu.memory_space<vmem>>, vector<4x1xf32>
      tpu.vector_store %arg4[%c0_19, %c0_20], %21 {strides = array<i32>} : memref<4x1xf32, #tpu.memory_space<vmem>>, vector<4x1xf32>,
    } else {
    }
    %c0 = arith.constant 0 : index
    %c0_1 = arith.constant 0 : index
    %c0_2 = arith.constant 0 : index
    %3 = vector.load %arg1[%c0, %c0_1, %c0_2] : memref<1x4x256xf32, #tpu.memory_space<vmem>>, vector<1x4x256xf32>
    %4 = vector.shape_cast %3 : vector<1x4x256xf32> to vector<4x256xf32>
    %c0_3 = arith.constant 0 : index
    %c0_4 = arith.constant 0 : index
    %c0_5 = arith.constant 0 : index
    %5 = vector.load %arg2[%c0_3, %c0_4, %c0_5] : memref<1x4x256xf32, #tpu.memory_space<vmem>>, vector<1x4x256xf32>
    %6 = vector.shape_cast %5 : vector<1x4x256xf32> to vector<4x256xf32>
    %7 = arith.addf %4, %6 : vector<4x256xf32>
    %c0_6 = arith.constant 0 : index
    %c0_7 = arith.constant 0 : index
    %8 = vector.load %arg3[%c0_6, %c0_7] : memref<4x1xf32, #tpu.memory_space<vmem>>, vector<4x1xf32>
    %cst = arith.constant dense<0.000000e+00> : vector<4xf32>
    %9 = vector.multi_reduction <add>, %7, %cst [1] : vector<4x256xf32> to vector<4xf32>
    %10 = vector.shape_cast %9 : vector<4xf32> to vector<4x1xf32>
    %11 = arith.addf %8, %10 : vector<4x1xf32>
    %c0_8 = arith.constant 0 : index
    %c0_9 = arith.constant 0 : index
    %12 = vector.load %arg3[%c0_8, %c0_9] : memref<4x1xf32, #tpu.memory_space<vmem>>, vector<4x1xf32>
    tpu.vector_store %arg3[%c0_8, %c0_9], %11 {strides = array<i32>} : memref<4x1xf32, #tpu.memory_space<vmem>>, vector<4x1xf32>,
    %c0_10 = arith.constant 0 : index
    %c0_11 = arith.constant 0 : index
    %13 = vector.load %arg4[%c0_10, %c0_11] : memref<4x1xf32, #tpu.memory_space<vmem>>, vector<4x1xf32>
    %14 = arith.mulf %7, %7 : vector<4x256xf32>
    %cst_12 = arith.constant dense<0.000000e+00> : vector<4xf32>
    %15 = vector.multi_reduction <add>, %14, %cst_12 [1] : vector<4x256xf32> to vector<4xf32>
    %16 = vector.shape_cast %15 : vector<4xf32> to vector<4x1xf32>
    %17 = arith.addf %13, %16 : vector<4x1xf32>
    %c0_13 = arith.constant 0 : index
    %c0_14 = arith.constant 0 : index
    %18 = vector.load %arg4[%c0_13, %c0_14] : memref<4x1xf32, #tpu.memory_space<vmem>>, vector<4x1xf32>
    tpu.vector_store %arg4[%c0_13, %c0_14], %17 {strides = array<i32>} : memref<4x1xf32, #tpu.memory_space<vmem>>, vector<4x1xf32>,
    return
  }
  func.func @transform_0(%arg0: i32) -> (i32, i32, i32) {
    %c0_i32 = arith.constant 0 : i32
    %c0_i32_0 = arith.constant 0 : i32
    %c0_i32_1 = arith.constant 0 : i32
    return %arg0, %c0_i32, %c0_i32_0 : i32, i32, i32
  }
  func.func @transform_1(%arg0: i32) -> (i32, i32, i32) {
    %c0_i32 = arith.constant 0 : i32
    %c0_i32_0 = arith.constant 0 : i32
    %c0_i32_1 = arith.constant 0 : i32
    return %arg0, %c0_i32, %c0_i32_0 : i32, i32, i32
  }
  func.func @transform_2(%arg0: i32) -> (i32, i32) {
    %c0_i32 = arith.constant 0 : i32
    %c0_i32_0 = arith.constant 0 : i32
    %c0_i32_1 = arith.constant 0 : i32
    return %c0_i32, %c0_i32_0 : i32, i32
  }
  func.func @transform_3(%arg0: i32) -> (i32, i32) {
    %c0_i32 = arith.constant 0 : i32
    %c0_i32_0 = arith.constant 0 : i32
    %c0_i32_1 = arith.constant 0 : i32
    return %c0_i32, %c0_i32_0 : i32, i32
  }
}

module attributes {stable_mosaic.version = 11 : i64} {
  func.func @_bn_norm_res_kernel(%arg0: i32, %arg1: memref<1x4x256xf32, #tpu.memory_space<vmem>>, %arg2: memref<1x4x256xf32, #tpu.memory_space<vmem>>, %arg3: memref<4x1xf32, #tpu.memory_space<vmem>>, %arg4: memref<4x1xf32, #tpu.memory_space<vmem>>, %arg5: memref<1x4x256xf32, #tpu.memory_space<vmem>>) attributes {dimension_semantics = [#tpu.dimension_semantics<parallel>], iteration_bounds = array<i64: 2>, scalar_prefetch = 0 : i64, scratch_operands = 0 : i64, tpu.core_type = #tpu.core_type<tc>, window_params = [{transform_indices = @transform_0, window_bounds = array<i64: 1, 4, 256>}, {transform_indices = @transform_1, window_bounds = array<i64: 1, 4, 256>}, {pipeline_mode = #tpu.pipeline_mode<synchronous>, transform_indices = @transform_2, window_bounds = array<i64: 4, 1>}, {pipeline_mode = #tpu.pipeline_mode<synchronous>, transform_indices = @transform_3, window_bounds = array<i64: 4, 1>}, {transform_indices = @transform_4, window_bounds = array<i64: 1, 4, 256>}]} {
    %c0 = arith.constant 0 : index
    %c0_0 = arith.constant 0 : index
    %c0_1 = arith.constant 0 : index
    %0 = vector.load %arg1[%c0, %c0_0, %c0_1] : memref<1x4x256xf32, #tpu.memory_space<vmem>>, vector<1x4x256xf32>
    %1 = vector.shape_cast %0 : vector<1x4x256xf32> to vector<4x256xf32>
    %c0_2 = arith.constant 0 : index
    %c0_3 = arith.constant 0 : index
    %c0_4 = arith.constant 0 : index
    %2 = vector.load %arg2[%c0_2, %c0_3, %c0_4] : memref<1x4x256xf32, #tpu.memory_space<vmem>>, vector<1x4x256xf32>
    %3 = vector.shape_cast %2 : vector<1x4x256xf32> to vector<4x256xf32>
    %4 = arith.addf %1, %3 : vector<4x256xf32>
    %c0_5 = arith.constant 0 : index
    %c0_6 = arith.constant 0 : index
    %5 = vector.load %arg3[%c0_5, %c0_6] : memref<4x1xf32, #tpu.memory_space<vmem>>, vector<4x1xf32>
    %6 = vector.broadcast %5 : vector<4x1xf32> to vector<4x256xf32>
    %7 = arith.mulf %4, %6 : vector<4x256xf32>
    %c0_7 = arith.constant 0 : index
    %c0_8 = arith.constant 0 : index
    %8 = vector.load %arg4[%c0_7, %c0_8] : memref<4x1xf32, #tpu.memory_space<vmem>>, vector<4x1xf32>
    %9 = vector.broadcast %8 : vector<4x1xf32> to vector<4x256xf32>
    %10 = arith.addf %7, %9 : vector<4x256xf32>
    %cst = arith.constant 0.000000e+00 : f32
    %11 = vector.broadcast %cst : f32 to vector<4x256xf32>
    %12 = arith.maximumf %10, %11 : vector<4x256xf32>
    %c0_9 = arith.constant 0 : index
    %c0_10 = arith.constant 0 : index
    %c0_11 = arith.constant 0 : index
    %13 = vector.load %arg5[%c0_9, %c0_10, %c0_11] : memref<1x4x256xf32, #tpu.memory_space<vmem>>, vector<1x4x256xf32>
    %14 = vector.shape_cast %13 : vector<1x4x256xf32> to vector<4x256xf32>
    %15 = vector.shape_cast %12 : vector<4x256xf32> to vector<1x4x256xf32>
    tpu.vector_store %arg5[%c0_9, %c0_10, %c0_11], %15 {strides = array<i32>} : memref<1x4x256xf32, #tpu.memory_space<vmem>>, vector<1x4x256xf32>,
    return
  }
  func.func @transform_0(%arg0: i32) -> (i32, i32, i32) {
    %c0_i32 = arith.constant 0 : i32
    %c0_i32_0 = arith.constant 0 : i32
    %c0_i32_1 = arith.constant 0 : i32
    return %arg0, %c0_i32, %c0_i32_0 : i32, i32, i32
  }
  func.func @transform_1(%arg0: i32) -> (i32, i32, i32) {
    %c0_i32 = arith.constant 0 : i32
    %c0_i32_0 = arith.constant 0 : i32
    %c0_i32_1 = arith.constant 0 : i32
    return %arg0, %c0_i32, %c0_i32_0 : i32, i32, i32
  }
  func.func @transform_2(%arg0: i32) -> (i32, i32) {
    %c0_i32 = arith.constant 0 : i32
    %c0_i32_0 = arith.constant 0 : i32
    %c0_i32_1 = arith.constant 0 : i32
    return %c0_i32, %c0_i32_0 : i32, i32
  }
  func.func @transform_3(%arg0: i32) -> (i32, i32) {
    %c0_i32 = arith.constant 0 : i32
    %c0_i32_0 = arith.constant 0 : i32
    %c0_i32_1 = arith.constant 0 : i32
    return %c0_i32, %c0_i32_0 : i32, i32
  }
  func.func @transform_4(%arg0: i32) -> (i32, i32, i32) {
    %c0_i32 = arith.constant 0 : i32
    %c0_i32_0 = arith.constant 0 : i32
    %c0_i32_1 = arith.constant 0 : i32
    return %arg0, %c0_i32, %c0_i32_0 : i32, i32, i32
  }
}

module attributes {stable_mosaic.version = 11 : i64} {
  func.func @_attn_kernel(%arg0: i32, %arg1: memref<1x4x256xf32, #tpu.memory_space<vmem>>, %arg2: memref<2x4xf32, #tpu.memory_space<vmem>>, %arg3: memref<2x1xf32, #tpu.memory_space<vmem>>, %arg4: memref<1x2xf32, #tpu.memory_space<vmem>>, %arg5: memref<1x1xf32, #tpu.memory_space<vmem>>, %arg6: memref<2x4xf32, #tpu.memory_space<vmem>>, %arg7: memref<2x1xf32, #tpu.memory_space<vmem>>, %arg8: memref<4x2xf32, #tpu.memory_space<vmem>>, %arg9: memref<4x1xf32, #tpu.memory_space<vmem>>, %arg10: memref<1x4x256xf32, #tpu.memory_space<vmem>>) attributes {dimension_semantics = [#tpu.dimension_semantics<parallel>], iteration_bounds = array<i64: 2>, scalar_prefetch = 0 : i64, scratch_operands = 0 : i64, tpu.core_type = #tpu.core_type<tc>, window_params = [{transform_indices = @transform_0, window_bounds = array<i64: 1, 4, 256>}, {pipeline_mode = #tpu.pipeline_mode<synchronous>, transform_indices = @transform_1, window_bounds = array<i64: 2, 4>}, {pipeline_mode = #tpu.pipeline_mode<synchronous>, transform_indices = @transform_2, window_bounds = array<i64: 2, 1>}, {pipeline_mode = #tpu.pipeline_mode<synchronous>, transform_indices = @transform_3, window_bounds = array<i64: 1, 2>}, {pipeline_mode = #tpu.pipeline_mode<synchronous>, transform_indices = @transform_4, window_bounds = array<i64: 1, 1>}, {pipeline_mode = #tpu.pipeline_mode<synchronous>, transform_indices = @transform_5, window_bounds = array<i64: 2, 4>}, {pipeline_mode = #tpu.pipeline_mode<synchronous>, transform_indices = @transform_6, window_bounds = array<i64: 2, 1>}, {pipeline_mode = #tpu.pipeline_mode<synchronous>, transform_indices = @transform_7, window_bounds = array<i64: 4, 2>}, {pipeline_mode = #tpu.pipeline_mode<synchronous>, transform_indices = @transform_8, window_bounds = array<i64: 4, 1>}, {transform_indices = @transform_9, window_bounds = array<i64: 1, 4, 256>}]} {
    %c0 = arith.constant 0 : index
    %c0_0 = arith.constant 0 : index
    %c0_1 = arith.constant 0 : index
    %0 = vector.load %arg1[%c0, %c0_0, %c0_1] : memref<1x4x256xf32, #tpu.memory_space<vmem>>, vector<1x4x256xf32>
    %1 = vector.shape_cast %0 : vector<1x4x256xf32> to vector<4x256xf32>
    %c0_2 = arith.constant 0 : index
    %c0_3 = arith.constant 0 : index
    %2 = vector.load %arg2[%c0_2, %c0_3] : memref<2x4xf32, #tpu.memory_space<vmem>>, vector<2x4xf32>
    %cst = arith.constant dense<0.000000e+00> : vector<2x256xf32>
    %3 = tpu.matmul %2, %1, %cst {dimension_numbers = #tpu.dot_dimension_numbers<[1], [0], [0], [1], [0, 0, 1, 1], [], []>} : vector<2x4xf32>, vector<4x256xf32>, vector<2x256xf32> -> vector<2x256xf32>
    %c0_4 = arith.constant 0 : index
    %c0_5 = arith.constant 0 : index
    %4 = vector.load %arg3[%c0_4, %c0_5] : memref<2x1xf32, #tpu.memory_space<vmem>>, vector<2x1xf32>
    %5 = vector.broadcast %4 : vector<2x1xf32> to vector<2x256xf32>
    %6 = arith.addf %3, %5 : vector<2x256xf32>
    %cst_6 = arith.constant 0.000000e+00 : f32
    %7 = vector.broadcast %cst_6 : f32 to vector<2x256xf32>
    %8 = arith.maximumf %6, %7 : vector<2x256xf32>
    %c0_7 = arith.constant 0 : index
    %c0_8 = arith.constant 0 : index
    %9 = vector.load %arg4[%c0_7, %c0_8] : memref<1x2xf32, #tpu.memory_space<vmem>>, vector<1x2xf32>
    %cst_9 = arith.constant dense<0.000000e+00> : vector<1x256xf32>
    %10 = tpu.matmul %9, %8, %cst_9 {dimension_numbers = #tpu.dot_dimension_numbers<[1], [0], [0], [1], [0, 0, 1, 1], [], []>} : vector<1x2xf32>, vector<2x256xf32>, vector<1x256xf32> -> vector<1x256xf32>
    %c0_10 = arith.constant 0 : index
    %c0_11 = arith.constant 0 : index
    %11 = vector.load %arg5[%c0_10, %c0_11] : memref<1x1xf32, #tpu.memory_space<vmem>>, vector<1x1xf32>
    %12 = vector.broadcast %11 : vector<1x1xf32> to vector<1x256xf32>
    %13 = arith.addf %10, %12 : vector<1x256xf32>
    %14 = arith.negf %13 : vector<1x256xf32>
    %15 = math.exp %14 : vector<1x256xf32>
    %cst_12 = arith.constant 1.000000e+00 : f32
    %16 = vector.broadcast %cst_12 : f32 to vector<1x256xf32>
    %17 = arith.addf %16, %15 : vector<1x256xf32>
    %18 = arith.divf %16, %17 : vector<1x256xf32>
    %19 = vector.broadcast %18 : vector<1x256xf32> to vector<4x256xf32>
    %20 = arith.mulf %1, %19 : vector<4x256xf32>
    %cst_13 = arith.constant dense<0.000000e+00> : vector<4xf32>
    %21 = vector.multi_reduction <add>, %20, %cst_13 [1] : vector<4x256xf32> to vector<4xf32>
    %22 = vector.shape_cast %21 : vector<4xf32> to vector<4x1xf32>
    %cst_14 = arith.constant 3.906250e-03 : f32
    %23 = vector.broadcast %cst_14 : f32 to vector<4x1xf32>
    %24 = arith.mulf %22, %23 : vector<4x1xf32>
    %c0_15 = arith.constant 0 : index
    %c0_16 = arith.constant 0 : index
    %25 = vector.load %arg6[%c0_15, %c0_16] : memref<2x4xf32, #tpu.memory_space<vmem>>, vector<2x4xf32>
    %cst_17 = arith.constant dense<0.000000e+00> : vector<2x1xf32>
    %26 = tpu.matmul %25, %24, %cst_17 {dimension_numbers = #tpu.dot_dimension_numbers<[1], [0], [0], [1], [0, 0, 1, 1], [], []>} : vector<2x4xf32>, vector<4x1xf32>, vector<2x1xf32> -> vector<2x1xf32>
    %c0_18 = arith.constant 0 : index
    %c0_19 = arith.constant 0 : index
    %27 = vector.load %arg7[%c0_18, %c0_19] : memref<2x1xf32, #tpu.memory_space<vmem>>, vector<2x1xf32>
    %28 = arith.addf %26, %27 : vector<2x1xf32>
    %cst_20 = arith.constant 0.000000e+00 : f32
    %29 = vector.broadcast %cst_20 : f32 to vector<2x1xf32>
    %30 = arith.maximumf %28, %29 : vector<2x1xf32>
    %c0_21 = arith.constant 0 : index
    %c0_22 = arith.constant 0 : index
    %31 = vector.load %arg8[%c0_21, %c0_22] : memref<4x2xf32, #tpu.memory_space<vmem>>, vector<4x2xf32>
    %cst_23 = arith.constant dense<0.000000e+00> : vector<4x1xf32>
    %32 = tpu.matmul %31, %30, %cst_23 {dimension_numbers = #tpu.dot_dimension_numbers<[1], [0], [0], [1], [0, 0, 1, 1], [], []>} : vector<4x2xf32>, vector<2x1xf32>, vector<4x1xf32> -> vector<4x1xf32>
    %c0_24 = arith.constant 0 : index
    %c0_25 = arith.constant 0 : index
    %33 = vector.load %arg9[%c0_24, %c0_25] : memref<4x1xf32, #tpu.memory_space<vmem>>, vector<4x1xf32>
    %34 = arith.addf %32, %33 : vector<4x1xf32>
    %35 = arith.negf %34 : vector<4x1xf32>
    %36 = math.exp %35 : vector<4x1xf32>
    %cst_26 = arith.constant 1.000000e+00 : f32
    %37 = vector.broadcast %cst_26 : f32 to vector<4x1xf32>
    %38 = arith.addf %37, %36 : vector<4x1xf32>
    %39 = arith.divf %37, %38 : vector<4x1xf32>
    %40 = vector.broadcast %39 : vector<4x1xf32> to vector<4x256xf32>
    %41 = arith.mulf %20, %40 : vector<4x256xf32>
    %c0_27 = arith.constant 0 : index
    %c0_28 = arith.constant 0 : index
    %c0_29 = arith.constant 0 : index
    %42 = vector.load %arg10[%c0_27, %c0_28, %c0_29] : memref<1x4x256xf32, #tpu.memory_space<vmem>>, vector<1x4x256xf32>
    %43 = vector.shape_cast %42 : vector<1x4x256xf32> to vector<4x256xf32>
    %44 = vector.shape_cast %41 : vector<4x256xf32> to vector<1x4x256xf32>
    tpu.vector_store %arg10[%c0_27, %c0_28, %c0_29], %44 {strides = array<i32>} : memref<1x4x256xf32, #tpu.memory_space<vmem>>, vector<1x4x256xf32>,
    return
  }
  func.func @transform_0(%arg0: i32) -> (i32, i32, i32) {
    %c0_i32 = arith.constant 0 : i32
    %c0_i32_0 = arith.constant 0 : i32
    %c0_i32_1 = arith.constant 0 : i32
    return %arg0, %c0_i32, %c0_i32_0 : i32, i32, i32
  }
  func.func @transform_1(%arg0: i32) -> (i32, i32) {
    %c0_i32 = arith.constant 0 : i32
    %c0_i32_0 = arith.constant 0 : i32
    %c0_i32_1 = arith.constant 0 : i32
    return %c0_i32, %c0_i32_0 : i32, i32
  }
  func.func @transform_2(%arg0: i32) -> (i32, i32) {
    %c0_i32 = arith.constant 0 : i32
    %c0_i32_0 = arith.constant 0 : i32
    %c0_i32_1 = arith.constant 0 : i32
    return %c0_i32, %c0_i32_0 : i32, i32
  }
  func.func @transform_3(%arg0: i32) -> (i32, i32) {
    %c0_i32 = arith.constant 0 : i32
    %c0_i32_0 = arith.constant 0 : i32
    %c0_i32_1 = arith.constant 0 : i32
    return %c0_i32, %c0_i32_0 : i32, i32
  }
  func.func @transform_4(%arg0: i32) -> (i32, i32) {
    %c0_i32 = arith.constant 0 : i32
    %c0_i32_0 = arith.constant 0 : i32
    %c0_i32_1 = arith.constant 0 : i32
    return %c0_i32, %c0_i32_0 : i32, i32
  }
  func.func @transform_5(%arg0: i32) -> (i32, i32) {
    %c0_i32 = arith.constant 0 : i32
    %c0_i32_0 = arith.constant 0 : i32
    %c0_i32_1 = arith.constant 0 : i32
    return %c0_i32, %c0_i32_0 : i32, i32
  }
  func.func @transform_6(%arg0: i32) -> (i32, i32) {
    %c0_i32 = arith.constant 0 : i32
    %c0_i32_0 = arith.constant 0 : i32
    %c0_i32_1 = arith.constant 0 : i32
    return %c0_i32, %c0_i32_0 : i32, i32
  }
  func.func @transform_7(%arg0: i32) -> (i32, i32) {
    %c0_i32 = arith.constant 0 : i32
    %c0_i32_0 = arith.constant 0 : i32
    %c0_i32_1 = arith.constant 0 : i32
    return %c0_i32, %c0_i32_0 : i32, i32
  }
  func.func @transform_8(%arg0: i32) -> (i32, i32) {
    %c0_i32 = arith.constant 0 : i32
    %c0_i32_0 = arith.constant 0 : i32
    %c0_i32_1 = arith.constant 0 : i32
    return %c0_i32, %c0_i32_0 : i32, i32
  }
  func.func @transform_9(%arg0: i32) -> (i32, i32, i32) {
    %c0_i32 = arith.constant 0 : i32
    %c0_i32_0 = arith.constant 0 : i32
    %c0_i32_1 = arith.constant 0 : i32
    return %arg0, %c0_i32, %c0_i32_0 : i32, i32, i32
  }
}

module attributes {stable_mosaic.version = 11 : i64} {
  func.func @_maxpool_kernel(%arg0: i32, %arg1: memref<1x4x326xf32, #tpu.memory_space<vmem>>, %arg2: memref<1x4x288xf32, #tpu.memory_space<vmem>>) attributes {dimension_semantics = [#tpu.dimension_semantics<parallel>], iteration_bounds = array<i64: 2>, scalar_prefetch = 0 : i64, scratch_operands = 0 : i64, tpu.core_type = #tpu.core_type<tc>, window_params = [{transform_indices = @transform_0, window_bounds = array<i64: 1, 4, 326>}, {transform_indices = @transform_1, window_bounds = array<i64: 1, 4, 288>}]} {
    %c0 = arith.constant 0 : index
    %c0_0 = arith.constant 0 : index
    %c0_1 = arith.constant 0 : index
    %0 = vector.load %arg1[%c0, %c0_0, %c0_1] : memref<1x4x326xf32, #tpu.memory_space<vmem>>, vector<1x4x288xf32>
    %1 = vector.shape_cast %0 : vector<1x4x288xf32> to vector<4x288xf32>
    %c0_2 = arith.constant 0 : index
    %c0_3 = arith.constant 0 : index
    %c1 = arith.constant 1 : index
    %2 = vector.load %arg1[%c0_2, %c0_3, %c1] : memref<1x4x326xf32, #tpu.memory_space<vmem>>, vector<1x4x288xf32>
    %3 = vector.shape_cast %2 : vector<1x4x288xf32> to vector<4x288xf32>
    %4 = arith.maximumf %1, %3 : vector<4x288xf32>
    %c0_4 = arith.constant 0 : index
    %c0_5 = arith.constant 0 : index
    %c2 = arith.constant 2 : index
    %5 = vector.load %arg1[%c0_4, %c0_5, %c2] : memref<1x4x326xf32, #tpu.memory_space<vmem>>, vector<1x4x288xf32>
    %6 = vector.shape_cast %5 : vector<1x4x288xf32> to vector<4x288xf32>
    %7 = arith.maximumf %4, %6 : vector<4x288xf32>
    %c0_6 = arith.constant 0 : index
    %c0_7 = arith.constant 0 : index
    %c18 = arith.constant 18 : index
    %8 = vector.load %arg1[%c0_6, %c0_7, %c18] : memref<1x4x326xf32, #tpu.memory_space<vmem>>, vector<1x4x288xf32>
    %9 = vector.shape_cast %8 : vector<1x4x288xf32> to vector<4x288xf32>
    %10 = arith.maximumf %7, %9 : vector<4x288xf32>
    %c0_8 = arith.constant 0 : index
    %c0_9 = arith.constant 0 : index
    %c19 = arith.constant 19 : index
    %11 = vector.load %arg1[%c0_8, %c0_9, %c19] : memref<1x4x326xf32, #tpu.memory_space<vmem>>, vector<1x4x288xf32>
    %12 = vector.shape_cast %11 : vector<1x4x288xf32> to vector<4x288xf32>
    %13 = arith.maximumf %10, %12 : vector<4x288xf32>
    %c0_10 = arith.constant 0 : index
    %c0_11 = arith.constant 0 : index
    %c20 = arith.constant 20 : index
    %14 = vector.load %arg1[%c0_10, %c0_11, %c20] : memref<1x4x326xf32, #tpu.memory_space<vmem>>, vector<1x4x288xf32>
    %15 = vector.shape_cast %14 : vector<1x4x288xf32> to vector<4x288xf32>
    %16 = arith.maximumf %13, %15 : vector<4x288xf32>
    %c0_12 = arith.constant 0 : index
    %c0_13 = arith.constant 0 : index
    %c36 = arith.constant 36 : index
    %17 = vector.load %arg1[%c0_12, %c0_13, %c36] : memref<1x4x326xf32, #tpu.memory_space<vmem>>, vector<1x4x288xf32>
    %18 = vector.shape_cast %17 : vector<1x4x288xf32> to vector<4x288xf32>
    %19 = arith.maximumf %16, %18 : vector<4x288xf32>
    %c0_14 = arith.constant 0 : index
    %c0_15 = arith.constant 0 : index
    %c37 = arith.constant 37 : index
    %20 = vector.load %arg1[%c0_14, %c0_15, %c37] : memref<1x4x326xf32, #tpu.memory_space<vmem>>, vector<1x4x288xf32>
    %21 = vector.shape_cast %20 : vector<1x4x288xf32> to vector<4x288xf32>
    %22 = arith.maximumf %19, %21 : vector<4x288xf32>
    %c0_16 = arith.constant 0 : index
    %c0_17 = arith.constant 0 : index
    %c38 = arith.constant 38 : index
    %23 = vector.load %arg1[%c0_16, %c0_17, %c38] : memref<1x4x326xf32, #tpu.memory_space<vmem>>, vector<1x4x288xf32>
    %24 = vector.shape_cast %23 : vector<1x4x288xf32> to vector<4x288xf32>
    %25 = arith.maximumf %22, %24 : vector<4x288xf32>
    %c0_18 = arith.constant 0 : index
    %c0_19 = arith.constant 0 : index
    %c0_20 = arith.constant 0 : index
    %26 = vector.load %arg2[%c0_18, %c0_19, %c0_20] : memref<1x4x288xf32, #tpu.memory_space<vmem>>, vector<1x4x288xf32>
    %27 = vector.shape_cast %26 : vector<1x4x288xf32> to vector<4x288xf32>
    %28 = vector.shape_cast %25 : vector<4x288xf32> to vector<1x4x288xf32>
    tpu.vector_store %arg2[%c0_18, %c0_19, %c0_20], %28 {strides = array<i32>} : memref<1x4x288xf32, #tpu.memory_space<vmem>>, vector<1x4x288xf32>,
    return
  }
  func.func @transform_0(%arg0: i32) -> (i32, i32, i32) {
    %c0_i32 = arith.constant 0 : i32
    %c0_i32_0 = arith.constant 0 : i32
    %c0_i32_1 = arith.constant 0 : i32
    return %arg0, %c0_i32, %c0_i32_0 : i32, i32, i32
  }
  func.func @transform_1(%arg0: i32) -> (i32, i32, i32) {
    %c0_i32 = arith.constant 0 : i32
    %c0_i32_0 = arith.constant 0 : i32
    %c0_i32_1 = arith.constant 0 : i32
    return %arg0, %c0_i32, %c0_i32_0 : i32, i32, i32
  }
}

module attributes {stable_mosaic.version = 11 : i64} {
  func.func @_conv3x3_kernel(%arg0: i32, %arg1: memref<1x4x102xf32, #tpu.memory_space<vmem>>, %arg2: memref<9x4x4xf32, #tpu.memory_space<vmem>>, %arg3: memref<4x1xf32, #tpu.memory_space<vmem>>, %arg4: memref<1x4x80xf32, #tpu.memory_space<vmem>>) attributes {dimension_semantics = [#tpu.dimension_semantics<parallel>], iteration_bounds = array<i64: 2>, scalar_prefetch = 0 : i64, scratch_operands = 0 : i64, tpu.core_type = #tpu.core_type<tc>, window_params = [{transform_indices = @transform_0, window_bounds = array<i64: 1, 4, 102>}, {pipeline_mode = #tpu.pipeline_mode<synchronous>, transform_indices = @transform_1, window_bounds = array<i64: 9, 4, 4>}, {pipeline_mode = #tpu.pipeline_mode<synchronous>, transform_indices = @transform_2, window_bounds = array<i64: 4, 1>}, {transform_indices = @transform_3, window_bounds = array<i64: 1, 4, 80>}]} {
    %cst = arith.constant 0.000000e+00 : f32
    %0 = vector.broadcast %cst : f32 to vector<4x80xf32>
    %c0 = arith.constant 0 : index
    %c0_0 = arith.constant 0 : index
    %c0_1 = arith.constant 0 : index
    %1 = vector.load %arg1[%c0, %c0_0, %c0_1] : memref<1x4x102xf32, #tpu.memory_space<vmem>>, vector<1x4x80xf32>
    %2 = vector.shape_cast %1 : vector<1x4x80xf32> to vector<4x80xf32>
    %c0_2 = arith.constant 0 : index
    %c0_3 = arith.constant 0 : index
    %c0_4 = arith.constant 0 : index
    %3 = vector.load %arg2[%c0_2, %c0_3, %c0_4] : memref<9x4x4xf32, #tpu.memory_space<vmem>>, vector<1x4x4xf32>
    %4 = vector.shape_cast %3 : vector<1x4x4xf32> to vector<4x4xf32>
    %cst_5 = arith.constant dense<0.000000e+00> : vector<4x80xf32>
    %5 = tpu.matmul %4, %2, %cst_5 {dimension_numbers = #tpu.dot_dimension_numbers<[1], [0], [0], [1], [0, 0, 1, 1], [], []>} : vector<4x4xf32>, vector<4x80xf32>, vector<4x80xf32> -> vector<4x80xf32>
    %6 = arith.addf %0, %5 : vector<4x80xf32>
    %c0_6 = arith.constant 0 : index
    %c0_7 = arith.constant 0 : index
    %c1 = arith.constant 1 : index
    %7 = vector.load %arg1[%c0_6, %c0_7, %c1] : memref<1x4x102xf32, #tpu.memory_space<vmem>>, vector<1x4x80xf32>
    %8 = vector.shape_cast %7 : vector<1x4x80xf32> to vector<4x80xf32>
    %c1_8 = arith.constant 1 : index
    %c0_9 = arith.constant 0 : index
    %c0_10 = arith.constant 0 : index
    %9 = vector.load %arg2[%c1_8, %c0_9, %c0_10] : memref<9x4x4xf32, #tpu.memory_space<vmem>>, vector<1x4x4xf32>
    %10 = vector.shape_cast %9 : vector<1x4x4xf32> to vector<4x4xf32>
    %cst_11 = arith.constant dense<0.000000e+00> : vector<4x80xf32>
    %11 = tpu.matmul %10, %8, %cst_11 {dimension_numbers = #tpu.dot_dimension_numbers<[1], [0], [0], [1], [0, 0, 1, 1], [], []>} : vector<4x4xf32>, vector<4x80xf32>, vector<4x80xf32> -> vector<4x80xf32>
    %12 = arith.addf %6, %11 : vector<4x80xf32>
    %c0_12 = arith.constant 0 : index
    %c0_13 = arith.constant 0 : index
    %c2 = arith.constant 2 : index
    %13 = vector.load %arg1[%c0_12, %c0_13, %c2] : memref<1x4x102xf32, #tpu.memory_space<vmem>>, vector<1x4x80xf32>
    %14 = vector.shape_cast %13 : vector<1x4x80xf32> to vector<4x80xf32>
    %c2_14 = arith.constant 2 : index
    %c0_15 = arith.constant 0 : index
    %c0_16 = arith.constant 0 : index
    %15 = vector.load %arg2[%c2_14, %c0_15, %c0_16] : memref<9x4x4xf32, #tpu.memory_space<vmem>>, vector<1x4x4xf32>
    %16 = vector.shape_cast %15 : vector<1x4x4xf32> to vector<4x4xf32>
    %cst_17 = arith.constant dense<0.000000e+00> : vector<4x80xf32>
    %17 = tpu.matmul %16, %14, %cst_17 {dimension_numbers = #tpu.dot_dimension_numbers<[1], [0], [0], [1], [0, 0, 1, 1], [], []>} : vector<4x4xf32>, vector<4x80xf32>, vector<4x80xf32> -> vector<4x80xf32>
    %18 = arith.addf %12, %17 : vector<4x80xf32>
    %c0_18 = arith.constant 0 : index
    %c0_19 = arith.constant 0 : index
    %c10 = arith.constant 10 : index
    %19 = vector.load %arg1[%c0_18, %c0_19, %c10] : memref<1x4x102xf32, #tpu.memory_space<vmem>>, vector<1x4x80xf32>
    %20 = vector.shape_cast %19 : vector<1x4x80xf32> to vector<4x80xf32>
    %c3 = arith.constant 3 : index
    %c0_20 = arith.constant 0 : index
    %c0_21 = arith.constant 0 : index
    %21 = vector.load %arg2[%c3, %c0_20, %c0_21] : memref<9x4x4xf32, #tpu.memory_space<vmem>>, vector<1x4x4xf32>
    %22 = vector.shape_cast %21 : vector<1x4x4xf32> to vector<4x4xf32>
    %cst_22 = arith.constant dense<0.000000e+00> : vector<4x80xf32>
    %23 = tpu.matmul %22, %20, %cst_22 {dimension_numbers = #tpu.dot_dimension_numbers<[1], [0], [0], [1], [0, 0, 1, 1], [], []>} : vector<4x4xf32>, vector<4x80xf32>, vector<4x80xf32> -> vector<4x80xf32>
    %24 = arith.addf %18, %23 : vector<4x80xf32>
    %c0_23 = arith.constant 0 : index
    %c0_24 = arith.constant 0 : index
    %c11 = arith.constant 11 : index
    %25 = vector.load %arg1[%c0_23, %c0_24, %c11] : memref<1x4x102xf32, #tpu.memory_space<vmem>>, vector<1x4x80xf32>
    %26 = vector.shape_cast %25 : vector<1x4x80xf32> to vector<4x80xf32>
    %c4 = arith.constant 4 : index
    %c0_25 = arith.constant 0 : index
    %c0_26 = arith.constant 0 : index
    %27 = vector.load %arg2[%c4, %c0_25, %c0_26] : memref<9x4x4xf32, #tpu.memory_space<vmem>>, vector<1x4x4xf32>
    %28 = vector.shape_cast %27 : vector<1x4x4xf32> to vector<4x4xf32>
    %cst_27 = arith.constant dense<0.000000e+00> : vector<4x80xf32>
    %29 = tpu.matmul %28, %26, %cst_27 {dimension_numbers = #tpu.dot_dimension_numbers<[1], [0], [0], [1], [0, 0, 1, 1], [], []>} : vector<4x4xf32>, vector<4x80xf32>, vector<4x80xf32> -> vector<4x80xf32>
    %30 = arith.addf %24, %29 : vector<4x80xf32>
    %c0_28 = arith.constant 0 : index
    %c0_29 = arith.constant 0 : index
    %c12 = arith.constant 12 : index
    %31 = vector.load %arg1[%c0_28, %c0_29, %c12] : memref<1x4x102xf32, #tpu.memory_space<vmem>>, vector<1x4x80xf32>
    %32 = vector.shape_cast %31 : vector<1x4x80xf32> to vector<4x80xf32>
    %c5 = arith.constant 5 : index
    %c0_30 = arith.constant 0 : index
    %c0_31 = arith.constant 0 : index
    %33 = vector.load %arg2[%c5, %c0_30, %c0_31] : memref<9x4x4xf32, #tpu.memory_space<vmem>>, vector<1x4x4xf32>
    %34 = vector.shape_cast %33 : vector<1x4x4xf32> to vector<4x4xf32>
    %cst_32 = arith.constant dense<0.000000e+00> : vector<4x80xf32>
    %35 = tpu.matmul %34, %32, %cst_32 {dimension_numbers = #tpu.dot_dimension_numbers<[1], [0], [0], [1], [0, 0, 1, 1], [], []>} : vector<4x4xf32>, vector<4x80xf32>, vector<4x80xf32> -> vector<4x80xf32>
    %36 = arith.addf %30, %35 : vector<4x80xf32>
    %c0_33 = arith.constant 0 : index
    %c0_34 = arith.constant 0 : index
    %c20 = arith.constant 20 : index
    %37 = vector.load %arg1[%c0_33, %c0_34, %c20] : memref<1x4x102xf32, #tpu.memory_space<vmem>>, vector<1x4x80xf32>
    %38 = vector.shape_cast %37 : vector<1x4x80xf32> to vector<4x80xf32>
    %c6 = arith.constant 6 : index
    %c0_35 = arith.constant 0 : index
    %c0_36 = arith.constant 0 : index
    %39 = vector.load %arg2[%c6, %c0_35, %c0_36] : memref<9x4x4xf32, #tpu.memory_space<vmem>>, vector<1x4x4xf32>
    %40 = vector.shape_cast %39 : vector<1x4x4xf32> to vector<4x4xf32>
    %cst_37 = arith.constant dense<0.000000e+00> : vector<4x80xf32>
    %41 = tpu.matmul %40, %38, %cst_37 {dimension_numbers = #tpu.dot_dimension_numbers<[1], [0], [0], [1], [0, 0, 1, 1], [], []>} : vector<4x4xf32>, vector<4x80xf32>, vector<4x80xf32> -> vector<4x80xf32>
    %42 = arith.addf %36, %41 : vector<4x80xf32>
    %c0_38 = arith.constant 0 : index
    %c0_39 = arith.constant 0 : index
    %c21 = arith.constant 21 : index
    %43 = vector.load %arg1[%c0_38, %c0_39, %c21] : memref<1x4x102xf32, #tpu.memory_space<vmem>>, vector<1x4x80xf32>
    %44 = vector.shape_cast %43 : vector<1x4x80xf32> to vector<4x80xf32>
    %c7 = arith.constant 7 : index
    %c0_40 = arith.constant 0 : index
    %c0_41 = arith.constant 0 : index
    %45 = vector.load %arg2[%c7, %c0_40, %c0_41] : memref<9x4x4xf32, #tpu.memory_space<vmem>>, vector<1x4x4xf32>
    %46 = vector.shape_cast %45 : vector<1x4x4xf32> to vector<4x4xf32>
    %cst_42 = arith.constant dense<0.000000e+00> : vector<4x80xf32>
    %47 = tpu.matmul %46, %44, %cst_42 {dimension_numbers = #tpu.dot_dimension_numbers<[1], [0], [0], [1], [0, 0, 1, 1], [], []>} : vector<4x4xf32>, vector<4x80xf32>, vector<4x80xf32> -> vector<4x80xf32>
    %48 = arith.addf %42, %47 : vector<4x80xf32>
    %c0_43 = arith.constant 0 : index
    %c0_44 = arith.constant 0 : index
    %c22 = arith.constant 22 : index
    %49 = vector.load %arg1[%c0_43, %c0_44, %c22] : memref<1x4x102xf32, #tpu.memory_space<vmem>>, vector<1x4x80xf32>
    %50 = vector.shape_cast %49 : vector<1x4x80xf32> to vector<4x80xf32>
    %c8 = arith.constant 8 : index
    %c0_45 = arith.constant 0 : index
    %c0_46 = arith.constant 0 : index
    %51 = vector.load %arg2[%c8, %c0_45, %c0_46] : memref<9x4x4xf32, #tpu.memory_space<vmem>>, vector<1x4x4xf32>
    %52 = vector.shape_cast %51 : vector<1x4x4xf32> to vector<4x4xf32>
    %cst_47 = arith.constant dense<0.000000e+00> : vector<4x80xf32>
    %53 = tpu.matmul %52, %50, %cst_47 {dimension_numbers = #tpu.dot_dimension_numbers<[1], [0], [0], [1], [0, 0, 1, 1], [], []>} : vector<4x4xf32>, vector<4x80xf32>, vector<4x80xf32> -> vector<4x80xf32>
    %54 = arith.addf %48, %53 : vector<4x80xf32>
    %c0_48 = arith.constant 0 : index
    %c0_49 = arith.constant 0 : index
    %55 = vector.load %arg3[%c0_48, %c0_49] : memref<4x1xf32, #tpu.memory_space<vmem>>, vector<4x1xf32>
    %56 = vector.broadcast %55 : vector<4x1xf32> to vector<4x80xf32>
    %57 = arith.addf %54, %56 : vector<4x80xf32>
    %cst_50 = arith.constant 0.000000e+00 : f32
    %58 = vector.broadcast %cst_50 : f32 to vector<4x80xf32>
    %59 = arith.maximumf %57, %58 : vector<4x80xf32>
    %c0_51 = arith.constant 0 : index
    %c0_52 = arith.constant 0 : index
    %c0_53 = arith.constant 0 : index
    %60 = vector.load %arg4[%c0_51, %c0_52, %c0_53] : memref<1x4x80xf32, #tpu.memory_space<vmem>>, vector<1x4x80xf32>
    %61 = vector.shape_cast %60 : vector<1x4x80xf32> to vector<4x80xf32>
    %62 = vector.shape_cast %59 : vector<4x80xf32> to vector<1x4x80xf32>
    tpu.vector_store %arg4[%c0_51, %c0_52, %c0_53], %62 {strides = array<i32>} : memref<1x4x80xf32, #tpu.memory_space<vmem>>, vector<1x4x80xf32>,
    return
  }
  func.func @transform_0(%arg0: i32) -> (i32, i32, i32) {
    %c0_i32 = arith.constant 0 : i32
    %c0_i32_0 = arith.constant 0 : i32
    %c0_i32_1 = arith.constant 0 : i32
    return %arg0, %c0_i32, %c0_i32_0 : i32, i32, i32
  }
  func.func @transform_1(%arg0: i32) -> (i32, i32, i32) {
    %c0_i32 = arith.constant 0 : i32
    %c0_i32_0 = arith.constant 0 : i32
    %c0_i32_1 = arith.constant 0 : i32
    %c0_i32_2 = arith.constant 0 : i32
    return %c0_i32, %c0_i32_0, %c0_i32_1 : i32, i32, i32
  }
  func.func @transform_2(%arg0: i32) -> (i32, i32) {
    %c0_i32 = arith.constant 0 : i32
    %c0_i32_0 = arith.constant 0 : i32
    %c0_i32_1 = arith.constant 0 : i32
    return %c0_i32, %c0_i32_0 : i32, i32
  }
  func.func @transform_3(%arg0: i32) -> (i32, i32, i32) {
    %c0_i32 = arith.constant 0 : i32
    %c0_i32_0 = arith.constant 0 : i32
    %c0_i32_1 = arith.constant 0 : i32
    return %arg0, %c0_i32, %c0_i32_0 : i32, i32, i32
  }
}

module attributes {stable_mosaic.version = 11 : i64} {
  func.func @_bn_norm_kernel(%arg0: i32, %arg1: memref<1x4x64xf32, #tpu.memory_space<vmem>>, %arg2: memref<4x1xf32, #tpu.memory_space<vmem>>, %arg3: memref<4x1xf32, #tpu.memory_space<vmem>>, %arg4: memref<1x4x64xf32, #tpu.memory_space<vmem>>) attributes {dimension_semantics = [#tpu.dimension_semantics<parallel>], iteration_bounds = array<i64: 2>, scalar_prefetch = 0 : i64, scratch_operands = 0 : i64, tpu.core_type = #tpu.core_type<tc>, window_params = [{transform_indices = @transform_0, window_bounds = array<i64: 1, 4, 64>}, {pipeline_mode = #tpu.pipeline_mode<synchronous>, transform_indices = @transform_1, window_bounds = array<i64: 4, 1>}, {pipeline_mode = #tpu.pipeline_mode<synchronous>, transform_indices = @transform_2, window_bounds = array<i64: 4, 1>}, {transform_indices = @transform_3, window_bounds = array<i64: 1, 4, 64>}]} {
    %c0 = arith.constant 0 : index
    %c0_0 = arith.constant 0 : index
    %c0_1 = arith.constant 0 : index
    %0 = vector.load %arg1[%c0, %c0_0, %c0_1] : memref<1x4x64xf32, #tpu.memory_space<vmem>>, vector<1x4x64xf32>
    %1 = vector.shape_cast %0 : vector<1x4x64xf32> to vector<4x64xf32>
    %c0_2 = arith.constant 0 : index
    %c0_3 = arith.constant 0 : index
    %2 = vector.load %arg2[%c0_2, %c0_3] : memref<4x1xf32, #tpu.memory_space<vmem>>, vector<4x1xf32>
    %3 = vector.broadcast %2 : vector<4x1xf32> to vector<4x64xf32>
    %4 = arith.mulf %1, %3 : vector<4x64xf32>
    %c0_4 = arith.constant 0 : index
    %c0_5 = arith.constant 0 : index
    %5 = vector.load %arg3[%c0_4, %c0_5] : memref<4x1xf32, #tpu.memory_space<vmem>>, vector<4x1xf32>
    %6 = vector.broadcast %5 : vector<4x1xf32> to vector<4x64xf32>
    %7 = arith.addf %4, %6 : vector<4x64xf32>
    %cst = arith.constant 0.000000e+00 : f32
    %8 = vector.broadcast %cst : f32 to vector<4x64xf32>
    %9 = arith.maximumf %7, %8 : vector<4x64xf32>
    %c0_6 = arith.constant 0 : index
    %c0_7 = arith.constant 0 : index
    %c0_8 = arith.constant 0 : index
    %10 = vector.load %arg4[%c0_6, %c0_7, %c0_8] : memref<1x4x64xf32, #tpu.memory_space<vmem>>, vector<1x4x64xf32>
    %11 = vector.shape_cast %10 : vector<1x4x64xf32> to vector<4x64xf32>
    %12 = vector.shape_cast %9 : vector<4x64xf32> to vector<1x4x64xf32>
    tpu.vector_store %arg4[%c0_6, %c0_7, %c0_8], %12 {strides = array<i32>} : memref<1x4x64xf32, #tpu.memory_space<vmem>>, vector<1x4x64xf32>,
    return
  }
  func.func @transform_0(%arg0: i32) -> (i32, i32, i32) {
    %c0_i32 = arith.constant 0 : i32
    %c0_i32_0 = arith.constant 0 : i32
    %c0_i32_1 = arith.constant 0 : i32
    return %arg0, %c0_i32, %c0_i32_0 : i32, i32, i32
  }
  func.func @transform_1(%arg0: i32) -> (i32, i32) {
    %c0_i32 = arith.constant 0 : i32
    %c0_i32_0 = arith.constant 0 : i32
    %c0_i32_1 = arith.constant 0 : i32
    return %c0_i32, %c0_i32_0 : i32, i32
  }
  func.func @transform_2(%arg0: i32) -> (i32, i32) {
    %c0_i32 = arith.constant 0 : i32
    %c0_i32_0 = arith.constant 0 : i32
    %c0_i32_1 = arith.constant 0 : i32
    return %c0_i32, %c0_i32_0 : i32, i32
  }
  func.func @transform_3(%arg0: i32) -> (i32, i32, i32) {
    %c0_i32 = arith.constant 0 : i32
    %c0_i32_0 = arith.constant 0 : i32
    %c0_i32_1 = arith.constant 0 : i32
    return %arg0, %c0_i32, %c0_i32_0 : i32, i32, i32
  }
}

module attributes {stable_mosaic.version = 11 : i64} {
  func.func @_bn_stats_res_kernel(%arg0: i32, %arg1: memref<1x4x64xf32, #tpu.memory_space<vmem>>, %arg2: memref<1x4x64xf32, #tpu.memory_space<vmem>>, %arg3: memref<4x1xf32, #tpu.memory_space<vmem>>, %arg4: memref<4x1xf32, #tpu.memory_space<vmem>>) attributes {dimension_semantics = [#tpu.dimension_semantics<arbitrary>], iteration_bounds = array<i64: 2>, scalar_prefetch = 0 : i64, scratch_operands = 0 : i64, tpu.core_type = #tpu.core_type<tc>, window_params = [{transform_indices = @transform_0, window_bounds = array<i64: 1, 4, 64>}, {transform_indices = @transform_1, window_bounds = array<i64: 1, 4, 64>}, {pipeline_mode = #tpu.pipeline_mode<synchronous>, transform_indices = @transform_2, window_bounds = array<i64: 4, 1>}, {pipeline_mode = #tpu.pipeline_mode<synchronous>, transform_indices = @transform_3, window_bounds = array<i64: 4, 1>}]} {
    %c0_i32 = arith.constant 0 : i32
    %0 = arith.cmpi eq, %arg0, %c0_i32 : i32
    %1 = arith.extui %0 : i1 to i32
    %c0_i32_0 = arith.constant 0 : i32
    %2 = arith.cmpi ne, %1, %c0_i32_0 : i32
    scf.if %2 {
      %cst_15 = arith.constant 0.000000e+00 : f32
      %19 = vector.broadcast %cst_15 : f32 to vector<4x1xf32>
      %c0_16 = arith.constant 0 : index
      %c0_17 = arith.constant 0 : index
      %20 = vector.load %arg3[%c0_16, %c0_17] : memref<4x1xf32, #tpu.memory_space<vmem>>, vector<4x1xf32>
      tpu.vector_store %arg3[%c0_16, %c0_17], %19 {strides = array<i32>} : memref<4x1xf32, #tpu.memory_space<vmem>>, vector<4x1xf32>,
      %cst_18 = arith.constant 0.000000e+00 : f32
      %21 = vector.broadcast %cst_18 : f32 to vector<4x1xf32>
      %c0_19 = arith.constant 0 : index
      %c0_20 = arith.constant 0 : index
      %22 = vector.load %arg4[%c0_19, %c0_20] : memref<4x1xf32, #tpu.memory_space<vmem>>, vector<4x1xf32>
      tpu.vector_store %arg4[%c0_19, %c0_20], %21 {strides = array<i32>} : memref<4x1xf32, #tpu.memory_space<vmem>>, vector<4x1xf32>,
    } else {
    }
    %c0 = arith.constant 0 : index
    %c0_1 = arith.constant 0 : index
    %c0_2 = arith.constant 0 : index
    %3 = vector.load %arg1[%c0, %c0_1, %c0_2] : memref<1x4x64xf32, #tpu.memory_space<vmem>>, vector<1x4x64xf32>
    %4 = vector.shape_cast %3 : vector<1x4x64xf32> to vector<4x64xf32>
    %c0_3 = arith.constant 0 : index
    %c0_4 = arith.constant 0 : index
    %c0_5 = arith.constant 0 : index
    %5 = vector.load %arg2[%c0_3, %c0_4, %c0_5] : memref<1x4x64xf32, #tpu.memory_space<vmem>>, vector<1x4x64xf32>
    %6 = vector.shape_cast %5 : vector<1x4x64xf32> to vector<4x64xf32>
    %7 = arith.addf %4, %6 : vector<4x64xf32>
    %c0_6 = arith.constant 0 : index
    %c0_7 = arith.constant 0 : index
    %8 = vector.load %arg3[%c0_6, %c0_7] : memref<4x1xf32, #tpu.memory_space<vmem>>, vector<4x1xf32>
    %cst = arith.constant dense<0.000000e+00> : vector<4xf32>
    %9 = vector.multi_reduction <add>, %7, %cst [1] : vector<4x64xf32> to vector<4xf32>
    %10 = vector.shape_cast %9 : vector<4xf32> to vector<4x1xf32>
    %11 = arith.addf %8, %10 : vector<4x1xf32>
    %c0_8 = arith.constant 0 : index
    %c0_9 = arith.constant 0 : index
    %12 = vector.load %arg3[%c0_8, %c0_9] : memref<4x1xf32, #tpu.memory_space<vmem>>, vector<4x1xf32>
    tpu.vector_store %arg3[%c0_8, %c0_9], %11 {strides = array<i32>} : memref<4x1xf32, #tpu.memory_space<vmem>>, vector<4x1xf32>,
    %c0_10 = arith.constant 0 : index
    %c0_11 = arith.constant 0 : index
    %13 = vector.load %arg4[%c0_10, %c0_11] : memref<4x1xf32, #tpu.memory_space<vmem>>, vector<4x1xf32>
    %14 = arith.mulf %7, %7 : vector<4x64xf32>
    %cst_12 = arith.constant dense<0.000000e+00> : vector<4xf32>
    %15 = vector.multi_reduction <add>, %14, %cst_12 [1] : vector<4x64xf32> to vector<4xf32>
    %16 = vector.shape_cast %15 : vector<4xf32> to vector<4x1xf32>
    %17 = arith.addf %13, %16 : vector<4x1xf32>
    %c0_13 = arith.constant 0 : index
    %c0_14 = arith.constant 0 : index
    %18 = vector.load %arg4[%c0_13, %c0_14] : memref<4x1xf32, #tpu.memory_space<vmem>>, vector<4x1xf32>
    tpu.vector_store %arg4[%c0_13, %c0_14], %17 {strides = array<i32>} : memref<4x1xf32, #tpu.memory_space<vmem>>, vector<4x1xf32>,
    return
  }
  func.func @transform_0(%arg0: i32) -> (i32, i32, i32) {
    %c0_i32 = arith.constant 0 : i32
    %c0_i32_0 = arith.constant 0 : i32
    %c0_i32_1 = arith.constant 0 : i32
    return %arg0, %c0_i32, %c0_i32_0 : i32, i32, i32
  }
  func.func @transform_1(%arg0: i32) -> (i32, i32, i32) {
    %c0_i32 = arith.constant 0 : i32
    %c0_i32_0 = arith.constant 0 : i32
    %c0_i32_1 = arith.constant 0 : i32
    return %arg0, %c0_i32, %c0_i32_0 : i32, i32, i32
  }
  func.func @transform_2(%arg0: i32) -> (i32, i32) {
    %c0_i32 = arith.constant 0 : i32
    %c0_i32_0 = arith.constant 0 : i32
    %c0_i32_1 = arith.constant 0 : i32
    return %c0_i32, %c0_i32_0 : i32, i32
  }
  func.func @transform_3(%arg0: i32) -> (i32, i32) {
    %c0_i32 = arith.constant 0 : i32
    %c0_i32_0 = arith.constant 0 : i32
    %c0_i32_1 = arith.constant 0 : i32
    return %c0_i32, %c0_i32_0 : i32, i32
  }
}

module attributes {stable_mosaic.version = 11 : i64} {
  func.func @_bn_stats_kernel(%arg0: i32, %arg1: memref<1x4x64xf32, #tpu.memory_space<vmem>>, %arg2: memref<4x1xf32, #tpu.memory_space<vmem>>, %arg3: memref<4x1xf32, #tpu.memory_space<vmem>>) attributes {dimension_semantics = [#tpu.dimension_semantics<arbitrary>], iteration_bounds = array<i64: 2>, scalar_prefetch = 0 : i64, scratch_operands = 0 : i64, tpu.core_type = #tpu.core_type<tc>, window_params = [{transform_indices = @transform_0, window_bounds = array<i64: 1, 4, 64>}, {pipeline_mode = #tpu.pipeline_mode<synchronous>, transform_indices = @transform_1, window_bounds = array<i64: 4, 1>}, {pipeline_mode = #tpu.pipeline_mode<synchronous>, transform_indices = @transform_2, window_bounds = array<i64: 4, 1>}]} {
    %c0_i32 = arith.constant 0 : i32
    %0 = arith.cmpi eq, %arg0, %c0_i32 : i32
    %1 = arith.extui %0 : i1 to i32
    %c0_i32_0 = arith.constant 0 : i32
    %2 = arith.cmpi ne, %1, %c0_i32_0 : i32
    scf.if %2 {
      %cst_12 = arith.constant 0.000000e+00 : f32
      %16 = vector.broadcast %cst_12 : f32 to vector<4x1xf32>
      %c0_13 = arith.constant 0 : index
      %c0_14 = arith.constant 0 : index
      %17 = vector.load %arg2[%c0_13, %c0_14] : memref<4x1xf32, #tpu.memory_space<vmem>>, vector<4x1xf32>
      tpu.vector_store %arg2[%c0_13, %c0_14], %16 {strides = array<i32>} : memref<4x1xf32, #tpu.memory_space<vmem>>, vector<4x1xf32>,
      %cst_15 = arith.constant 0.000000e+00 : f32
      %18 = vector.broadcast %cst_15 : f32 to vector<4x1xf32>
      %c0_16 = arith.constant 0 : index
      %c0_17 = arith.constant 0 : index
      %19 = vector.load %arg3[%c0_16, %c0_17] : memref<4x1xf32, #tpu.memory_space<vmem>>, vector<4x1xf32>
      tpu.vector_store %arg3[%c0_16, %c0_17], %18 {strides = array<i32>} : memref<4x1xf32, #tpu.memory_space<vmem>>, vector<4x1xf32>,
    } else {
    }
    %c0 = arith.constant 0 : index
    %c0_1 = arith.constant 0 : index
    %c0_2 = arith.constant 0 : index
    %3 = vector.load %arg1[%c0, %c0_1, %c0_2] : memref<1x4x64xf32, #tpu.memory_space<vmem>>, vector<1x4x64xf32>
    %4 = vector.shape_cast %3 : vector<1x4x64xf32> to vector<4x64xf32>
    %c0_3 = arith.constant 0 : index
    %c0_4 = arith.constant 0 : index
    %5 = vector.load %arg2[%c0_3, %c0_4] : memref<4x1xf32, #tpu.memory_space<vmem>>, vector<4x1xf32>
    %cst = arith.constant dense<0.000000e+00> : vector<4xf32>
    %6 = vector.multi_reduction <add>, %4, %cst [1] : vector<4x64xf32> to vector<4xf32>
    %7 = vector.shape_cast %6 : vector<4xf32> to vector<4x1xf32>
    %8 = arith.addf %5, %7 : vector<4x1xf32>
    %c0_5 = arith.constant 0 : index
    %c0_6 = arith.constant 0 : index
    %9 = vector.load %arg2[%c0_5, %c0_6] : memref<4x1xf32, #tpu.memory_space<vmem>>, vector<4x1xf32>
    tpu.vector_store %arg2[%c0_5, %c0_6], %8 {strides = array<i32>} : memref<4x1xf32, #tpu.memory_space<vmem>>, vector<4x1xf32>,
    %c0_7 = arith.constant 0 : index
    %c0_8 = arith.constant 0 : index
    %10 = vector.load %arg3[%c0_7, %c0_8] : memref<4x1xf32, #tpu.memory_space<vmem>>, vector<4x1xf32>
    %11 = arith.mulf %4, %4 : vector<4x64xf32>
    %cst_9 = arith.constant dense<0.000000e+00> : vector<4xf32>
    %12 = vector.multi_reduction <add>, %11, %cst_9 [1] : vector<4x64xf32> to vector<4xf32>
    %13 = vector.shape_cast %12 : vector<4xf32> to vector<4x1xf32>
    %14 = arith.addf %10, %13 : vector<4x1xf32>
    %c0_10 = arith.constant 0 : index
    %c0_11 = arith.constant 0 : index
    %15 = vector.load %arg3[%c0_10, %c0_11] : memref<4x1xf32, #tpu.memory_space<vmem>>, vector<4x1xf32>
    tpu.vector_store %arg3[%c0_10, %c0_11], %14 {strides = array<i32>} : memref<4x1xf32, #tpu.memory_space<vmem>>, vector<4x1xf32>,
    return
  }
  func.func @transform_0(%arg0: i32) -> (i32, i32, i32) {
    %c0_i32 = arith.constant 0 : i32
    %c0_i32_0 = arith.constant 0 : i32
    %c0_i32_1 = arith.constant 0 : i32
    return %arg0, %c0_i32, %c0_i32_0 : i32, i32, i32
  }
  func.func @transform_1(%arg0: i32) -> (i32, i32) {
    %c0_i32 = arith.constant 0 : i32
    %c0_i32_0 = arith.constant 0 : i32
    %c0_i32_1 = arith.constant 0 : i32
    return %c0_i32, %c0_i32_0 : i32, i32
  }
  func.func @transform_2(%arg0: i32) -> (i32, i32) {
    %c0_i32 = arith.constant 0 : i32
    %c0_i32_0 = arith.constant 0 : i32
    %c0_i32_1 = arith.constant 0 : i32
    return %c0_i32, %c0_i32_0 : i32, i32
  }
}

module attributes {stable_mosaic.version = 11 : i64} {
  func.func @_bn_norm_res_kernel(%arg0: i32, %arg1: memref<1x4x64xf32, #tpu.memory_space<vmem>>, %arg2: memref<1x4x64xf32, #tpu.memory_space<vmem>>, %arg3: memref<4x1xf32, #tpu.memory_space<vmem>>, %arg4: memref<4x1xf32, #tpu.memory_space<vmem>>, %arg5: memref<1x4x64xf32, #tpu.memory_space<vmem>>) attributes {dimension_semantics = [#tpu.dimension_semantics<parallel>], iteration_bounds = array<i64: 2>, scalar_prefetch = 0 : i64, scratch_operands = 0 : i64, tpu.core_type = #tpu.core_type<tc>, window_params = [{transform_indices = @transform_0, window_bounds = array<i64: 1, 4, 64>}, {transform_indices = @transform_1, window_bounds = array<i64: 1, 4, 64>}, {pipeline_mode = #tpu.pipeline_mode<synchronous>, transform_indices = @transform_2, window_bounds = array<i64: 4, 1>}, {pipeline_mode = #tpu.pipeline_mode<synchronous>, transform_indices = @transform_3, window_bounds = array<i64: 4, 1>}, {transform_indices = @transform_4, window_bounds = array<i64: 1, 4, 64>}]} {
    %c0 = arith.constant 0 : index
    %c0_0 = arith.constant 0 : index
    %c0_1 = arith.constant 0 : index
    %0 = vector.load %arg1[%c0, %c0_0, %c0_1] : memref<1x4x64xf32, #tpu.memory_space<vmem>>, vector<1x4x64xf32>
    %1 = vector.shape_cast %0 : vector<1x4x64xf32> to vector<4x64xf32>
    %c0_2 = arith.constant 0 : index
    %c0_3 = arith.constant 0 : index
    %c0_4 = arith.constant 0 : index
    %2 = vector.load %arg2[%c0_2, %c0_3, %c0_4] : memref<1x4x64xf32, #tpu.memory_space<vmem>>, vector<1x4x64xf32>
    %3 = vector.shape_cast %2 : vector<1x4x64xf32> to vector<4x64xf32>
    %4 = arith.addf %1, %3 : vector<4x64xf32>
    %c0_5 = arith.constant 0 : index
    %c0_6 = arith.constant 0 : index
    %5 = vector.load %arg3[%c0_5, %c0_6] : memref<4x1xf32, #tpu.memory_space<vmem>>, vector<4x1xf32>
    %6 = vector.broadcast %5 : vector<4x1xf32> to vector<4x64xf32>
    %7 = arith.mulf %4, %6 : vector<4x64xf32>
    %c0_7 = arith.constant 0 : index
    %c0_8 = arith.constant 0 : index
    %8 = vector.load %arg4[%c0_7, %c0_8] : memref<4x1xf32, #tpu.memory_space<vmem>>, vector<4x1xf32>
    %9 = vector.broadcast %8 : vector<4x1xf32> to vector<4x64xf32>
    %10 = arith.addf %7, %9 : vector<4x64xf32>
    %cst = arith.constant 0.000000e+00 : f32
    %11 = vector.broadcast %cst : f32 to vector<4x64xf32>
    %12 = arith.maximumf %10, %11 : vector<4x64xf32>
    %c0_9 = arith.constant 0 : index
    %c0_10 = arith.constant 0 : index
    %c0_11 = arith.constant 0 : index
    %13 = vector.load %arg5[%c0_9, %c0_10, %c0_11] : memref<1x4x64xf32, #tpu.memory_space<vmem>>, vector<1x4x64xf32>
    %14 = vector.shape_cast %13 : vector<1x4x64xf32> to vector<4x64xf32>
    %15 = vector.shape_cast %12 : vector<4x64xf32> to vector<1x4x64xf32>
    tpu.vector_store %arg5[%c0_9, %c0_10, %c0_11], %15 {strides = array<i32>} : memref<1x4x64xf32, #tpu.memory_space<vmem>>, vector<1x4x64xf32>,
    return
  }
  func.func @transform_0(%arg0: i32) -> (i32, i32, i32) {
    %c0_i32 = arith.constant 0 : i32
    %c0_i32_0 = arith.constant 0 : i32
    %c0_i32_1 = arith.constant 0 : i32
    return %arg0, %c0_i32, %c0_i32_0 : i32, i32, i32
  }
  func.func @transform_1(%arg0: i32) -> (i32, i32, i32) {
    %c0_i32 = arith.constant 0 : i32
    %c0_i32_0 = arith.constant 0 : i32
    %c0_i32_1 = arith.constant 0 : i32
    return %arg0, %c0_i32, %c0_i32_0 : i32, i32, i32
  }
  func.func @transform_2(%arg0: i32) -> (i32, i32) {
    %c0_i32 = arith.constant 0 : i32
    %c0_i32_0 = arith.constant 0 : i32
    %c0_i32_1 = arith.constant 0 : i32
    return %c0_i32, %c0_i32_0 : i32, i32
  }
  func.func @transform_3(%arg0: i32) -> (i32, i32) {
    %c0_i32 = arith.constant 0 : i32
    %c0_i32_0 = arith.constant 0 : i32
    %c0_i32_1 = arith.constant 0 : i32
    return %c0_i32, %c0_i32_0 : i32, i32
  }
  func.func @transform_4(%arg0: i32) -> (i32, i32, i32) {
    %c0_i32 = arith.constant 0 : i32
    %c0_i32_0 = arith.constant 0 : i32
    %c0_i32_1 = arith.constant 0 : i32
    return %arg0, %c0_i32, %c0_i32_0 : i32, i32, i32
  }
}

module attributes {stable_mosaic.version = 11 : i64} {
  func.func @_attn_kernel(%arg0: i32, %arg1: memref<1x4x64xf32, #tpu.memory_space<vmem>>, %arg2: memref<2x4xf32, #tpu.memory_space<vmem>>, %arg3: memref<2x1xf32, #tpu.memory_space<vmem>>, %arg4: memref<1x2xf32, #tpu.memory_space<vmem>>, %arg5: memref<1x1xf32, #tpu.memory_space<vmem>>, %arg6: memref<2x4xf32, #tpu.memory_space<vmem>>, %arg7: memref<2x1xf32, #tpu.memory_space<vmem>>, %arg8: memref<4x2xf32, #tpu.memory_space<vmem>>, %arg9: memref<4x1xf32, #tpu.memory_space<vmem>>, %arg10: memref<1x4x64xf32, #tpu.memory_space<vmem>>) attributes {dimension_semantics = [#tpu.dimension_semantics<parallel>], iteration_bounds = array<i64: 2>, scalar_prefetch = 0 : i64, scratch_operands = 0 : i64, tpu.core_type = #tpu.core_type<tc>, window_params = [{transform_indices = @transform_0, window_bounds = array<i64: 1, 4, 64>}, {pipeline_mode = #tpu.pipeline_mode<synchronous>, transform_indices = @transform_1, window_bounds = array<i64: 2, 4>}, {pipeline_mode = #tpu.pipeline_mode<synchronous>, transform_indices = @transform_2, window_bounds = array<i64: 2, 1>}, {pipeline_mode = #tpu.pipeline_mode<synchronous>, transform_indices = @transform_3, window_bounds = array<i64: 1, 2>}, {pipeline_mode = #tpu.pipeline_mode<synchronous>, transform_indices = @transform_4, window_bounds = array<i64: 1, 1>}, {pipeline_mode = #tpu.pipeline_mode<synchronous>, transform_indices = @transform_5, window_bounds = array<i64: 2, 4>}, {pipeline_mode = #tpu.pipeline_mode<synchronous>, transform_indices = @transform_6, window_bounds = array<i64: 2, 1>}, {pipeline_mode = #tpu.pipeline_mode<synchronous>, transform_indices = @transform_7, window_bounds = array<i64: 4, 2>}, {pipeline_mode = #tpu.pipeline_mode<synchronous>, transform_indices = @transform_8, window_bounds = array<i64: 4, 1>}, {transform_indices = @transform_9, window_bounds = array<i64: 1, 4, 64>}]} {
    %c0 = arith.constant 0 : index
    %c0_0 = arith.constant 0 : index
    %c0_1 = arith.constant 0 : index
    %0 = vector.load %arg1[%c0, %c0_0, %c0_1] : memref<1x4x64xf32, #tpu.memory_space<vmem>>, vector<1x4x64xf32>
    %1 = vector.shape_cast %0 : vector<1x4x64xf32> to vector<4x64xf32>
    %c0_2 = arith.constant 0 : index
    %c0_3 = arith.constant 0 : index
    %2 = vector.load %arg2[%c0_2, %c0_3] : memref<2x4xf32, #tpu.memory_space<vmem>>, vector<2x4xf32>
    %cst = arith.constant dense<0.000000e+00> : vector<2x64xf32>
    %3 = tpu.matmul %2, %1, %cst {dimension_numbers = #tpu.dot_dimension_numbers<[1], [0], [0], [1], [0, 0, 1, 1], [], []>} : vector<2x4xf32>, vector<4x64xf32>, vector<2x64xf32> -> vector<2x64xf32>
    %c0_4 = arith.constant 0 : index
    %c0_5 = arith.constant 0 : index
    %4 = vector.load %arg3[%c0_4, %c0_5] : memref<2x1xf32, #tpu.memory_space<vmem>>, vector<2x1xf32>
    %5 = vector.broadcast %4 : vector<2x1xf32> to vector<2x64xf32>
    %6 = arith.addf %3, %5 : vector<2x64xf32>
    %cst_6 = arith.constant 0.000000e+00 : f32
    %7 = vector.broadcast %cst_6 : f32 to vector<2x64xf32>
    %8 = arith.maximumf %6, %7 : vector<2x64xf32>
    %c0_7 = arith.constant 0 : index
    %c0_8 = arith.constant 0 : index
    %9 = vector.load %arg4[%c0_7, %c0_8] : memref<1x2xf32, #tpu.memory_space<vmem>>, vector<1x2xf32>
    %cst_9 = arith.constant dense<0.000000e+00> : vector<1x64xf32>
    %10 = tpu.matmul %9, %8, %cst_9 {dimension_numbers = #tpu.dot_dimension_numbers<[1], [0], [0], [1], [0, 0, 1, 1], [], []>} : vector<1x2xf32>, vector<2x64xf32>, vector<1x64xf32> -> vector<1x64xf32>
    %c0_10 = arith.constant 0 : index
    %c0_11 = arith.constant 0 : index
    %11 = vector.load %arg5[%c0_10, %c0_11] : memref<1x1xf32, #tpu.memory_space<vmem>>, vector<1x1xf32>
    %12 = vector.broadcast %11 : vector<1x1xf32> to vector<1x64xf32>
    %13 = arith.addf %10, %12 : vector<1x64xf32>
    %14 = arith.negf %13 : vector<1x64xf32>
    %15 = math.exp %14 : vector<1x64xf32>
    %cst_12 = arith.constant 1.000000e+00 : f32
    %16 = vector.broadcast %cst_12 : f32 to vector<1x64xf32>
    %17 = arith.addf %16, %15 : vector<1x64xf32>
    %18 = arith.divf %16, %17 : vector<1x64xf32>
    %19 = vector.broadcast %18 : vector<1x64xf32> to vector<4x64xf32>
    %20 = arith.mulf %1, %19 : vector<4x64xf32>
    %cst_13 = arith.constant dense<0.000000e+00> : vector<4xf32>
    %21 = vector.multi_reduction <add>, %20, %cst_13 [1] : vector<4x64xf32> to vector<4xf32>
    %22 = vector.shape_cast %21 : vector<4xf32> to vector<4x1xf32>
    %cst_14 = arith.constant 1.562500e-02 : f32
    %23 = vector.broadcast %cst_14 : f32 to vector<4x1xf32>
    %24 = arith.mulf %22, %23 : vector<4x1xf32>
    %c0_15 = arith.constant 0 : index
    %c0_16 = arith.constant 0 : index
    %25 = vector.load %arg6[%c0_15, %c0_16] : memref<2x4xf32, #tpu.memory_space<vmem>>, vector<2x4xf32>
    %cst_17 = arith.constant dense<0.000000e+00> : vector<2x1xf32>
    %26 = tpu.matmul %25, %24, %cst_17 {dimension_numbers = #tpu.dot_dimension_numbers<[1], [0], [0], [1], [0, 0, 1, 1], [], []>} : vector<2x4xf32>, vector<4x1xf32>, vector<2x1xf32> -> vector<2x1xf32>
    %c0_18 = arith.constant 0 : index
    %c0_19 = arith.constant 0 : index
    %27 = vector.load %arg7[%c0_18, %c0_19] : memref<2x1xf32, #tpu.memory_space<vmem>>, vector<2x1xf32>
    %28 = arith.addf %26, %27 : vector<2x1xf32>
    %cst_20 = arith.constant 0.000000e+00 : f32
    %29 = vector.broadcast %cst_20 : f32 to vector<2x1xf32>
    %30 = arith.maximumf %28, %29 : vector<2x1xf32>
    %c0_21 = arith.constant 0 : index
    %c0_22 = arith.constant 0 : index
    %31 = vector.load %arg8[%c0_21, %c0_22] : memref<4x2xf32, #tpu.memory_space<vmem>>, vector<4x2xf32>
    %cst_23 = arith.constant dense<0.000000e+00> : vector<4x1xf32>
    %32 = tpu.matmul %31, %30, %cst_23 {dimension_numbers = #tpu.dot_dimension_numbers<[1], [0], [0], [1], [0, 0, 1, 1], [], []>} : vector<4x2xf32>, vector<2x1xf32>, vector<4x1xf32> -> vector<4x1xf32>
    %c0_24 = arith.constant 0 : index
    %c0_25 = arith.constant 0 : index
    %33 = vector.load %arg9[%c0_24, %c0_25] : memref<4x1xf32, #tpu.memory_space<vmem>>, vector<4x1xf32>
    %34 = arith.addf %32, %33 : vector<4x1xf32>
    %35 = arith.negf %34 : vector<4x1xf32>
    %36 = math.exp %35 : vector<4x1xf32>
    %cst_26 = arith.constant 1.000000e+00 : f32
    %37 = vector.broadcast %cst_26 : f32 to vector<4x1xf32>
    %38 = arith.addf %37, %36 : vector<4x1xf32>
    %39 = arith.divf %37, %38 : vector<4x1xf32>
    %40 = vector.broadcast %39 : vector<4x1xf32> to vector<4x64xf32>
    %41 = arith.mulf %20, %40 : vector<4x64xf32>
    %c0_27 = arith.constant 0 : index
    %c0_28 = arith.constant 0 : index
    %c0_29 = arith.constant 0 : index
    %42 = vector.load %arg10[%c0_27, %c0_28, %c0_29] : memref<1x4x64xf32, #tpu.memory_space<vmem>>, vector<1x4x64xf32>
    %43 = vector.shape_cast %42 : vector<1x4x64xf32> to vector<4x64xf32>
    %44 = vector.shape_cast %41 : vector<4x64xf32> to vector<1x4x64xf32>
    tpu.vector_store %arg10[%c0_27, %c0_28, %c0_29], %44 {strides = array<i32>} : memref<1x4x64xf32, #tpu.memory_space<vmem>>, vector<1x4x64xf32>,
    return
  }
  func.func @transform_0(%arg0: i32) -> (i32, i32, i32) {
    %c0_i32 = arith.constant 0 : i32
    %c0_i32_0 = arith.constant 0 : i32
    %c0_i32_1 = arith.constant 0 : i32
    return %arg0, %c0_i32, %c0_i32_0 : i32, i32, i32
  }
  func.func @transform_1(%arg0: i32) -> (i32, i32) {
    %c0_i32 = arith.constant 0 : i32
    %c0_i32_0 = arith.constant 0 : i32
    %c0_i32_1 = arith.constant 0 : i32
    return %c0_i32, %c0_i32_0 : i32, i32
  }
  func.func @transform_2(%arg0: i32) -> (i32, i32) {
    %c0_i32 = arith.constant 0 : i32
    %c0_i32_0 = arith.constant 0 : i32
    %c0_i32_1 = arith.constant 0 : i32
    return %c0_i32, %c0_i32_0 : i32, i32
  }
  func.func @transform_3(%arg0: i32) -> (i32, i32) {
    %c0_i32 = arith.constant 0 : i32
    %c0_i32_0 = arith.constant 0 : i32
    %c0_i32_1 = arith.constant 0 : i32
    return %c0_i32, %c0_i32_0 : i32, i32
  }
  func.func @transform_4(%arg0: i32) -> (i32, i32) {
    %c0_i32 = arith.constant 0 : i32
    %c0_i32_0 = arith.constant 0 : i32
    %c0_i32_1 = arith.constant 0 : i32
    return %c0_i32, %c0_i32_0 : i32, i32
  }
  func.func @transform_5(%arg0: i32) -> (i32, i32) {
    %c0_i32 = arith.constant 0 : i32
    %c0_i32_0 = arith.constant 0 : i32
    %c0_i32_1 = arith.constant 0 : i32
    return %c0_i32, %c0_i32_0 : i32, i32
  }
  func.func @transform_6(%arg0: i32) -> (i32, i32) {
    %c0_i32 = arith.constant 0 : i32
    %c0_i32_0 = arith.constant 0 : i32
    %c0_i32_1 = arith.constant 0 : i32
    return %c0_i32, %c0_i32_0 : i32, i32
  }
  func.func @transform_7(%arg0: i32) -> (i32, i32) {
    %c0_i32 = arith.constant 0 : i32
    %c0_i32_0 = arith.constant 0 : i32
    %c0_i32_1 = arith.constant 0 : i32
    return %c0_i32, %c0_i32_0 : i32, i32
  }
  func.func @transform_8(%arg0: i32) -> (i32, i32) {
    %c0_i32 = arith.constant 0 : i32
    %c0_i32_0 = arith.constant 0 : i32
    %c0_i32_1 = arith.constant 0 : i32
    return %c0_i32, %c0_i32_0 : i32, i32
  }
  func.func @transform_9(%arg0: i32) -> (i32, i32, i32) {
    %c0_i32 = arith.constant 0 : i32
    %c0_i32_0 = arith.constant 0 : i32
    %c0_i32_1 = arith.constant 0 : i32
    return %arg0, %c0_i32, %c0_i32_0 : i32, i32, i32
  }
}

module attributes {stable_mosaic.version = 11 : i64} {
  func.func @_maxpool_kernel(%arg0: i32, %arg1: memref<1x4x102xf32, #tpu.memory_space<vmem>>, %arg2: memref<1x4x80xf32, #tpu.memory_space<vmem>>) attributes {dimension_semantics = [#tpu.dimension_semantics<parallel>], iteration_bounds = array<i64: 2>, scalar_prefetch = 0 : i64, scratch_operands = 0 : i64, tpu.core_type = #tpu.core_type<tc>, window_params = [{transform_indices = @transform_0, window_bounds = array<i64: 1, 4, 102>}, {transform_indices = @transform_1, window_bounds = array<i64: 1, 4, 80>}]} {
    %c0 = arith.constant 0 : index
    %c0_0 = arith.constant 0 : index
    %c0_1 = arith.constant 0 : index
    %0 = vector.load %arg1[%c0, %c0_0, %c0_1] : memref<1x4x102xf32, #tpu.memory_space<vmem>>, vector<1x4x80xf32>
    %1 = vector.shape_cast %0 : vector<1x4x80xf32> to vector<4x80xf32>
    %c0_2 = arith.constant 0 : index
    %c0_3 = arith.constant 0 : index
    %c1 = arith.constant 1 : index
    %2 = vector.load %arg1[%c0_2, %c0_3, %c1] : memref<1x4x102xf32, #tpu.memory_space<vmem>>, vector<1x4x80xf32>
    %3 = vector.shape_cast %2 : vector<1x4x80xf32> to vector<4x80xf32>
    %4 = arith.maximumf %1, %3 : vector<4x80xf32>
    %c0_4 = arith.constant 0 : index
    %c0_5 = arith.constant 0 : index
    %c2 = arith.constant 2 : index
    %5 = vector.load %arg1[%c0_4, %c0_5, %c2] : memref<1x4x102xf32, #tpu.memory_space<vmem>>, vector<1x4x80xf32>
    %6 = vector.shape_cast %5 : vector<1x4x80xf32> to vector<4x80xf32>
    %7 = arith.maximumf %4, %6 : vector<4x80xf32>
    %c0_6 = arith.constant 0 : index
    %c0_7 = arith.constant 0 : index
    %c10 = arith.constant 10 : index
    %8 = vector.load %arg1[%c0_6, %c0_7, %c10] : memref<1x4x102xf32, #tpu.memory_space<vmem>>, vector<1x4x80xf32>
    %9 = vector.shape_cast %8 : vector<1x4x80xf32> to vector<4x80xf32>
    %10 = arith.maximumf %7, %9 : vector<4x80xf32>
    %c0_8 = arith.constant 0 : index
    %c0_9 = arith.constant 0 : index
    %c11 = arith.constant 11 : index
    %11 = vector.load %arg1[%c0_8, %c0_9, %c11] : memref<1x4x102xf32, #tpu.memory_space<vmem>>, vector<1x4x80xf32>
    %12 = vector.shape_cast %11 : vector<1x4x80xf32> to vector<4x80xf32>
    %13 = arith.maximumf %10, %12 : vector<4x80xf32>
    %c0_10 = arith.constant 0 : index
    %c0_11 = arith.constant 0 : index
    %c12 = arith.constant 12 : index
    %14 = vector.load %arg1[%c0_10, %c0_11, %c12] : memref<1x4x102xf32, #tpu.memory_space<vmem>>, vector<1x4x80xf32>
    %15 = vector.shape_cast %14 : vector<1x4x80xf32> to vector<4x80xf32>
    %16 = arith.maximumf %13, %15 : vector<4x80xf32>
    %c0_12 = arith.constant 0 : index
    %c0_13 = arith.constant 0 : index
    %c20 = arith.constant 20 : index
    %17 = vector.load %arg1[%c0_12, %c0_13, %c20] : memref<1x4x102xf32, #tpu.memory_space<vmem>>, vector<1x4x80xf32>
    %18 = vector.shape_cast %17 : vector<1x4x80xf32> to vector<4x80xf32>
    %19 = arith.maximumf %16, %18 : vector<4x80xf32>
    %c0_14 = arith.constant 0 : index
    %c0_15 = arith.constant 0 : index
    %c21 = arith.constant 21 : index
    %20 = vector.load %arg1[%c0_14, %c0_15, %c21] : memref<1x4x102xf32, #tpu.memory_space<vmem>>, vector<1x4x80xf32>
    %21 = vector.shape_cast %20 : vector<1x4x80xf32> to vector<4x80xf32>
    %22 = arith.maximumf %19, %21 : vector<4x80xf32>
    %c0_16 = arith.constant 0 : index
    %c0_17 = arith.constant 0 : index
    %c22 = arith.constant 22 : index
    %23 = vector.load %arg1[%c0_16, %c0_17, %c22] : memref<1x4x102xf32, #tpu.memory_space<vmem>>, vector<1x4x80xf32>
    %24 = vector.shape_cast %23 : vector<1x4x80xf32> to vector<4x80xf32>
    %25 = arith.maximumf %22, %24 : vector<4x80xf32>
    %c0_18 = arith.constant 0 : index
    %c0_19 = arith.constant 0 : index
    %c0_20 = arith.constant 0 : index
    %26 = vector.load %arg2[%c0_18, %c0_19, %c0_20] : memref<1x4x80xf32, #tpu.memory_space<vmem>>, vector<1x4x80xf32>
    %27 = vector.shape_cast %26 : vector<1x4x80xf32> to vector<4x80xf32>
    %28 = vector.shape_cast %25 : vector<4x80xf32> to vector<1x4x80xf32>
    tpu.vector_store %arg2[%c0_18, %c0_19, %c0_20], %28 {strides = array<i32>} : memref<1x4x80xf32, #tpu.memory_space<vmem>>, vector<1x4x80xf32>,
    return
  }
  func.func @transform_0(%arg0: i32) -> (i32, i32, i32) {
    %c0_i32 = arith.constant 0 : i32
    %c0_i32_0 = arith.constant 0 : i32
    %c0_i32_1 = arith.constant 0 : i32
    return %arg0, %c0_i32, %c0_i32_0 : i32, i32, i32
  }
  func.func @transform_1(%arg0: i32) -> (i32, i32, i32) {
    %c0_i32 = arith.constant 0 : i32
    %c0_i32_0 = arith.constant 0 : i32
    %c0_i32_1 = arith.constant 0 : i32
    return %arg0, %c0_i32, %c0_i32_0 : i32, i32, i32
  }
}

module attributes {stable_mosaic.version = 11 : i64} {
  func.func @_conv3x3_kernel(%arg0: i32, %arg1: memref<1x4x38xf32, #tpu.memory_space<vmem>>, %arg2: memref<9x4x4xf32, #tpu.memory_space<vmem>>, %arg3: memref<4x1xf32, #tpu.memory_space<vmem>>, %arg4: memref<1x4x24xf32, #tpu.memory_space<vmem>>) attributes {dimension_semantics = [#tpu.dimension_semantics<parallel>], iteration_bounds = array<i64: 2>, scalar_prefetch = 0 : i64, scratch_operands = 0 : i64, tpu.core_type = #tpu.core_type<tc>, window_params = [{transform_indices = @transform_0, window_bounds = array<i64: 1, 4, 38>}, {pipeline_mode = #tpu.pipeline_mode<synchronous>, transform_indices = @transform_1, window_bounds = array<i64: 9, 4, 4>}, {pipeline_mode = #tpu.pipeline_mode<synchronous>, transform_indices = @transform_2, window_bounds = array<i64: 4, 1>}, {transform_indices = @transform_3, window_bounds = array<i64: 1, 4, 24>}]} {
    %cst = arith.constant 0.000000e+00 : f32
    %0 = vector.broadcast %cst : f32 to vector<4x24xf32>
    %c0 = arith.constant 0 : index
    %c0_0 = arith.constant 0 : index
    %c0_1 = arith.constant 0 : index
    %1 = vector.load %arg1[%c0, %c0_0, %c0_1] : memref<1x4x38xf32, #tpu.memory_space<vmem>>, vector<1x4x24xf32>
    %2 = vector.shape_cast %1 : vector<1x4x24xf32> to vector<4x24xf32>
    %c0_2 = arith.constant 0 : index
    %c0_3 = arith.constant 0 : index
    %c0_4 = arith.constant 0 : index
    %3 = vector.load %arg2[%c0_2, %c0_3, %c0_4] : memref<9x4x4xf32, #tpu.memory_space<vmem>>, vector<1x4x4xf32>
    %4 = vector.shape_cast %3 : vector<1x4x4xf32> to vector<4x4xf32>
    %cst_5 = arith.constant dense<0.000000e+00> : vector<4x24xf32>
    %5 = tpu.matmul %4, %2, %cst_5 {dimension_numbers = #tpu.dot_dimension_numbers<[1], [0], [0], [1], [0, 0, 1, 1], [], []>} : vector<4x4xf32>, vector<4x24xf32>, vector<4x24xf32> -> vector<4x24xf32>
    %6 = arith.addf %0, %5 : vector<4x24xf32>
    %c0_6 = arith.constant 0 : index
    %c0_7 = arith.constant 0 : index
    %c1 = arith.constant 1 : index
    %7 = vector.load %arg1[%c0_6, %c0_7, %c1] : memref<1x4x38xf32, #tpu.memory_space<vmem>>, vector<1x4x24xf32>
    %8 = vector.shape_cast %7 : vector<1x4x24xf32> to vector<4x24xf32>
    %c1_8 = arith.constant 1 : index
    %c0_9 = arith.constant 0 : index
    %c0_10 = arith.constant 0 : index
    %9 = vector.load %arg2[%c1_8, %c0_9, %c0_10] : memref<9x4x4xf32, #tpu.memory_space<vmem>>, vector<1x4x4xf32>
    %10 = vector.shape_cast %9 : vector<1x4x4xf32> to vector<4x4xf32>
    %cst_11 = arith.constant dense<0.000000e+00> : vector<4x24xf32>
    %11 = tpu.matmul %10, %8, %cst_11 {dimension_numbers = #tpu.dot_dimension_numbers<[1], [0], [0], [1], [0, 0, 1, 1], [], []>} : vector<4x4xf32>, vector<4x24xf32>, vector<4x24xf32> -> vector<4x24xf32>
    %12 = arith.addf %6, %11 : vector<4x24xf32>
    %c0_12 = arith.constant 0 : index
    %c0_13 = arith.constant 0 : index
    %c2 = arith.constant 2 : index
    %13 = vector.load %arg1[%c0_12, %c0_13, %c2] : memref<1x4x38xf32, #tpu.memory_space<vmem>>, vector<1x4x24xf32>
    %14 = vector.shape_cast %13 : vector<1x4x24xf32> to vector<4x24xf32>
    %c2_14 = arith.constant 2 : index
    %c0_15 = arith.constant 0 : index
    %c0_16 = arith.constant 0 : index
    %15 = vector.load %arg2[%c2_14, %c0_15, %c0_16] : memref<9x4x4xf32, #tpu.memory_space<vmem>>, vector<1x4x4xf32>
    %16 = vector.shape_cast %15 : vector<1x4x4xf32> to vector<4x4xf32>
    %cst_17 = arith.constant dense<0.000000e+00> : vector<4x24xf32>
    %17 = tpu.matmul %16, %14, %cst_17 {dimension_numbers = #tpu.dot_dimension_numbers<[1], [0], [0], [1], [0, 0, 1, 1], [], []>} : vector<4x4xf32>, vector<4x24xf32>, vector<4x24xf32> -> vector<4x24xf32>
    %18 = arith.addf %12, %17 : vector<4x24xf32>
    %c0_18 = arith.constant 0 : index
    %c0_19 = arith.constant 0 : index
    %c6 = arith.constant 6 : index
    %19 = vector.load %arg1[%c0_18, %c0_19, %c6] : memref<1x4x38xf32, #tpu.memory_space<vmem>>, vector<1x4x24xf32>
    %20 = vector.shape_cast %19 : vector<1x4x24xf32> to vector<4x24xf32>
    %c3 = arith.constant 3 : index
    %c0_20 = arith.constant 0 : index
    %c0_21 = arith.constant 0 : index
    %21 = vector.load %arg2[%c3, %c0_20, %c0_21] : memref<9x4x4xf32, #tpu.memory_space<vmem>>, vector<1x4x4xf32>
    %22 = vector.shape_cast %21 : vector<1x4x4xf32> to vector<4x4xf32>
    %cst_22 = arith.constant dense<0.000000e+00> : vector<4x24xf32>
    %23 = tpu.matmul %22, %20, %cst_22 {dimension_numbers = #tpu.dot_dimension_numbers<[1], [0], [0], [1], [0, 0, 1, 1], [], []>} : vector<4x4xf32>, vector<4x24xf32>, vector<4x24xf32> -> vector<4x24xf32>
    %24 = arith.addf %18, %23 : vector<4x24xf32>
    %c0_23 = arith.constant 0 : index
    %c0_24 = arith.constant 0 : index
    %c7 = arith.constant 7 : index
    %25 = vector.load %arg1[%c0_23, %c0_24, %c7] : memref<1x4x38xf32, #tpu.memory_space<vmem>>, vector<1x4x24xf32>
    %26 = vector.shape_cast %25 : vector<1x4x24xf32> to vector<4x24xf32>
    %c4 = arith.constant 4 : index
    %c0_25 = arith.constant 0 : index
    %c0_26 = arith.constant 0 : index
    %27 = vector.load %arg2[%c4, %c0_25, %c0_26] : memref<9x4x4xf32, #tpu.memory_space<vmem>>, vector<1x4x4xf32>
    %28 = vector.shape_cast %27 : vector<1x4x4xf32> to vector<4x4xf32>
    %cst_27 = arith.constant dense<0.000000e+00> : vector<4x24xf32>
    %29 = tpu.matmul %28, %26, %cst_27 {dimension_numbers = #tpu.dot_dimension_numbers<[1], [0], [0], [1], [0, 0, 1, 1], [], []>} : vector<4x4xf32>, vector<4x24xf32>, vector<4x24xf32> -> vector<4x24xf32>
    %30 = arith.addf %24, %29 : vector<4x24xf32>
    %c0_28 = arith.constant 0 : index
    %c0_29 = arith.constant 0 : index
    %c8 = arith.constant 8 : index
    %31 = vector.load %arg1[%c0_28, %c0_29, %c8] : memref<1x4x38xf32, #tpu.memory_space<vmem>>, vector<1x4x24xf32>
    %32 = vector.shape_cast %31 : vector<1x4x24xf32> to vector<4x24xf32>
    %c5 = arith.constant 5 : index
    %c0_30 = arith.constant 0 : index
    %c0_31 = arith.constant 0 : index
    %33 = vector.load %arg2[%c5, %c0_30, %c0_31] : memref<9x4x4xf32, #tpu.memory_space<vmem>>, vector<1x4x4xf32>
    %34 = vector.shape_cast %33 : vector<1x4x4xf32> to vector<4x4xf32>
    %cst_32 = arith.constant dense<0.000000e+00> : vector<4x24xf32>
    %35 = tpu.matmul %34, %32, %cst_32 {dimension_numbers = #tpu.dot_dimension_numbers<[1], [0], [0], [1], [0, 0, 1, 1], [], []>} : vector<4x4xf32>, vector<4x24xf32>, vector<4x24xf32> -> vector<4x24xf32>
    %36 = arith.addf %30, %35 : vector<4x24xf32>
    %c0_33 = arith.constant 0 : index
    %c0_34 = arith.constant 0 : index
    %c12 = arith.constant 12 : index
    %37 = vector.load %arg1[%c0_33, %c0_34, %c12] : memref<1x4x38xf32, #tpu.memory_space<vmem>>, vector<1x4x24xf32>
    %38 = vector.shape_cast %37 : vector<1x4x24xf32> to vector<4x24xf32>
    %c6_35 = arith.constant 6 : index
    %c0_36 = arith.constant 0 : index
    %c0_37 = arith.constant 0 : index
    %39 = vector.load %arg2[%c6_35, %c0_36, %c0_37] : memref<9x4x4xf32, #tpu.memory_space<vmem>>, vector<1x4x4xf32>
    %40 = vector.shape_cast %39 : vector<1x4x4xf32> to vector<4x4xf32>
    %cst_38 = arith.constant dense<0.000000e+00> : vector<4x24xf32>
    %41 = tpu.matmul %40, %38, %cst_38 {dimension_numbers = #tpu.dot_dimension_numbers<[1], [0], [0], [1], [0, 0, 1, 1], [], []>} : vector<4x4xf32>, vector<4x24xf32>, vector<4x24xf32> -> vector<4x24xf32>
    %42 = arith.addf %36, %41 : vector<4x24xf32>
    %c0_39 = arith.constant 0 : index
    %c0_40 = arith.constant 0 : index
    %c13 = arith.constant 13 : index
    %43 = vector.load %arg1[%c0_39, %c0_40, %c13] : memref<1x4x38xf32, #tpu.memory_space<vmem>>, vector<1x4x24xf32>
    %44 = vector.shape_cast %43 : vector<1x4x24xf32> to vector<4x24xf32>
    %c7_41 = arith.constant 7 : index
    %c0_42 = arith.constant 0 : index
    %c0_43 = arith.constant 0 : index
    %45 = vector.load %arg2[%c7_41, %c0_42, %c0_43] : memref<9x4x4xf32, #tpu.memory_space<vmem>>, vector<1x4x4xf32>
    %46 = vector.shape_cast %45 : vector<1x4x4xf32> to vector<4x4xf32>
    %cst_44 = arith.constant dense<0.000000e+00> : vector<4x24xf32>
    %47 = tpu.matmul %46, %44, %cst_44 {dimension_numbers = #tpu.dot_dimension_numbers<[1], [0], [0], [1], [0, 0, 1, 1], [], []>} : vector<4x4xf32>, vector<4x24xf32>, vector<4x24xf32> -> vector<4x24xf32>
    %48 = arith.addf %42, %47 : vector<4x24xf32>
    %c0_45 = arith.constant 0 : index
    %c0_46 = arith.constant 0 : index
    %c14 = arith.constant 14 : index
    %49 = vector.load %arg1[%c0_45, %c0_46, %c14] : memref<1x4x38xf32, #tpu.memory_space<vmem>>, vector<1x4x24xf32>
    %50 = vector.shape_cast %49 : vector<1x4x24xf32> to vector<4x24xf32>
    %c8_47 = arith.constant 8 : index
    %c0_48 = arith.constant 0 : index
    %c0_49 = arith.constant 0 : index
    %51 = vector.load %arg2[%c8_47, %c0_48, %c0_49] : memref<9x4x4xf32, #tpu.memory_space<vmem>>, vector<1x4x4xf32>
    %52 = vector.shape_cast %51 : vector<1x4x4xf32> to vector<4x4xf32>
    %cst_50 = arith.constant dense<0.000000e+00> : vector<4x24xf32>
    %53 = tpu.matmul %52, %50, %cst_50 {dimension_numbers = #tpu.dot_dimension_numbers<[1], [0], [0], [1], [0, 0, 1, 1], [], []>} : vector<4x4xf32>, vector<4x24xf32>, vector<4x24xf32> -> vector<4x24xf32>
    %54 = arith.addf %48, %53 : vector<4x24xf32>
    %c0_51 = arith.constant 0 : index
    %c0_52 = arith.constant 0 : index
    %55 = vector.load %arg3[%c0_51, %c0_52] : memref<4x1xf32, #tpu.memory_space<vmem>>, vector<4x1xf32>
    %56 = vector.broadcast %55 : vector<4x1xf32> to vector<4x24xf32>
    %57 = arith.addf %54, %56 : vector<4x24xf32>
    %cst_53 = arith.constant 0.000000e+00 : f32
    %58 = vector.broadcast %cst_53 : f32 to vector<4x24xf32>
    %59 = arith.maximumf %57, %58 : vector<4x24xf32>
    %c0_54 = arith.constant 0 : index
    %c0_55 = arith.constant 0 : index
    %c0_56 = arith.constant 0 : index
    %60 = vector.load %arg4[%c0_54, %c0_55, %c0_56] : memref<1x4x24xf32, #tpu.memory_space<vmem>>, vector<1x4x24xf32>
    %61 = vector.shape_cast %60 : vector<1x4x24xf32> to vector<4x24xf32>
    %62 = vector.shape_cast %59 : vector<4x24xf32> to vector<1x4x24xf32>
    tpu.vector_store %arg4[%c0_54, %c0_55, %c0_56], %62 {strides = array<i32>} : memref<1x4x24xf32, #tpu.memory_space<vmem>>, vector<1x4x24xf32>,
    return
  }
  func.func @transform_0(%arg0: i32) -> (i32, i32, i32) {
    %c0_i32 = arith.constant 0 : i32
    %c0_i32_0 = arith.constant 0 : i32
    %c0_i32_1 = arith.constant 0 : i32
    return %arg0, %c0_i32, %c0_i32_0 : i32, i32, i32
  }
  func.func @transform_1(%arg0: i32) -> (i32, i32, i32) {
    %c0_i32 = arith.constant 0 : i32
    %c0_i32_0 = arith.constant 0 : i32
    %c0_i32_1 = arith.constant 0 : i32
    %c0_i32_2 = arith.constant 0 : i32
    return %c0_i32, %c0_i32_0, %c0_i32_1 : i32, i32, i32
  }
  func.func @transform_2(%arg0: i32) -> (i32, i32) {
    %c0_i32 = arith.constant 0 : i32
    %c0_i32_0 = arith.constant 0 : i32
    %c0_i32_1 = arith.constant 0 : i32
    return %c0_i32, %c0_i32_0 : i32, i32
  }
  func.func @transform_3(%arg0: i32) -> (i32, i32, i32) {
    %c0_i32 = arith.constant 0 : i32
    %c0_i32_0 = arith.constant 0 : i32
    %c0_i32_1 = arith.constant 0 : i32
    return %arg0, %c0_i32, %c0_i32_0 : i32, i32, i32
  }
}

module attributes {stable_mosaic.version = 11 : i64} {
  func.func @_bn_stats_kernel(%arg0: i32, %arg1: memref<1x4x16xf32, #tpu.memory_space<vmem>>, %arg2: memref<4x1xf32, #tpu.memory_space<vmem>>, %arg3: memref<4x1xf32, #tpu.memory_space<vmem>>) attributes {dimension_semantics = [#tpu.dimension_semantics<arbitrary>], iteration_bounds = array<i64: 2>, scalar_prefetch = 0 : i64, scratch_operands = 0 : i64, tpu.core_type = #tpu.core_type<tc>, window_params = [{transform_indices = @transform_0, window_bounds = array<i64: 1, 4, 16>}, {pipeline_mode = #tpu.pipeline_mode<synchronous>, transform_indices = @transform_1, window_bounds = array<i64: 4, 1>}, {pipeline_mode = #tpu.pipeline_mode<synchronous>, transform_indices = @transform_2, window_bounds = array<i64: 4, 1>}]} {
    %c0_i32 = arith.constant 0 : i32
    %0 = arith.cmpi eq, %arg0, %c0_i32 : i32
    %1 = arith.extui %0 : i1 to i32
    %c0_i32_0 = arith.constant 0 : i32
    %2 = arith.cmpi ne, %1, %c0_i32_0 : i32
    scf.if %2 {
      %cst_12 = arith.constant 0.000000e+00 : f32
      %16 = vector.broadcast %cst_12 : f32 to vector<4x1xf32>
      %c0_13 = arith.constant 0 : index
      %c0_14 = arith.constant 0 : index
      %17 = vector.load %arg2[%c0_13, %c0_14] : memref<4x1xf32, #tpu.memory_space<vmem>>, vector<4x1xf32>
      tpu.vector_store %arg2[%c0_13, %c0_14], %16 {strides = array<i32>} : memref<4x1xf32, #tpu.memory_space<vmem>>, vector<4x1xf32>,
      %cst_15 = arith.constant 0.000000e+00 : f32
      %18 = vector.broadcast %cst_15 : f32 to vector<4x1xf32>
      %c0_16 = arith.constant 0 : index
      %c0_17 = arith.constant 0 : index
      %19 = vector.load %arg3[%c0_16, %c0_17] : memref<4x1xf32, #tpu.memory_space<vmem>>, vector<4x1xf32>
      tpu.vector_store %arg3[%c0_16, %c0_17], %18 {strides = array<i32>} : memref<4x1xf32, #tpu.memory_space<vmem>>, vector<4x1xf32>,
    } else {
    }
    %c0 = arith.constant 0 : index
    %c0_1 = arith.constant 0 : index
    %c0_2 = arith.constant 0 : index
    %3 = vector.load %arg1[%c0, %c0_1, %c0_2] : memref<1x4x16xf32, #tpu.memory_space<vmem>>, vector<1x4x16xf32>
    %4 = vector.shape_cast %3 : vector<1x4x16xf32> to vector<4x16xf32>
    %c0_3 = arith.constant 0 : index
    %c0_4 = arith.constant 0 : index
    %5 = vector.load %arg2[%c0_3, %c0_4] : memref<4x1xf32, #tpu.memory_space<vmem>>, vector<4x1xf32>
    %cst = arith.constant dense<0.000000e+00> : vector<4xf32>
    %6 = vector.multi_reduction <add>, %4, %cst [1] : vector<4x16xf32> to vector<4xf32>
    %7 = vector.shape_cast %6 : vector<4xf32> to vector<4x1xf32>
    %8 = arith.addf %5, %7 : vector<4x1xf32>
    %c0_5 = arith.constant 0 : index
    %c0_6 = arith.constant 0 : index
    %9 = vector.load %arg2[%c0_5, %c0_6] : memref<4x1xf32, #tpu.memory_space<vmem>>, vector<4x1xf32>
    tpu.vector_store %arg2[%c0_5, %c0_6], %8 {strides = array<i32>} : memref<4x1xf32, #tpu.memory_space<vmem>>, vector<4x1xf32>,
    %c0_7 = arith.constant 0 : index
    %c0_8 = arith.constant 0 : index
    %10 = vector.load %arg3[%c0_7, %c0_8] : memref<4x1xf32, #tpu.memory_space<vmem>>, vector<4x1xf32>
    %11 = arith.mulf %4, %4 : vector<4x16xf32>
    %cst_9 = arith.constant dense<0.000000e+00> : vector<4xf32>
    %12 = vector.multi_reduction <add>, %11, %cst_9 [1] : vector<4x16xf32> to vector<4xf32>
    %13 = vector.shape_cast %12 : vector<4xf32> to vector<4x1xf32>
    %14 = arith.addf %10, %13 : vector<4x1xf32>
    %c0_10 = arith.constant 0 : index
    %c0_11 = arith.constant 0 : index
    %15 = vector.load %arg3[%c0_10, %c0_11] : memref<4x1xf32, #tpu.memory_space<vmem>>, vector<4x1xf32>
    tpu.vector_store %arg3[%c0_10, %c0_11], %14 {strides = array<i32>} : memref<4x1xf32, #tpu.memory_space<vmem>>, vector<4x1xf32>,
    return
  }
  func.func @transform_0(%arg0: i32) -> (i32, i32, i32) {
    %c0_i32 = arith.constant 0 : i32
    %c0_i32_0 = arith.constant 0 : i32
    %c0_i32_1 = arith.constant 0 : i32
    return %arg0, %c0_i32, %c0_i32_0 : i32, i32, i32
  }
  func.func @transform_1(%arg0: i32) -> (i32, i32) {
    %c0_i32 = arith.constant 0 : i32
    %c0_i32_0 = arith.constant 0 : i32
    %c0_i32_1 = arith.constant 0 : i32
    return %c0_i32, %c0_i32_0 : i32, i32
  }
  func.func @transform_2(%arg0: i32) -> (i32, i32) {
    %c0_i32 = arith.constant 0 : i32
    %c0_i32_0 = arith.constant 0 : i32
    %c0_i32_1 = arith.constant 0 : i32
    return %c0_i32, %c0_i32_0 : i32, i32
  }
}

module attributes {stable_mosaic.version = 11 : i64} {
  func.func @_bn_norm_kernel(%arg0: i32, %arg1: memref<1x4x16xf32, #tpu.memory_space<vmem>>, %arg2: memref<4x1xf32, #tpu.memory_space<vmem>>, %arg3: memref<4x1xf32, #tpu.memory_space<vmem>>, %arg4: memref<1x4x16xf32, #tpu.memory_space<vmem>>) attributes {dimension_semantics = [#tpu.dimension_semantics<parallel>], iteration_bounds = array<i64: 2>, scalar_prefetch = 0 : i64, scratch_operands = 0 : i64, tpu.core_type = #tpu.core_type<tc>, window_params = [{transform_indices = @transform_0, window_bounds = array<i64: 1, 4, 16>}, {pipeline_mode = #tpu.pipeline_mode<synchronous>, transform_indices = @transform_1, window_bounds = array<i64: 4, 1>}, {pipeline_mode = #tpu.pipeline_mode<synchronous>, transform_indices = @transform_2, window_bounds = array<i64: 4, 1>}, {transform_indices = @transform_3, window_bounds = array<i64: 1, 4, 16>}]} {
    %c0 = arith.constant 0 : index
    %c0_0 = arith.constant 0 : index
    %c0_1 = arith.constant 0 : index
    %0 = vector.load %arg1[%c0, %c0_0, %c0_1] : memref<1x4x16xf32, #tpu.memory_space<vmem>>, vector<1x4x16xf32>
    %1 = vector.shape_cast %0 : vector<1x4x16xf32> to vector<4x16xf32>
    %c0_2 = arith.constant 0 : index
    %c0_3 = arith.constant 0 : index
    %2 = vector.load %arg2[%c0_2, %c0_3] : memref<4x1xf32, #tpu.memory_space<vmem>>, vector<4x1xf32>
    %3 = vector.broadcast %2 : vector<4x1xf32> to vector<4x16xf32>
    %4 = arith.mulf %1, %3 : vector<4x16xf32>
    %c0_4 = arith.constant 0 : index
    %c0_5 = arith.constant 0 : index
    %5 = vector.load %arg3[%c0_4, %c0_5] : memref<4x1xf32, #tpu.memory_space<vmem>>, vector<4x1xf32>
    %6 = vector.broadcast %5 : vector<4x1xf32> to vector<4x16xf32>
    %7 = arith.addf %4, %6 : vector<4x16xf32>
    %cst = arith.constant 0.000000e+00 : f32
    %8 = vector.broadcast %cst : f32 to vector<4x16xf32>
    %9 = arith.maximumf %7, %8 : vector<4x16xf32>
    %c0_6 = arith.constant 0 : index
    %c0_7 = arith.constant 0 : index
    %c0_8 = arith.constant 0 : index
    %10 = vector.load %arg4[%c0_6, %c0_7, %c0_8] : memref<1x4x16xf32, #tpu.memory_space<vmem>>, vector<1x4x16xf32>
    %11 = vector.shape_cast %10 : vector<1x4x16xf32> to vector<4x16xf32>
    %12 = vector.shape_cast %9 : vector<4x16xf32> to vector<1x4x16xf32>
    tpu.vector_store %arg4[%c0_6, %c0_7, %c0_8], %12 {strides = array<i32>} : memref<1x4x16xf32, #tpu.memory_space<vmem>>, vector<1x4x16xf32>,
    return
  }
  func.func @transform_0(%arg0: i32) -> (i32, i32, i32) {
    %c0_i32 = arith.constant 0 : i32
    %c0_i32_0 = arith.constant 0 : i32
    %c0_i32_1 = arith.constant 0 : i32
    return %arg0, %c0_i32, %c0_i32_0 : i32, i32, i32
  }
  func.func @transform_1(%arg0: i32) -> (i32, i32) {
    %c0_i32 = arith.constant 0 : i32
    %c0_i32_0 = arith.constant 0 : i32
    %c0_i32_1 = arith.constant 0 : i32
    return %c0_i32, %c0_i32_0 : i32, i32
  }
  func.func @transform_2(%arg0: i32) -> (i32, i32) {
    %c0_i32 = arith.constant 0 : i32
    %c0_i32_0 = arith.constant 0 : i32
    %c0_i32_1 = arith.constant 0 : i32
    return %c0_i32, %c0_i32_0 : i32, i32
  }
  func.func @transform_3(%arg0: i32) -> (i32, i32, i32) {
    %c0_i32 = arith.constant 0 : i32
    %c0_i32_0 = arith.constant 0 : i32
    %c0_i32_1 = arith.constant 0 : i32
    return %arg0, %c0_i32, %c0_i32_0 : i32, i32, i32
  }
}

module attributes {stable_mosaic.version = 11 : i64} {
  func.func @_bn_stats_res_kernel(%arg0: i32, %arg1: memref<1x4x16xf32, #tpu.memory_space<vmem>>, %arg2: memref<1x4x16xf32, #tpu.memory_space<vmem>>, %arg3: memref<4x1xf32, #tpu.memory_space<vmem>>, %arg4: memref<4x1xf32, #tpu.memory_space<vmem>>) attributes {dimension_semantics = [#tpu.dimension_semantics<arbitrary>], iteration_bounds = array<i64: 2>, scalar_prefetch = 0 : i64, scratch_operands = 0 : i64, tpu.core_type = #tpu.core_type<tc>, window_params = [{transform_indices = @transform_0, window_bounds = array<i64: 1, 4, 16>}, {transform_indices = @transform_1, window_bounds = array<i64: 1, 4, 16>}, {pipeline_mode = #tpu.pipeline_mode<synchronous>, transform_indices = @transform_2, window_bounds = array<i64: 4, 1>}, {pipeline_mode = #tpu.pipeline_mode<synchronous>, transform_indices = @transform_3, window_bounds = array<i64: 4, 1>}]} {
    %c0_i32 = arith.constant 0 : i32
    %0 = arith.cmpi eq, %arg0, %c0_i32 : i32
    %1 = arith.extui %0 : i1 to i32
    %c0_i32_0 = arith.constant 0 : i32
    %2 = arith.cmpi ne, %1, %c0_i32_0 : i32
    scf.if %2 {
      %cst_15 = arith.constant 0.000000e+00 : f32
      %19 = vector.broadcast %cst_15 : f32 to vector<4x1xf32>
      %c0_16 = arith.constant 0 : index
      %c0_17 = arith.constant 0 : index
      %20 = vector.load %arg3[%c0_16, %c0_17] : memref<4x1xf32, #tpu.memory_space<vmem>>, vector<4x1xf32>
      tpu.vector_store %arg3[%c0_16, %c0_17], %19 {strides = array<i32>} : memref<4x1xf32, #tpu.memory_space<vmem>>, vector<4x1xf32>,
      %cst_18 = arith.constant 0.000000e+00 : f32
      %21 = vector.broadcast %cst_18 : f32 to vector<4x1xf32>
      %c0_19 = arith.constant 0 : index
      %c0_20 = arith.constant 0 : index
      %22 = vector.load %arg4[%c0_19, %c0_20] : memref<4x1xf32, #tpu.memory_space<vmem>>, vector<4x1xf32>
      tpu.vector_store %arg4[%c0_19, %c0_20], %21 {strides = array<i32>} : memref<4x1xf32, #tpu.memory_space<vmem>>, vector<4x1xf32>,
    } else {
    }
    %c0 = arith.constant 0 : index
    %c0_1 = arith.constant 0 : index
    %c0_2 = arith.constant 0 : index
    %3 = vector.load %arg1[%c0, %c0_1, %c0_2] : memref<1x4x16xf32, #tpu.memory_space<vmem>>, vector<1x4x16xf32>
    %4 = vector.shape_cast %3 : vector<1x4x16xf32> to vector<4x16xf32>
    %c0_3 = arith.constant 0 : index
    %c0_4 = arith.constant 0 : index
    %c0_5 = arith.constant 0 : index
    %5 = vector.load %arg2[%c0_3, %c0_4, %c0_5] : memref<1x4x16xf32, #tpu.memory_space<vmem>>, vector<1x4x16xf32>
    %6 = vector.shape_cast %5 : vector<1x4x16xf32> to vector<4x16xf32>
    %7 = arith.addf %4, %6 : vector<4x16xf32>
    %c0_6 = arith.constant 0 : index
    %c0_7 = arith.constant 0 : index
    %8 = vector.load %arg3[%c0_6, %c0_7] : memref<4x1xf32, #tpu.memory_space<vmem>>, vector<4x1xf32>
    %cst = arith.constant dense<0.000000e+00> : vector<4xf32>
    %9 = vector.multi_reduction <add>, %7, %cst [1] : vector<4x16xf32> to vector<4xf32>
    %10 = vector.shape_cast %9 : vector<4xf32> to vector<4x1xf32>
    %11 = arith.addf %8, %10 : vector<4x1xf32>
    %c0_8 = arith.constant 0 : index
    %c0_9 = arith.constant 0 : index
    %12 = vector.load %arg3[%c0_8, %c0_9] : memref<4x1xf32, #tpu.memory_space<vmem>>, vector<4x1xf32>
    tpu.vector_store %arg3[%c0_8, %c0_9], %11 {strides = array<i32>} : memref<4x1xf32, #tpu.memory_space<vmem>>, vector<4x1xf32>,
    %c0_10 = arith.constant 0 : index
    %c0_11 = arith.constant 0 : index
    %13 = vector.load %arg4[%c0_10, %c0_11] : memref<4x1xf32, #tpu.memory_space<vmem>>, vector<4x1xf32>
    %14 = arith.mulf %7, %7 : vector<4x16xf32>
    %cst_12 = arith.constant dense<0.000000e+00> : vector<4xf32>
    %15 = vector.multi_reduction <add>, %14, %cst_12 [1] : vector<4x16xf32> to vector<4xf32>
    %16 = vector.shape_cast %15 : vector<4xf32> to vector<4x1xf32>
    %17 = arith.addf %13, %16 : vector<4x1xf32>
    %c0_13 = arith.constant 0 : index
    %c0_14 = arith.constant 0 : index
    %18 = vector.load %arg4[%c0_13, %c0_14] : memref<4x1xf32, #tpu.memory_space<vmem>>, vector<4x1xf32>
    tpu.vector_store %arg4[%c0_13, %c0_14], %17 {strides = array<i32>} : memref<4x1xf32, #tpu.memory_space<vmem>>, vector<4x1xf32>,
    return
  }
  func.func @transform_0(%arg0: i32) -> (i32, i32, i32) {
    %c0_i32 = arith.constant 0 : i32
    %c0_i32_0 = arith.constant 0 : i32
    %c0_i32_1 = arith.constant 0 : i32
    return %arg0, %c0_i32, %c0_i32_0 : i32, i32, i32
  }
  func.func @transform_1(%arg0: i32) -> (i32, i32, i32) {
    %c0_i32 = arith.constant 0 : i32
    %c0_i32_0 = arith.constant 0 : i32
    %c0_i32_1 = arith.constant 0 : i32
    return %arg0, %c0_i32, %c0_i32_0 : i32, i32, i32
  }
  func.func @transform_2(%arg0: i32) -> (i32, i32) {
    %c0_i32 = arith.constant 0 : i32
    %c0_i32_0 = arith.constant 0 : i32
    %c0_i32_1 = arith.constant 0 : i32
    return %c0_i32, %c0_i32_0 : i32, i32
  }
  func.func @transform_3(%arg0: i32) -> (i32, i32) {
    %c0_i32 = arith.constant 0 : i32
    %c0_i32_0 = arith.constant 0 : i32
    %c0_i32_1 = arith.constant 0 : i32
    return %c0_i32, %c0_i32_0 : i32, i32
  }
}

module attributes {stable_mosaic.version = 11 : i64} {
  func.func @_bn_norm_res_kernel(%arg0: i32, %arg1: memref<1x4x16xf32, #tpu.memory_space<vmem>>, %arg2: memref<1x4x16xf32, #tpu.memory_space<vmem>>, %arg3: memref<4x1xf32, #tpu.memory_space<vmem>>, %arg4: memref<4x1xf32, #tpu.memory_space<vmem>>, %arg5: memref<1x4x16xf32, #tpu.memory_space<vmem>>) attributes {dimension_semantics = [#tpu.dimension_semantics<parallel>], iteration_bounds = array<i64: 2>, scalar_prefetch = 0 : i64, scratch_operands = 0 : i64, tpu.core_type = #tpu.core_type<tc>, window_params = [{transform_indices = @transform_0, window_bounds = array<i64: 1, 4, 16>}, {transform_indices = @transform_1, window_bounds = array<i64: 1, 4, 16>}, {pipeline_mode = #tpu.pipeline_mode<synchronous>, transform_indices = @transform_2, window_bounds = array<i64: 4, 1>}, {pipeline_mode = #tpu.pipeline_mode<synchronous>, transform_indices = @transform_3, window_bounds = array<i64: 4, 1>}, {transform_indices = @transform_4, window_bounds = array<i64: 1, 4, 16>}]} {
    %c0 = arith.constant 0 : index
    %c0_0 = arith.constant 0 : index
    %c0_1 = arith.constant 0 : index
    %0 = vector.load %arg1[%c0, %c0_0, %c0_1] : memref<1x4x16xf32, #tpu.memory_space<vmem>>, vector<1x4x16xf32>
    %1 = vector.shape_cast %0 : vector<1x4x16xf32> to vector<4x16xf32>
    %c0_2 = arith.constant 0 : index
    %c0_3 = arith.constant 0 : index
    %c0_4 = arith.constant 0 : index
    %2 = vector.load %arg2[%c0_2, %c0_3, %c0_4] : memref<1x4x16xf32, #tpu.memory_space<vmem>>, vector<1x4x16xf32>
    %3 = vector.shape_cast %2 : vector<1x4x16xf32> to vector<4x16xf32>
    %4 = arith.addf %1, %3 : vector<4x16xf32>
    %c0_5 = arith.constant 0 : index
    %c0_6 = arith.constant 0 : index
    %5 = vector.load %arg3[%c0_5, %c0_6] : memref<4x1xf32, #tpu.memory_space<vmem>>, vector<4x1xf32>
    %6 = vector.broadcast %5 : vector<4x1xf32> to vector<4x16xf32>
    %7 = arith.mulf %4, %6 : vector<4x16xf32>
    %c0_7 = arith.constant 0 : index
    %c0_8 = arith.constant 0 : index
    %8 = vector.load %arg4[%c0_7, %c0_8] : memref<4x1xf32, #tpu.memory_space<vmem>>, vector<4x1xf32>
    %9 = vector.broadcast %8 : vector<4x1xf32> to vector<4x16xf32>
    %10 = arith.addf %7, %9 : vector<4x16xf32>
    %cst = arith.constant 0.000000e+00 : f32
    %11 = vector.broadcast %cst : f32 to vector<4x16xf32>
    %12 = arith.maximumf %10, %11 : vector<4x16xf32>
    %c0_9 = arith.constant 0 : index
    %c0_10 = arith.constant 0 : index
    %c0_11 = arith.constant 0 : index
    %13 = vector.load %arg5[%c0_9, %c0_10, %c0_11] : memref<1x4x16xf32, #tpu.memory_space<vmem>>, vector<1x4x16xf32>
    %14 = vector.shape_cast %13 : vector<1x4x16xf32> to vector<4x16xf32>
    %15 = vector.shape_cast %12 : vector<4x16xf32> to vector<1x4x16xf32>
    tpu.vector_store %arg5[%c0_9, %c0_10, %c0_11], %15 {strides = array<i32>} : memref<1x4x16xf32, #tpu.memory_space<vmem>>, vector<1x4x16xf32>,
    return
  }
  func.func @transform_0(%arg0: i32) -> (i32, i32, i32) {
    %c0_i32 = arith.constant 0 : i32
    %c0_i32_0 = arith.constant 0 : i32
    %c0_i32_1 = arith.constant 0 : i32
    return %arg0, %c0_i32, %c0_i32_0 : i32, i32, i32
  }
  func.func @transform_1(%arg0: i32) -> (i32, i32, i32) {
    %c0_i32 = arith.constant 0 : i32
    %c0_i32_0 = arith.constant 0 : i32
    %c0_i32_1 = arith.constant 0 : i32
    return %arg0, %c0_i32, %c0_i32_0 : i32, i32, i32
  }
  func.func @transform_2(%arg0: i32) -> (i32, i32) {
    %c0_i32 = arith.constant 0 : i32
    %c0_i32_0 = arith.constant 0 : i32
    %c0_i32_1 = arith.constant 0 : i32
    return %c0_i32, %c0_i32_0 : i32, i32
  }
  func.func @transform_3(%arg0: i32) -> (i32, i32) {
    %c0_i32 = arith.constant 0 : i32
    %c0_i32_0 = arith.constant 0 : i32
    %c0_i32_1 = arith.constant 0 : i32
    return %c0_i32, %c0_i32_0 : i32, i32
  }
  func.func @transform_4(%arg0: i32) -> (i32, i32, i32) {
    %c0_i32 = arith.constant 0 : i32
    %c0_i32_0 = arith.constant 0 : i32
    %c0_i32_1 = arith.constant 0 : i32
    return %arg0, %c0_i32, %c0_i32_0 : i32, i32, i32
  }
}

module attributes {stable_mosaic.version = 11 : i64} {
  func.func @_attn_kernel(%arg0: i32, %arg1: memref<1x4x16xf32, #tpu.memory_space<vmem>>, %arg2: memref<2x4xf32, #tpu.memory_space<vmem>>, %arg3: memref<2x1xf32, #tpu.memory_space<vmem>>, %arg4: memref<1x2xf32, #tpu.memory_space<vmem>>, %arg5: memref<1x1xf32, #tpu.memory_space<vmem>>, %arg6: memref<2x4xf32, #tpu.memory_space<vmem>>, %arg7: memref<2x1xf32, #tpu.memory_space<vmem>>, %arg8: memref<4x2xf32, #tpu.memory_space<vmem>>, %arg9: memref<4x1xf32, #tpu.memory_space<vmem>>, %arg10: memref<1x4x16xf32, #tpu.memory_space<vmem>>) attributes {dimension_semantics = [#tpu.dimension_semantics<parallel>], iteration_bounds = array<i64: 2>, scalar_prefetch = 0 : i64, scratch_operands = 0 : i64, tpu.core_type = #tpu.core_type<tc>, window_params = [{transform_indices = @transform_0, window_bounds = array<i64: 1, 4, 16>}, {pipeline_mode = #tpu.pipeline_mode<synchronous>, transform_indices = @transform_1, window_bounds = array<i64: 2, 4>}, {pipeline_mode = #tpu.pipeline_mode<synchronous>, transform_indices = @transform_2, window_bounds = array<i64: 2, 1>}, {pipeline_mode = #tpu.pipeline_mode<synchronous>, transform_indices = @transform_3, window_bounds = array<i64: 1, 2>}, {pipeline_mode = #tpu.pipeline_mode<synchronous>, transform_indices = @transform_4, window_bounds = array<i64: 1, 1>}, {pipeline_mode = #tpu.pipeline_mode<synchronous>, transform_indices = @transform_5, window_bounds = array<i64: 2, 4>}, {pipeline_mode = #tpu.pipeline_mode<synchronous>, transform_indices = @transform_6, window_bounds = array<i64: 2, 1>}, {pipeline_mode = #tpu.pipeline_mode<synchronous>, transform_indices = @transform_7, window_bounds = array<i64: 4, 2>}, {pipeline_mode = #tpu.pipeline_mode<synchronous>, transform_indices = @transform_8, window_bounds = array<i64: 4, 1>}, {transform_indices = @transform_9, window_bounds = array<i64: 1, 4, 16>}]} {
    %c0 = arith.constant 0 : index
    %c0_0 = arith.constant 0 : index
    %c0_1 = arith.constant 0 : index
    %0 = vector.load %arg1[%c0, %c0_0, %c0_1] : memref<1x4x16xf32, #tpu.memory_space<vmem>>, vector<1x4x16xf32>
    %1 = vector.shape_cast %0 : vector<1x4x16xf32> to vector<4x16xf32>
    %c0_2 = arith.constant 0 : index
    %c0_3 = arith.constant 0 : index
    %2 = vector.load %arg2[%c0_2, %c0_3] : memref<2x4xf32, #tpu.memory_space<vmem>>, vector<2x4xf32>
    %cst = arith.constant dense<0.000000e+00> : vector<2x16xf32>
    %3 = tpu.matmul %2, %1, %cst {dimension_numbers = #tpu.dot_dimension_numbers<[1], [0], [0], [1], [0, 0, 1, 1], [], []>} : vector<2x4xf32>, vector<4x16xf32>, vector<2x16xf32> -> vector<2x16xf32>
    %c0_4 = arith.constant 0 : index
    %c0_5 = arith.constant 0 : index
    %4 = vector.load %arg3[%c0_4, %c0_5] : memref<2x1xf32, #tpu.memory_space<vmem>>, vector<2x1xf32>
    %5 = vector.broadcast %4 : vector<2x1xf32> to vector<2x16xf32>
    %6 = arith.addf %3, %5 : vector<2x16xf32>
    %cst_6 = arith.constant 0.000000e+00 : f32
    %7 = vector.broadcast %cst_6 : f32 to vector<2x16xf32>
    %8 = arith.maximumf %6, %7 : vector<2x16xf32>
    %c0_7 = arith.constant 0 : index
    %c0_8 = arith.constant 0 : index
    %9 = vector.load %arg4[%c0_7, %c0_8] : memref<1x2xf32, #tpu.memory_space<vmem>>, vector<1x2xf32>
    %cst_9 = arith.constant dense<0.000000e+00> : vector<1x16xf32>
    %10 = tpu.matmul %9, %8, %cst_9 {dimension_numbers = #tpu.dot_dimension_numbers<[1], [0], [0], [1], [0, 0, 1, 1], [], []>} : vector<1x2xf32>, vector<2x16xf32>, vector<1x16xf32> -> vector<1x16xf32>
    %c0_10 = arith.constant 0 : index
    %c0_11 = arith.constant 0 : index
    %11 = vector.load %arg5[%c0_10, %c0_11] : memref<1x1xf32, #tpu.memory_space<vmem>>, vector<1x1xf32>
    %12 = vector.broadcast %11 : vector<1x1xf32> to vector<1x16xf32>
    %13 = arith.addf %10, %12 : vector<1x16xf32>
    %14 = arith.negf %13 : vector<1x16xf32>
    %15 = math.exp %14 : vector<1x16xf32>
    %cst_12 = arith.constant 1.000000e+00 : f32
    %16 = vector.broadcast %cst_12 : f32 to vector<1x16xf32>
    %17 = arith.addf %16, %15 : vector<1x16xf32>
    %18 = arith.divf %16, %17 : vector<1x16xf32>
    %19 = vector.broadcast %18 : vector<1x16xf32> to vector<4x16xf32>
    %20 = arith.mulf %1, %19 : vector<4x16xf32>
    %cst_13 = arith.constant dense<0.000000e+00> : vector<4xf32>
    %21 = vector.multi_reduction <add>, %20, %cst_13 [1] : vector<4x16xf32> to vector<4xf32>
    %22 = vector.shape_cast %21 : vector<4xf32> to vector<4x1xf32>
    %cst_14 = arith.constant 6.250000e-02 : f32
    %23 = vector.broadcast %cst_14 : f32 to vector<4x1xf32>
    %24 = arith.mulf %22, %23 : vector<4x1xf32>
    %c0_15 = arith.constant 0 : index
    %c0_16 = arith.constant 0 : index
    %25 = vector.load %arg6[%c0_15, %c0_16] : memref<2x4xf32, #tpu.memory_space<vmem>>, vector<2x4xf32>
    %cst_17 = arith.constant dense<0.000000e+00> : vector<2x1xf32>
    %26 = tpu.matmul %25, %24, %cst_17 {dimension_numbers = #tpu.dot_dimension_numbers<[1], [0], [0], [1], [0, 0, 1, 1], [], []>} : vector<2x4xf32>, vector<4x1xf32>, vector<2x1xf32> -> vector<2x1xf32>
    %c0_18 = arith.constant 0 : index
    %c0_19 = arith.constant 0 : index
    %27 = vector.load %arg7[%c0_18, %c0_19] : memref<2x1xf32, #tpu.memory_space<vmem>>, vector<2x1xf32>
    %28 = arith.addf %26, %27 : vector<2x1xf32>
    %cst_20 = arith.constant 0.000000e+00 : f32
    %29 = vector.broadcast %cst_20 : f32 to vector<2x1xf32>
    %30 = arith.maximumf %28, %29 : vector<2x1xf32>
    %c0_21 = arith.constant 0 : index
    %c0_22 = arith.constant 0 : index
    %31 = vector.load %arg8[%c0_21, %c0_22] : memref<4x2xf32, #tpu.memory_space<vmem>>, vector<4x2xf32>
    %cst_23 = arith.constant dense<0.000000e+00> : vector<4x1xf32>
    %32 = tpu.matmul %31, %30, %cst_23 {dimension_numbers = #tpu.dot_dimension_numbers<[1], [0], [0], [1], [0, 0, 1, 1], [], []>} : vector<4x2xf32>, vector<2x1xf32>, vector<4x1xf32> -> vector<4x1xf32>
    %c0_24 = arith.constant 0 : index
    %c0_25 = arith.constant 0 : index
    %33 = vector.load %arg9[%c0_24, %c0_25] : memref<4x1xf32, #tpu.memory_space<vmem>>, vector<4x1xf32>
    %34 = arith.addf %32, %33 : vector<4x1xf32>
    %35 = arith.negf %34 : vector<4x1xf32>
    %36 = math.exp %35 : vector<4x1xf32>
    %cst_26 = arith.constant 1.000000e+00 : f32
    %37 = vector.broadcast %cst_26 : f32 to vector<4x1xf32>
    %38 = arith.addf %37, %36 : vector<4x1xf32>
    %39 = arith.divf %37, %38 : vector<4x1xf32>
    %40 = vector.broadcast %39 : vector<4x1xf32> to vector<4x16xf32>
    %41 = arith.mulf %20, %40 : vector<4x16xf32>
    %c0_27 = arith.constant 0 : index
    %c0_28 = arith.constant 0 : index
    %c0_29 = arith.constant 0 : index
    %42 = vector.load %arg10[%c0_27, %c0_28, %c0_29] : memref<1x4x16xf32, #tpu.memory_space<vmem>>, vector<1x4x16xf32>
    %43 = vector.shape_cast %42 : vector<1x4x16xf32> to vector<4x16xf32>
    %44 = vector.shape_cast %41 : vector<4x16xf32> to vector<1x4x16xf32>
    tpu.vector_store %arg10[%c0_27, %c0_28, %c0_29], %44 {strides = array<i32>} : memref<1x4x16xf32, #tpu.memory_space<vmem>>, vector<1x4x16xf32>,
    return
  }
  func.func @transform_0(%arg0: i32) -> (i32, i32, i32) {
    %c0_i32 = arith.constant 0 : i32
    %c0_i32_0 = arith.constant 0 : i32
    %c0_i32_1 = arith.constant 0 : i32
    return %arg0, %c0_i32, %c0_i32_0 : i32, i32, i32
  }
  func.func @transform_1(%arg0: i32) -> (i32, i32) {
    %c0_i32 = arith.constant 0 : i32
    %c0_i32_0 = arith.constant 0 : i32
    %c0_i32_1 = arith.constant 0 : i32
    return %c0_i32, %c0_i32_0 : i32, i32
  }
  func.func @transform_2(%arg0: i32) -> (i32, i32) {
    %c0_i32 = arith.constant 0 : i32
    %c0_i32_0 = arith.constant 0 : i32
    %c0_i32_1 = arith.constant 0 : i32
    return %c0_i32, %c0_i32_0 : i32, i32
  }
  func.func @transform_3(%arg0: i32) -> (i32, i32) {
    %c0_i32 = arith.constant 0 : i32
    %c0_i32_0 = arith.constant 0 : i32
    %c0_i32_1 = arith.constant 0 : i32
    return %c0_i32, %c0_i32_0 : i32, i32
  }
  func.func @transform_4(%arg0: i32) -> (i32, i32) {
    %c0_i32 = arith.constant 0 : i32
    %c0_i32_0 = arith.constant 0 : i32
    %c0_i32_1 = arith.constant 0 : i32
    return %c0_i32, %c0_i32_0 : i32, i32
  }
  func.func @transform_5(%arg0: i32) -> (i32, i32) {
    %c0_i32 = arith.constant 0 : i32
    %c0_i32_0 = arith.constant 0 : i32
    %c0_i32_1 = arith.constant 0 : i32
    return %c0_i32, %c0_i32_0 : i32, i32
  }
  func.func @transform_6(%arg0: i32) -> (i32, i32) {
    %c0_i32 = arith.constant 0 : i32
    %c0_i32_0 = arith.constant 0 : i32
    %c0_i32_1 = arith.constant 0 : i32
    return %c0_i32, %c0_i32_0 : i32, i32
  }
  func.func @transform_7(%arg0: i32) -> (i32, i32) {
    %c0_i32 = arith.constant 0 : i32
    %c0_i32_0 = arith.constant 0 : i32
    %c0_i32_1 = arith.constant 0 : i32
    return %c0_i32, %c0_i32_0 : i32, i32
  }
  func.func @transform_8(%arg0: i32) -> (i32, i32) {
    %c0_i32 = arith.constant 0 : i32
    %c0_i32_0 = arith.constant 0 : i32
    %c0_i32_1 = arith.constant 0 : i32
    return %c0_i32, %c0_i32_0 : i32, i32
  }
  func.func @transform_9(%arg0: i32) -> (i32, i32, i32) {
    %c0_i32 = arith.constant 0 : i32
    %c0_i32_0 = arith.constant 0 : i32
    %c0_i32_1 = arith.constant 0 : i32
    return %arg0, %c0_i32, %c0_i32_0 : i32, i32, i32
  }
}

module attributes {stable_mosaic.version = 11 : i64} {
  func.func @_upsample2x_kernel(%arg0: i32, %arg1: memref<1x4x38xf32, #tpu.memory_space<vmem>>, %arg2: memref<1x4x4x24xf32, #tpu.memory_space<vmem>>) attributes {dimension_semantics = [#tpu.dimension_semantics<parallel>], iteration_bounds = array<i64: 2>, scalar_prefetch = 0 : i64, scratch_operands = 0 : i64, tpu.core_type = #tpu.core_type<tc>, window_params = [{transform_indices = @transform_0, window_bounds = array<i64: 1, 4, 38>}, {transform_indices = @transform_1, window_bounds = array<i64: 1, 4, 4, 24>}]} {
    %c0 = arith.constant 0 : index
    %c0_0 = arith.constant 0 : index
    %c0_1 = arith.constant 0 : index
    %0 = vector.load %arg1[%c0, %c0_0, %c0_1] : memref<1x4x38xf32, #tpu.memory_space<vmem>>, vector<1x4x24xf32>
    %1 = vector.shape_cast %0 : vector<1x4x24xf32> to vector<4x24xf32>
    %cst = arith.constant 6.250000e-02 : f32
    %2 = vector.broadcast %cst : f32 to vector<4x24xf32>
    %3 = arith.mulf %2, %1 : vector<4x24xf32>
    %c0_2 = arith.constant 0 : index
    %c0_3 = arith.constant 0 : index
    %c1 = arith.constant 1 : index
    %4 = vector.load %arg1[%c0_2, %c0_3, %c1] : memref<1x4x38xf32, #tpu.memory_space<vmem>>, vector<1x4x24xf32>
    %5 = vector.shape_cast %4 : vector<1x4x24xf32> to vector<4x24xf32>
    %cst_4 = arith.constant 1.875000e-01 : f32
    %6 = vector.broadcast %cst_4 : f32 to vector<4x24xf32>
    %7 = arith.mulf %6, %5 : vector<4x24xf32>
    %8 = arith.addf %3, %7 : vector<4x24xf32>
    %c0_5 = arith.constant 0 : index
    %c0_6 = arith.constant 0 : index
    %c6 = arith.constant 6 : index
    %9 = vector.load %arg1[%c0_5, %c0_6, %c6] : memref<1x4x38xf32, #tpu.memory_space<vmem>>, vector<1x4x24xf32>
    %10 = vector.shape_cast %9 : vector<1x4x24xf32> to vector<4x24xf32>
    %cst_7 = arith.constant 1.875000e-01 : f32
    %11 = vector.broadcast %cst_7 : f32 to vector<4x24xf32>
    %12 = arith.mulf %11, %10 : vector<4x24xf32>
    %13 = arith.addf %8, %12 : vector<4x24xf32>
    %c0_8 = arith.constant 0 : index
    %c0_9 = arith.constant 0 : index
    %c7 = arith.constant 7 : index
    %14 = vector.load %arg1[%c0_8, %c0_9, %c7] : memref<1x4x38xf32, #tpu.memory_space<vmem>>, vector<1x4x24xf32>
    %15 = vector.shape_cast %14 : vector<1x4x24xf32> to vector<4x24xf32>
    %cst_10 = arith.constant 5.625000e-01 : f32
    %16 = vector.broadcast %cst_10 : f32 to vector<4x24xf32>
    %17 = arith.mulf %16, %15 : vector<4x24xf32>
    %18 = arith.addf %13, %17 : vector<4x24xf32>
    %c0_11 = arith.constant 0 : index
    %c0_12 = arith.constant 0 : index
    %c0_13 = arith.constant 0 : index
    %c0_14 = arith.constant 0 : index
    %19 = vector.load %arg2[%c0_11, %c0_12, %c0_13, %c0_14] : memref<1x4x4x24xf32, #tpu.memory_space<vmem>>, vector<1x1x4x24xf32>
    %20 = vector.shape_cast %19 : vector<1x1x4x24xf32> to vector<4x24xf32>
    %21 = vector.shape_cast %18 : vector<4x24xf32> to vector<1x1x4x24xf32>
    tpu.vector_store %arg2[%c0_11, %c0_12, %c0_13, %c0_14], %21 {strides = array<i32>} : memref<1x4x4x24xf32, #tpu.memory_space<vmem>>, vector<1x1x4x24xf32>,
    %c0_15 = arith.constant 0 : index
    %c0_16 = arith.constant 0 : index
    %c1_17 = arith.constant 1 : index
    %22 = vector.load %arg1[%c0_15, %c0_16, %c1_17] : memref<1x4x38xf32, #tpu.memory_space<vmem>>, vector<1x4x24xf32>
    %23 = vector.shape_cast %22 : vector<1x4x24xf32> to vector<4x24xf32>
    %cst_18 = arith.constant 1.875000e-01 : f32
    %24 = vector.broadcast %cst_18 : f32 to vector<4x24xf32>
    %25 = arith.mulf %24, %23 : vector<4x24xf32>
    %c0_19 = arith.constant 0 : index
    %c0_20 = arith.constant 0 : index
    %c2 = arith.constant 2 : index
    %26 = vector.load %arg1[%c0_19, %c0_20, %c2] : memref<1x4x38xf32, #tpu.memory_space<vmem>>, vector<1x4x24xf32>
    %27 = vector.shape_cast %26 : vector<1x4x24xf32> to vector<4x24xf32>
    %cst_21 = arith.constant 6.250000e-02 : f32
    %28 = vector.broadcast %cst_21 : f32 to vector<4x24xf32>
    %29 = arith.mulf %28, %27 : vector<4x24xf32>
    %30 = arith.addf %25, %29 : vector<4x24xf32>
    %c0_22 = arith.constant 0 : index
    %c0_23 = arith.constant 0 : index
    %c7_24 = arith.constant 7 : index
    %31 = vector.load %arg1[%c0_22, %c0_23, %c7_24] : memref<1x4x38xf32, #tpu.memory_space<vmem>>, vector<1x4x24xf32>
    %32 = vector.shape_cast %31 : vector<1x4x24xf32> to vector<4x24xf32>
    %cst_25 = arith.constant 5.625000e-01 : f32
    %33 = vector.broadcast %cst_25 : f32 to vector<4x24xf32>
    %34 = arith.mulf %33, %32 : vector<4x24xf32>
    %35 = arith.addf %30, %34 : vector<4x24xf32>
    %c0_26 = arith.constant 0 : index
    %c0_27 = arith.constant 0 : index
    %c8 = arith.constant 8 : index
    %36 = vector.load %arg1[%c0_26, %c0_27, %c8] : memref<1x4x38xf32, #tpu.memory_space<vmem>>, vector<1x4x24xf32>
    %37 = vector.shape_cast %36 : vector<1x4x24xf32> to vector<4x24xf32>
    %cst_28 = arith.constant 1.875000e-01 : f32
    %38 = vector.broadcast %cst_28 : f32 to vector<4x24xf32>
    %39 = arith.mulf %38, %37 : vector<4x24xf32>
    %40 = arith.addf %35, %39 : vector<4x24xf32>
    %c0_29 = arith.constant 0 : index
    %c1_30 = arith.constant 1 : index
    %c0_31 = arith.constant 0 : index
    %c0_32 = arith.constant 0 : index
    %41 = vector.load %arg2[%c0_29, %c1_30, %c0_31, %c0_32] : memref<1x4x4x24xf32, #tpu.memory_space<vmem>>, vector<1x1x4x24xf32>
    %42 = vector.shape_cast %41 : vector<1x1x4x24xf32> to vector<4x24xf32>
    %43 = vector.shape_cast %40 : vector<4x24xf32> to vector<1x1x4x24xf32>
    tpu.vector_store %arg2[%c0_29, %c1_30, %c0_31, %c0_32], %43 {strides = array<i32>} : memref<1x4x4x24xf32, #tpu.memory_space<vmem>>, vector<1x1x4x24xf32>,
    %c0_33 = arith.constant 0 : index
    %c0_34 = arith.constant 0 : index
    %c6_35 = arith.constant 6 : index
    %44 = vector.load %arg1[%c0_33, %c0_34, %c6_35] : memref<1x4x38xf32, #tpu.memory_space<vmem>>, vector<1x4x24xf32>
    %45 = vector.shape_cast %44 : vector<1x4x24xf32> to vector<4x24xf32>
    %cst_36 = arith.constant 1.875000e-01 : f32
    %46 = vector.broadcast %cst_36 : f32 to vector<4x24xf32>
    %47 = arith.mulf %46, %45 : vector<4x24xf32>
    %c0_37 = arith.constant 0 : index
    %c0_38 = arith.constant 0 : index
    %c7_39 = arith.constant 7 : index
    %48 = vector.load %arg1[%c0_37, %c0_38, %c7_39] : memref<1x4x38xf32, #tpu.memory_space<vmem>>, vector<1x4x24xf32>
    %49 = vector.shape_cast %48 : vector<1x4x24xf32> to vector<4x24xf32>
    %cst_40 = arith.constant 5.625000e-01 : f32
    %50 = vector.broadcast %cst_40 : f32 to vector<4x24xf32>
    %51 = arith.mulf %50, %49 : vector<4x24xf32>
    %52 = arith.addf %47, %51 : vector<4x24xf32>
    %c0_41 = arith.constant 0 : index
    %c0_42 = arith.constant 0 : index
    %c12 = arith.constant 12 : index
    %53 = vector.load %arg1[%c0_41, %c0_42, %c12] : memref<1x4x38xf32, #tpu.memory_space<vmem>>, vector<1x4x24xf32>
    %54 = vector.shape_cast %53 : vector<1x4x24xf32> to vector<4x24xf32>
    %cst_43 = arith.constant 6.250000e-02 : f32
    %55 = vector.broadcast %cst_43 : f32 to vector<4x24xf32>
    %56 = arith.mulf %55, %54 : vector<4x24xf32>
    %57 = arith.addf %52, %56 : vector<4x24xf32>
    %c0_44 = arith.constant 0 : index
    %c0_45 = arith.constant 0 : index
    %c13 = arith.constant 13 : index
    %58 = vector.load %arg1[%c0_44, %c0_45, %c13] : memref<1x4x38xf32, #tpu.memory_space<vmem>>, vector<1x4x24xf32>
    %59 = vector.shape_cast %58 : vector<1x4x24xf32> to vector<4x24xf32>
    %cst_46 = arith.constant 1.875000e-01 : f32
    %60 = vector.broadcast %cst_46 : f32 to vector<4x24xf32>
    %61 = arith.mulf %60, %59 : vector<4x24xf32>
    %62 = arith.addf %57, %61 : vector<4x24xf32>
    %c0_47 = arith.constant 0 : index
    %c2_48 = arith.constant 2 : index
    %c0_49 = arith.constant 0 : index
    %c0_50 = arith.constant 0 : index
    %63 = vector.load %arg2[%c0_47, %c2_48, %c0_49, %c0_50] : memref<1x4x4x24xf32, #tpu.memory_space<vmem>>, vector<1x1x4x24xf32>
    %64 = vector.shape_cast %63 : vector<1x1x4x24xf32> to vector<4x24xf32>
    %65 = vector.shape_cast %62 : vector<4x24xf32> to vector<1x1x4x24xf32>
    tpu.vector_store %arg2[%c0_47, %c2_48, %c0_49, %c0_50], %65 {strides = array<i32>} : memref<1x4x4x24xf32, #tpu.memory_space<vmem>>, vector<1x1x4x24xf32>,
    %c0_51 = arith.constant 0 : index
    %c0_52 = arith.constant 0 : index
    %c7_53 = arith.constant 7 : index
    %66 = vector.load %arg1[%c0_51, %c0_52, %c7_53] : memref<1x4x38xf32, #tpu.memory_space<vmem>>, vector<1x4x24xf32>
    %67 = vector.shape_cast %66 : vector<1x4x24xf32> to vector<4x24xf32>
    %cst_54 = arith.constant 5.625000e-01 : f32
    %68 = vector.broadcast %cst_54 : f32 to vector<4x24xf32>
    %69 = arith.mulf %68, %67 : vector<4x24xf32>
    %c0_55 = arith.constant 0 : index
    %c0_56 = arith.constant 0 : index
    %c8_57 = arith.constant 8 : index
    %70 = vector.load %arg1[%c0_55, %c0_56, %c8_57] : memref<1x4x38xf32, #tpu.memory_space<vmem>>, vector<1x4x24xf32>
    %71 = vector.shape_cast %70 : vector<1x4x24xf32> to vector<4x24xf32>
    %cst_58 = arith.constant 1.875000e-01 : f32
    %72 = vector.broadcast %cst_58 : f32 to vector<4x24xf32>
    %73 = arith.mulf %72, %71 : vector<4x24xf32>
    %74 = arith.addf %69, %73 : vector<4x24xf32>
    %c0_59 = arith.constant 0 : index
    %c0_60 = arith.constant 0 : index
    %c13_61 = arith.constant 13 : index
    %75 = vector.load %arg1[%c0_59, %c0_60, %c13_61] : memref<1x4x38xf32, #tpu.memory_space<vmem>>, vector<1x4x24xf32>
    %76 = vector.shape_cast %75 : vector<1x4x24xf32> to vector<4x24xf32>
    %cst_62 = arith.constant 1.875000e-01 : f32
    %77 = vector.broadcast %cst_62 : f32 to vector<4x24xf32>
    %78 = arith.mulf %77, %76 : vector<4x24xf32>
    %79 = arith.addf %74, %78 : vector<4x24xf32>
    %c0_63 = arith.constant 0 : index
    %c0_64 = arith.constant 0 : index
    %c14 = arith.constant 14 : index
    %80 = vector.load %arg1[%c0_63, %c0_64, %c14] : memref<1x4x38xf32, #tpu.memory_space<vmem>>, vector<1x4x24xf32>
    %81 = vector.shape_cast %80 : vector<1x4x24xf32> to vector<4x24xf32>
    %cst_65 = arith.constant 6.250000e-02 : f32
    %82 = vector.broadcast %cst_65 : f32 to vector<4x24xf32>
    %83 = arith.mulf %82, %81 : vector<4x24xf32>
    %84 = arith.addf %79, %83 : vector<4x24xf32>
    %c0_66 = arith.constant 0 : index
    %c3 = arith.constant 3 : index
    %c0_67 = arith.constant 0 : index
    %c0_68 = arith.constant 0 : index
    %85 = vector.load %arg2[%c0_66, %c3, %c0_67, %c0_68] : memref<1x4x4x24xf32, #tpu.memory_space<vmem>>, vector<1x1x4x24xf32>
    %86 = vector.shape_cast %85 : vector<1x1x4x24xf32> to vector<4x24xf32>
    %87 = vector.shape_cast %84 : vector<4x24xf32> to vector<1x1x4x24xf32>
    tpu.vector_store %arg2[%c0_66, %c3, %c0_67, %c0_68], %87 {strides = array<i32>} : memref<1x4x4x24xf32, #tpu.memory_space<vmem>>, vector<1x1x4x24xf32>,
    return
  }
  func.func @transform_0(%arg0: i32) -> (i32, i32, i32) {
    %c0_i32 = arith.constant 0 : i32
    %c0_i32_0 = arith.constant 0 : i32
    %c0_i32_1 = arith.constant 0 : i32
    return %arg0, %c0_i32, %c0_i32_0 : i32, i32, i32
  }
  func.func @transform_1(%arg0: i32) -> (i32, i32, i32, i32) {
    %c0_i32 = arith.constant 0 : i32
    %c0_i32_0 = arith.constant 0 : i32
    %c0_i32_1 = arith.constant 0 : i32
    %c0_i32_2 = arith.constant 0 : i32
    return %arg0, %c0_i32, %c0_i32_0, %c0_i32_1 : i32, i32, i32, i32
  }
}

module attributes {stable_mosaic.version = 11 : i64} {
  func.func @_add_kernel(%arg0: i32, %arg1: memref<1x4x64xf32, #tpu.memory_space<vmem>>, %arg2: memref<1x4x64xf32, #tpu.memory_space<vmem>>, %arg3: memref<1x4x64xf32, #tpu.memory_space<vmem>>) attributes {dimension_semantics = [#tpu.dimension_semantics<parallel>], iteration_bounds = array<i64: 2>, scalar_prefetch = 0 : i64, scratch_operands = 0 : i64, tpu.core_type = #tpu.core_type<tc>, window_params = [{transform_indices = @transform_0, window_bounds = array<i64: 1, 4, 64>}, {transform_indices = @transform_1, window_bounds = array<i64: 1, 4, 64>}, {transform_indices = @transform_2, window_bounds = array<i64: 1, 4, 64>}]} {
    %c0 = arith.constant 0 : index
    %c0_0 = arith.constant 0 : index
    %c0_1 = arith.constant 0 : index
    %0 = vector.load %arg1[%c0, %c0_0, %c0_1] : memref<1x4x64xf32, #tpu.memory_space<vmem>>, vector<1x4x64xf32>
    %1 = vector.shape_cast %0 : vector<1x4x64xf32> to vector<4x64xf32>
    %c0_2 = arith.constant 0 : index
    %c0_3 = arith.constant 0 : index
    %c0_4 = arith.constant 0 : index
    %2 = vector.load %arg2[%c0_2, %c0_3, %c0_4] : memref<1x4x64xf32, #tpu.memory_space<vmem>>, vector<1x4x64xf32>
    %3 = vector.shape_cast %2 : vector<1x4x64xf32> to vector<4x64xf32>
    %4 = arith.addf %1, %3 : vector<4x64xf32>
    %c0_5 = arith.constant 0 : index
    %c0_6 = arith.constant 0 : index
    %c0_7 = arith.constant 0 : index
    %5 = vector.load %arg3[%c0_5, %c0_6, %c0_7] : memref<1x4x64xf32, #tpu.memory_space<vmem>>, vector<1x4x64xf32>
    %6 = vector.shape_cast %5 : vector<1x4x64xf32> to vector<4x64xf32>
    %7 = vector.shape_cast %4 : vector<4x64xf32> to vector<1x4x64xf32>
    tpu.vector_store %arg3[%c0_5, %c0_6, %c0_7], %7 {strides = array<i32>} : memref<1x4x64xf32, #tpu.memory_space<vmem>>, vector<1x4x64xf32>,
    return
  }
  func.func @transform_0(%arg0: i32) -> (i32, i32, i32) {
    %c0_i32 = arith.constant 0 : i32
    %c0_i32_0 = arith.constant 0 : i32
    %c0_i32_1 = arith.constant 0 : i32
    return %arg0, %c0_i32, %c0_i32_0 : i32, i32, i32
  }
  func.func @transform_1(%arg0: i32) -> (i32, i32, i32) {
    %c0_i32 = arith.constant 0 : i32
    %c0_i32_0 = arith.constant 0 : i32
    %c0_i32_1 = arith.constant 0 : i32
    return %arg0, %c0_i32, %c0_i32_0 : i32, i32, i32
  }
  func.func @transform_2(%arg0: i32) -> (i32, i32, i32) {
    %c0_i32 = arith.constant 0 : i32
    %c0_i32_0 = arith.constant 0 : i32
    %c0_i32_1 = arith.constant 0 : i32
    return %arg0, %c0_i32, %c0_i32_0 : i32, i32, i32
  }
}

module attributes {stable_mosaic.version = 11 : i64} {
  func.func @_upsample2x_kernel(%arg0: i32, %arg1: memref<1x4x102xf32, #tpu.memory_space<vmem>>, %arg2: memref<1x4x4x80xf32, #tpu.memory_space<vmem>>) attributes {dimension_semantics = [#tpu.dimension_semantics<parallel>], iteration_bounds = array<i64: 2>, scalar_prefetch = 0 : i64, scratch_operands = 0 : i64, tpu.core_type = #tpu.core_type<tc>, window_params = [{transform_indices = @transform_0, window_bounds = array<i64: 1, 4, 102>}, {transform_indices = @transform_1, window_bounds = array<i64: 1, 4, 4, 80>}]} {
    %c0 = arith.constant 0 : index
    %c0_0 = arith.constant 0 : index
    %c0_1 = arith.constant 0 : index
    %0 = vector.load %arg1[%c0, %c0_0, %c0_1] : memref<1x4x102xf32, #tpu.memory_space<vmem>>, vector<1x4x80xf32>
    %1 = vector.shape_cast %0 : vector<1x4x80xf32> to vector<4x80xf32>
    %cst = arith.constant 6.250000e-02 : f32
    %2 = vector.broadcast %cst : f32 to vector<4x80xf32>
    %3 = arith.mulf %2, %1 : vector<4x80xf32>
    %c0_2 = arith.constant 0 : index
    %c0_3 = arith.constant 0 : index
    %c1 = arith.constant 1 : index
    %4 = vector.load %arg1[%c0_2, %c0_3, %c1] : memref<1x4x102xf32, #tpu.memory_space<vmem>>, vector<1x4x80xf32>
    %5 = vector.shape_cast %4 : vector<1x4x80xf32> to vector<4x80xf32>
    %cst_4 = arith.constant 1.875000e-01 : f32
    %6 = vector.broadcast %cst_4 : f32 to vector<4x80xf32>
    %7 = arith.mulf %6, %5 : vector<4x80xf32>
    %8 = arith.addf %3, %7 : vector<4x80xf32>
    %c0_5 = arith.constant 0 : index
    %c0_6 = arith.constant 0 : index
    %c10 = arith.constant 10 : index
    %9 = vector.load %arg1[%c0_5, %c0_6, %c10] : memref<1x4x102xf32, #tpu.memory_space<vmem>>, vector<1x4x80xf32>
    %10 = vector.shape_cast %9 : vector<1x4x80xf32> to vector<4x80xf32>
    %cst_7 = arith.constant 1.875000e-01 : f32
    %11 = vector.broadcast %cst_7 : f32 to vector<4x80xf32>
    %12 = arith.mulf %11, %10 : vector<4x80xf32>
    %13 = arith.addf %8, %12 : vector<4x80xf32>
    %c0_8 = arith.constant 0 : index
    %c0_9 = arith.constant 0 : index
    %c11 = arith.constant 11 : index
    %14 = vector.load %arg1[%c0_8, %c0_9, %c11] : memref<1x4x102xf32, #tpu.memory_space<vmem>>, vector<1x4x80xf32>
    %15 = vector.shape_cast %14 : vector<1x4x80xf32> to vector<4x80xf32>
    %cst_10 = arith.constant 5.625000e-01 : f32
    %16 = vector.broadcast %cst_10 : f32 to vector<4x80xf32>
    %17 = arith.mulf %16, %15 : vector<4x80xf32>
    %18 = arith.addf %13, %17 : vector<4x80xf32>
    %c0_11 = arith.constant 0 : index
    %c0_12 = arith.constant 0 : index
    %c0_13 = arith.constant 0 : index
    %c0_14 = arith.constant 0 : index
    %19 = vector.load %arg2[%c0_11, %c0_12, %c0_13, %c0_14] : memref<1x4x4x80xf32, #tpu.memory_space<vmem>>, vector<1x1x4x80xf32>
    %20 = vector.shape_cast %19 : vector<1x1x4x80xf32> to vector<4x80xf32>
    %21 = vector.shape_cast %18 : vector<4x80xf32> to vector<1x1x4x80xf32>
    tpu.vector_store %arg2[%c0_11, %c0_12, %c0_13, %c0_14], %21 {strides = array<i32>} : memref<1x4x4x80xf32, #tpu.memory_space<vmem>>, vector<1x1x4x80xf32>,
    %c0_15 = arith.constant 0 : index
    %c0_16 = arith.constant 0 : index
    %c1_17 = arith.constant 1 : index
    %22 = vector.load %arg1[%c0_15, %c0_16, %c1_17] : memref<1x4x102xf32, #tpu.memory_space<vmem>>, vector<1x4x80xf32>
    %23 = vector.shape_cast %22 : vector<1x4x80xf32> to vector<4x80xf32>
    %cst_18 = arith.constant 1.875000e-01 : f32
    %24 = vector.broadcast %cst_18 : f32 to vector<4x80xf32>
    %25 = arith.mulf %24, %23 : vector<4x80xf32>
    %c0_19 = arith.constant 0 : index
    %c0_20 = arith.constant 0 : index
    %c2 = arith.constant 2 : index
    %26 = vector.load %arg1[%c0_19, %c0_20, %c2] : memref<1x4x102xf32, #tpu.memory_space<vmem>>, vector<1x4x80xf32>
    %27 = vector.shape_cast %26 : vector<1x4x80xf32> to vector<4x80xf32>
    %cst_21 = arith.constant 6.250000e-02 : f32
    %28 = vector.broadcast %cst_21 : f32 to vector<4x80xf32>
    %29 = arith.mulf %28, %27 : vector<4x80xf32>
    %30 = arith.addf %25, %29 : vector<4x80xf32>
    %c0_22 = arith.constant 0 : index
    %c0_23 = arith.constant 0 : index
    %c11_24 = arith.constant 11 : index
    %31 = vector.load %arg1[%c0_22, %c0_23, %c11_24] : memref<1x4x102xf32, #tpu.memory_space<vmem>>, vector<1x4x80xf32>
    %32 = vector.shape_cast %31 : vector<1x4x80xf32> to vector<4x80xf32>
    %cst_25 = arith.constant 5.625000e-01 : f32
    %33 = vector.broadcast %cst_25 : f32 to vector<4x80xf32>
    %34 = arith.mulf %33, %32 : vector<4x80xf32>
    %35 = arith.addf %30, %34 : vector<4x80xf32>
    %c0_26 = arith.constant 0 : index
    %c0_27 = arith.constant 0 : index
    %c12 = arith.constant 12 : index
    %36 = vector.load %arg1[%c0_26, %c0_27, %c12] : memref<1x4x102xf32, #tpu.memory_space<vmem>>, vector<1x4x80xf32>
    %37 = vector.shape_cast %36 : vector<1x4x80xf32> to vector<4x80xf32>
    %cst_28 = arith.constant 1.875000e-01 : f32
    %38 = vector.broadcast %cst_28 : f32 to vector<4x80xf32>
    %39 = arith.mulf %38, %37 : vector<4x80xf32>
    %40 = arith.addf %35, %39 : vector<4x80xf32>
    %c0_29 = arith.constant 0 : index
    %c1_30 = arith.constant 1 : index
    %c0_31 = arith.constant 0 : index
    %c0_32 = arith.constant 0 : index
    %41 = vector.load %arg2[%c0_29, %c1_30, %c0_31, %c0_32] : memref<1x4x4x80xf32, #tpu.memory_space<vmem>>, vector<1x1x4x80xf32>
    %42 = vector.shape_cast %41 : vector<1x1x4x80xf32> to vector<4x80xf32>
    %43 = vector.shape_cast %40 : vector<4x80xf32> to vector<1x1x4x80xf32>
    tpu.vector_store %arg2[%c0_29, %c1_30, %c0_31, %c0_32], %43 {strides = array<i32>} : memref<1x4x4x80xf32, #tpu.memory_space<vmem>>, vector<1x1x4x80xf32>,
    %c0_33 = arith.constant 0 : index
    %c0_34 = arith.constant 0 : index
    %c10_35 = arith.constant 10 : index
    %44 = vector.load %arg1[%c0_33, %c0_34, %c10_35] : memref<1x4x102xf32, #tpu.memory_space<vmem>>, vector<1x4x80xf32>
    %45 = vector.shape_cast %44 : vector<1x4x80xf32> to vector<4x80xf32>
    %cst_36 = arith.constant 1.875000e-01 : f32
    %46 = vector.broadcast %cst_36 : f32 to vector<4x80xf32>
    %47 = arith.mulf %46, %45 : vector<4x80xf32>
    %c0_37 = arith.constant 0 : index
    %c0_38 = arith.constant 0 : index
    %c11_39 = arith.constant 11 : index
    %48 = vector.load %arg1[%c0_37, %c0_38, %c11_39] : memref<1x4x102xf32, #tpu.memory_space<vmem>>, vector<1x4x80xf32>
    %49 = vector.shape_cast %48 : vector<1x4x80xf32> to vector<4x80xf32>
    %cst_40 = arith.constant 5.625000e-01 : f32
    %50 = vector.broadcast %cst_40 : f32 to vector<4x80xf32>
    %51 = arith.mulf %50, %49 : vector<4x80xf32>
    %52 = arith.addf %47, %51 : vector<4x80xf32>
    %c0_41 = arith.constant 0 : index
    %c0_42 = arith.constant 0 : index
    %c20 = arith.constant 20 : index
    %53 = vector.load %arg1[%c0_41, %c0_42, %c20] : memref<1x4x102xf32, #tpu.memory_space<vmem>>, vector<1x4x80xf32>
    %54 = vector.shape_cast %53 : vector<1x4x80xf32> to vector<4x80xf32>
    %cst_43 = arith.constant 6.250000e-02 : f32
    %55 = vector.broadcast %cst_43 : f32 to vector<4x80xf32>
    %56 = arith.mulf %55, %54 : vector<4x80xf32>
    %57 = arith.addf %52, %56 : vector<4x80xf32>
    %c0_44 = arith.constant 0 : index
    %c0_45 = arith.constant 0 : index
    %c21 = arith.constant 21 : index
    %58 = vector.load %arg1[%c0_44, %c0_45, %c21] : memref<1x4x102xf32, #tpu.memory_space<vmem>>, vector<1x4x80xf32>
    %59 = vector.shape_cast %58 : vector<1x4x80xf32> to vector<4x80xf32>
    %cst_46 = arith.constant 1.875000e-01 : f32
    %60 = vector.broadcast %cst_46 : f32 to vector<4x80xf32>
    %61 = arith.mulf %60, %59 : vector<4x80xf32>
    %62 = arith.addf %57, %61 : vector<4x80xf32>
    %c0_47 = arith.constant 0 : index
    %c2_48 = arith.constant 2 : index
    %c0_49 = arith.constant 0 : index
    %c0_50 = arith.constant 0 : index
    %63 = vector.load %arg2[%c0_47, %c2_48, %c0_49, %c0_50] : memref<1x4x4x80xf32, #tpu.memory_space<vmem>>, vector<1x1x4x80xf32>
    %64 = vector.shape_cast %63 : vector<1x1x4x80xf32> to vector<4x80xf32>
    %65 = vector.shape_cast %62 : vector<4x80xf32> to vector<1x1x4x80xf32>
    tpu.vector_store %arg2[%c0_47, %c2_48, %c0_49, %c0_50], %65 {strides = array<i32>} : memref<1x4x4x80xf32, #tpu.memory_space<vmem>>, vector<1x1x4x80xf32>,
    %c0_51 = arith.constant 0 : index
    %c0_52 = arith.constant 0 : index
    %c11_53 = arith.constant 11 : index
    %66 = vector.load %arg1[%c0_51, %c0_52, %c11_53] : memref<1x4x102xf32, #tpu.memory_space<vmem>>, vector<1x4x80xf32>
    %67 = vector.shape_cast %66 : vector<1x4x80xf32> to vector<4x80xf32>
    %cst_54 = arith.constant 5.625000e-01 : f32
    %68 = vector.broadcast %cst_54 : f32 to vector<4x80xf32>
    %69 = arith.mulf %68, %67 : vector<4x80xf32>
    %c0_55 = arith.constant 0 : index
    %c0_56 = arith.constant 0 : index
    %c12_57 = arith.constant 12 : index
    %70 = vector.load %arg1[%c0_55, %c0_56, %c12_57] : memref<1x4x102xf32, #tpu.memory_space<vmem>>, vector<1x4x80xf32>
    %71 = vector.shape_cast %70 : vector<1x4x80xf32> to vector<4x80xf32>
    %cst_58 = arith.constant 1.875000e-01 : f32
    %72 = vector.broadcast %cst_58 : f32 to vector<4x80xf32>
    %73 = arith.mulf %72, %71 : vector<4x80xf32>
    %74 = arith.addf %69, %73 : vector<4x80xf32>
    %c0_59 = arith.constant 0 : index
    %c0_60 = arith.constant 0 : index
    %c21_61 = arith.constant 21 : index
    %75 = vector.load %arg1[%c0_59, %c0_60, %c21_61] : memref<1x4x102xf32, #tpu.memory_space<vmem>>, vector<1x4x80xf32>
    %76 = vector.shape_cast %75 : vector<1x4x80xf32> to vector<4x80xf32>
    %cst_62 = arith.constant 1.875000e-01 : f32
    %77 = vector.broadcast %cst_62 : f32 to vector<4x80xf32>
    %78 = arith.mulf %77, %76 : vector<4x80xf32>
    %79 = arith.addf %74, %78 : vector<4x80xf32>
    %c0_63 = arith.constant 0 : index
    %c0_64 = arith.constant 0 : index
    %c22 = arith.constant 22 : index
    %80 = vector.load %arg1[%c0_63, %c0_64, %c22] : memref<1x4x102xf32, #tpu.memory_space<vmem>>, vector<1x4x80xf32>
    %81 = vector.shape_cast %80 : vector<1x4x80xf32> to vector<4x80xf32>
    %cst_65 = arith.constant 6.250000e-02 : f32
    %82 = vector.broadcast %cst_65 : f32 to vector<4x80xf32>
    %83 = arith.mulf %82, %81 : vector<4x80xf32>
    %84 = arith.addf %79, %83 : vector<4x80xf32>
    %c0_66 = arith.constant 0 : index
    %c3 = arith.constant 3 : index
    %c0_67 = arith.constant 0 : index
    %c0_68 = arith.constant 0 : index
    %85 = vector.load %arg2[%c0_66, %c3, %c0_67, %c0_68] : memref<1x4x4x80xf32, #tpu.memory_space<vmem>>, vector<1x1x4x80xf32>
    %86 = vector.shape_cast %85 : vector<1x1x4x80xf32> to vector<4x80xf32>
    %87 = vector.shape_cast %84 : vector<4x80xf32> to vector<1x1x4x80xf32>
    tpu.vector_store %arg2[%c0_66, %c3, %c0_67, %c0_68], %87 {strides = array<i32>} : memref<1x4x4x80xf32, #tpu.memory_space<vmem>>, vector<1x1x4x80xf32>,
    return
  }
  func.func @transform_0(%arg0: i32) -> (i32, i32, i32) {
    %c0_i32 = arith.constant 0 : i32
    %c0_i32_0 = arith.constant 0 : i32
    %c0_i32_1 = arith.constant 0 : i32
    return %arg0, %c0_i32, %c0_i32_0 : i32, i32, i32
  }
  func.func @transform_1(%arg0: i32) -> (i32, i32, i32, i32) {
    %c0_i32 = arith.constant 0 : i32
    %c0_i32_0 = arith.constant 0 : i32
    %c0_i32_1 = arith.constant 0 : i32
    %c0_i32_2 = arith.constant 0 : i32
    return %arg0, %c0_i32, %c0_i32_0, %c0_i32_1 : i32, i32, i32, i32
  }
}

module attributes {stable_mosaic.version = 11 : i64} {
  func.func @_mask_gate_kernel(%arg0: i32, %arg1: memref<1x4x256xf32, #tpu.memory_space<vmem>>, %arg2: memref<1x4x256xf32, #tpu.memory_space<vmem>>, %arg3: memref<4x4xf32, #tpu.memory_space<vmem>>, %arg4: memref<4x1xf32, #tpu.memory_space<vmem>>, %arg5: memref<4x4xf32, #tpu.memory_space<vmem>>, %arg6: memref<4x1xf32, #tpu.memory_space<vmem>>, %arg7: memref<1x4x256xf32, #tpu.memory_space<vmem>>) attributes {dimension_semantics = [#tpu.dimension_semantics<parallel>], iteration_bounds = array<i64: 2>, scalar_prefetch = 0 : i64, scratch_operands = 0 : i64, tpu.core_type = #tpu.core_type<tc>, window_params = [{transform_indices = @transform_0, window_bounds = array<i64: 1, 4, 256>}, {transform_indices = @transform_1, window_bounds = array<i64: 1, 4, 256>}, {pipeline_mode = #tpu.pipeline_mode<synchronous>, transform_indices = @transform_2, window_bounds = array<i64: 4, 4>}, {pipeline_mode = #tpu.pipeline_mode<synchronous>, transform_indices = @transform_3, window_bounds = array<i64: 4, 1>}, {pipeline_mode = #tpu.pipeline_mode<synchronous>, transform_indices = @transform_4, window_bounds = array<i64: 4, 4>}, {pipeline_mode = #tpu.pipeline_mode<synchronous>, transform_indices = @transform_5, window_bounds = array<i64: 4, 1>}, {transform_indices = @transform_6, window_bounds = array<i64: 1, 4, 256>}]} {
    %c0 = arith.constant 0 : index
    %c0_0 = arith.constant 0 : index
    %c0_1 = arith.constant 0 : index
    %0 = vector.load %arg1[%c0, %c0_0, %c0_1] : memref<1x4x256xf32, #tpu.memory_space<vmem>>, vector<1x4x256xf32>
    %1 = vector.shape_cast %0 : vector<1x4x256xf32> to vector<4x256xf32>
    %c0_2 = arith.constant 0 : index
    %c0_3 = arith.constant 0 : index
    %2 = vector.load %arg3[%c0_2, %c0_3] : memref<4x4xf32, #tpu.memory_space<vmem>>, vector<4x4xf32>
    %cst = arith.constant dense<0.000000e+00> : vector<4x256xf32>
    %3 = tpu.matmul %2, %1, %cst {dimension_numbers = #tpu.dot_dimension_numbers<[1], [0], [0], [1], [0, 0, 1, 1], [], []>} : vector<4x4xf32>, vector<4x256xf32>, vector<4x256xf32> -> vector<4x256xf32>
    %c0_4 = arith.constant 0 : index
    %c0_5 = arith.constant 0 : index
    %4 = vector.load %arg4[%c0_4, %c0_5] : memref<4x1xf32, #tpu.memory_space<vmem>>, vector<4x1xf32>
    %5 = vector.broadcast %4 : vector<4x1xf32> to vector<4x256xf32>
    %6 = arith.addf %3, %5 : vector<4x256xf32>
    %cst_6 = arith.constant 0.000000e+00 : f32
    %7 = vector.broadcast %cst_6 : f32 to vector<4x256xf32>
    %8 = arith.maximumf %6, %7 : vector<4x256xf32>
    %c0_7 = arith.constant 0 : index
    %c0_8 = arith.constant 0 : index
    %9 = vector.load %arg5[%c0_7, %c0_8] : memref<4x4xf32, #tpu.memory_space<vmem>>, vector<4x4xf32>
    %cst_9 = arith.constant dense<0.000000e+00> : vector<4x256xf32>
    %10 = tpu.matmul %9, %8, %cst_9 {dimension_numbers = #tpu.dot_dimension_numbers<[1], [0], [0], [1], [0, 0, 1, 1], [], []>} : vector<4x4xf32>, vector<4x256xf32>, vector<4x256xf32> -> vector<4x256xf32>
    %c0_10 = arith.constant 0 : index
    %c0_11 = arith.constant 0 : index
    %11 = vector.load %arg6[%c0_10, %c0_11] : memref<4x1xf32, #tpu.memory_space<vmem>>, vector<4x1xf32>
    %12 = vector.broadcast %11 : vector<4x1xf32> to vector<4x256xf32>
    %13 = arith.addf %10, %12 : vector<4x256xf32>
    %14 = arith.negf %13 : vector<4x256xf32>
    %15 = math.exp %14 : vector<4x256xf32>
    %cst_12 = arith.constant 1.000000e+00 : f32
    %16 = vector.broadcast %cst_12 : f32 to vector<4x256xf32>
    %17 = arith.addf %16, %15 : vector<4x256xf32>
    %18 = arith.divf %16, %17 : vector<4x256xf32>
    %c0_13 = arith.constant 0 : index
    %c0_14 = arith.constant 0 : index
    %c0_15 = arith.constant 0 : index
    %19 = vector.load %arg2[%c0_13, %c0_14, %c0_15] : memref<1x4x256xf32, #tpu.memory_space<vmem>>, vector<1x4x256xf32>
    %20 = vector.shape_cast %19 : vector<1x4x256xf32> to vector<4x256xf32>
    %cst_16 = arith.constant 1.000000e+00 : f32
    %21 = vector.broadcast %cst_16 : f32 to vector<4x256xf32>
    %22 = arith.addf %21, %18 : vector<4x256xf32>
    %23 = arith.mulf %20, %22 : vector<4x256xf32>
    %c0_17 = arith.constant 0 : index
    %c0_18 = arith.constant 0 : index
    %c0_19 = arith.constant 0 : index
    %24 = vector.load %arg7[%c0_17, %c0_18, %c0_19] : memref<1x4x256xf32, #tpu.memory_space<vmem>>, vector<1x4x256xf32>
    %25 = vector.shape_cast %24 : vector<1x4x256xf32> to vector<4x256xf32>
    %26 = vector.shape_cast %23 : vector<4x256xf32> to vector<1x4x256xf32>
    tpu.vector_store %arg7[%c0_17, %c0_18, %c0_19], %26 {strides = array<i32>} : memref<1x4x256xf32, #tpu.memory_space<vmem>>, vector<1x4x256xf32>,
    return
  }
  func.func @transform_0(%arg0: i32) -> (i32, i32, i32) {
    %c0_i32 = arith.constant 0 : i32
    %c0_i32_0 = arith.constant 0 : i32
    %c0_i32_1 = arith.constant 0 : i32
    return %arg0, %c0_i32, %c0_i32_0 : i32, i32, i32
  }
  func.func @transform_1(%arg0: i32) -> (i32, i32, i32) {
    %c0_i32 = arith.constant 0 : i32
    %c0_i32_0 = arith.constant 0 : i32
    %c0_i32_1 = arith.constant 0 : i32
    return %arg0, %c0_i32, %c0_i32_0 : i32, i32, i32
  }
  func.func @transform_2(%arg0: i32) -> (i32, i32) {
    %c0_i32 = arith.constant 0 : i32
    %c0_i32_0 = arith.constant 0 : i32
    %c0_i32_1 = arith.constant 0 : i32
    return %c0_i32, %c0_i32_0 : i32, i32
  }
  func.func @transform_3(%arg0: i32) -> (i32, i32) {
    %c0_i32 = arith.constant 0 : i32
    %c0_i32_0 = arith.constant 0 : i32
    %c0_i32_1 = arith.constant 0 : i32
    return %c0_i32, %c0_i32_0 : i32, i32
  }
  func.func @transform_4(%arg0: i32) -> (i32, i32) {
    %c0_i32 = arith.constant 0 : i32
    %c0_i32_0 = arith.constant 0 : i32
    %c0_i32_1 = arith.constant 0 : i32
    return %c0_i32, %c0_i32_0 : i32, i32
  }
  func.func @transform_5(%arg0: i32) -> (i32, i32) {
    %c0_i32 = arith.constant 0 : i32
    %c0_i32_0 = arith.constant 0 : i32
    %c0_i32_1 = arith.constant 0 : i32
    return %c0_i32, %c0_i32_0 : i32, i32
  }
  func.func @transform_6(%arg0: i32) -> (i32, i32, i32) {
    %c0_i32 = arith.constant 0 : i32
    %c0_i32_0 = arith.constant 0 : i32
    %c0_i32_1 = arith.constant 0 : i32
    return %arg0, %c0_i32, %c0_i32_0 : i32, i32, i32
  }
}

</mosaic_0001>

<bundles_post_ra>
// kernel: _lambda_.64
= control target key start
LH: loop header
LB: loop body
LE: loop exit
PB: predicated region body
PF: predicated region fallthrough
CT: control target
= control target key end

     0   :  { %s311_s12 = smov 0   ;;  %s334_s0 = inlined_call_operand.vmem [shape: f32[2,4,256], index: 0, kind: input, shape index: {}]   ;;  %s335_s1 = inlined_call_operand.vmem [shape: f32[4,1], index: 1, kind: input, shape index: {}]   ;;  %s336_s2 = inlined_call_operand.vmem [shape: f32[4,1], index: 2, kind: input, shape index: {}]   ;;  %s337_s3 = inlined_call_operand.vmem [shape: f32[2,4,256], index: 3, kind: output, shape index: {}]  }
   0x1 LB: > { %s257_s13 = sadd.s32 4294967295, %s287_s12   ;;  %p261_p0 = scmp.ge.s32.totalorder %s287_s12, 1  ;;  %s287_s12 = sphi %s311_s12, %s13_s12  }
   0x2   : > { %p137_p1 = scmp.lt.s32.totalorder %s287_s12, 3 }
   0x4   : > { %p138_p2 = pnand %p261_p0, %p137_p1 }
   0x5   : > { %v172_v0 = vld [vmem:[%s335_s1] sm:$0xf] (!%p138_p2)  ;;  %v289_v1 = vmov (!%p138_p2), 0   ;;  %p161_p3 = scmp.lt.s32.totalorder (!%p138_p2), %s257_s13, 1  ;;  %v290_v3 = vmov (!%p138_p2), 839922192   ;;  %v180_v5 = vlaneseq (!%p138_p2) }
   0x6   : > { %141 = sbr.rel (%p138_p2) target bundleno = 146 (0x92), region = 32  ;;  %280 = vset.pattern.permute.xlu0 (!%p138_p2), %v289_v1  ;;  %v186_v2 = vld [vmem:[%s336_s2] sm:$0xf] (!%p138_p2)  ;;  %v178_v4 = vunpack.c.l.s4 (!%p138_p2), %v290_v3 }
   0x7   : > { %175 = vperm.xlu0 (!%p138_p2), %280, %v172_v0   ;;  %v181_v7 = vshrl.u32 (!%p138_p2), %v180_v5, 7 }
   0x8   : > { %v179_v6 = vunpack.c.0.s8 (!%p138_p2), %v178_v4 }
   0xa   : > { %v182_v8 = vsub.s32 (!%p138_p2), %v179_v6, %v181_v7 }
   0xb   : > { %189 = vperm.xlu0 (!%p138_p2), %280, %v186_v2  }
   0xd   : > { %s339_s13 = smov (!%p161_p3, %s257_s13), 1 }
   0xe   : > { %s268_s18 = sshll.u32 %s339_s13, 3 }
   0xf   : > { %s165_s21 = scalar_lea.vmem %s334_s0, %s268_s18  ;;  %s170_s24 = scalar_lea.vmem %s337_s3, %s268_s18 }
  0x10   : > { %v171_v11 = vld [vmem:[%s165_s21] sm:$0xff] }
  0x86   : > { %v176_v9 = vpop.permute.xlu0 %175 }
  0x87   : > { %v183_v10 = vrot.slane %v176_v9, %v182_v8 }
  0x89   : > { %v185_v13 = vmul.f32 %v183_v10, %v171_v11 }
  0x8a   : > { %v190_v12 = vpop.permute.xlu0 %189 }
  0x8b   : > { %v197_v14 = vrot.slane %v190_v12, %v182_v8 }
  0x8d   : > { %v199_v15 = vadd.f32 %v197_v14, %v185_v13 }
  0x8f   : > { %v200_v16 = vmax.f32 %v199_v15, 0.0 }
  0x91   : > { %201 = vst [vmem:[%s170_s24] sm:$0xff] %v200_v16 }
  0x92 PF: > { %s13_s12 = sadd.s32 1, %s287_s12  }
  0x93   : > { %p10_p4 = scmp.ge.s32.totalorder %s13_s12, 4  }
  0x95   :  { %12 = sbr.rel (!%p10_p4) target bundleno = 1 (0x1), region = 62 }

// kernel: _lambda_.63
= control target key start
LH: loop header
LB: loop body
LE: loop exit
PB: predicated region body
PF: predicated region fallthrough
CT: control target
= control target key end

     0   :  { %s238_s9 = smov 0   ;;  %s270_s0 = inlined_call_operand.vmem [shape: f32[2,4,256], index: 0, kind: input, shape index: {}]   ;;  %s271_s1 = inlined_call_operand.vmem [shape: f32[4,1], index: 1, kind: output, shape index: {0}]   ;;  %s272_s2 = inlined_call_operand.vmem [shape: f32[4,1], index: 2, kind: output, shape index: {1}]  }
   0x1 LB: > { %s194_s10 = sadd.s32 4294967295, %s220_s9   ;;  %p197_p0 = scmp.ge.s32.totalorder %s220_s9, 1  ;;  %s220_s9 = sphi %s238_s9, %s13_s9  }
   0x2   : > { %p105_p1 = scmp.lt.s32.totalorder %s220_s9, 3 }
   0x4   : > { %p106_p2 = pnand %p197_p0, %p105_p1 }
   0x5   : > { %p122_p3 = scmp.lt.s32.totalorder (!%p106_p2), %s194_s10, 1  ;;  %p200_p4 = scmp.ne.s32.totalorder (!%p106_p2), %s194_s10, 0 }
   0x6   : > { %109 = sbr.rel (%p106_p2) target bundleno = 176 (0xb0), region = 24 }
   0xd   : > { %s123_s11 = scalar_select %p122_p3, %s194_s10, 1 }
   0xe   : > { %130 = sbr.rel (%p200_p4) target bundleno = 21 (0x15), region = 28  ;;  %vm131_vm0 = vcmask (!%p200_p4), 3072   ;;  %v222_v0 = vmov (!%p200_p4), 0.0  }
   0xf   : > { %s203_s12 = sshll.u32 %s123_s11, 3  ;;  %132 = vst.msk [vmem:[%s271_s1] sm:$0xf] (!%p200_p4), %vm131_vm0, %v222_v0  ;;  %133 = vst.msk [vmem:[%s272_s2] sm:$0xf] (!%p200_p4), %vm131_vm0, %v222_v0 }
  0x10   : > { %s126_s15 = scalar_lea.vmem %s270_s0, %s203_s12 }
  0x15 PF: > { %v134_v1 = vld [vmem:[%s126_s15] sm:$0xff]  ;;  %vm139_vm1 = vcmask 1043456   ;;  %vm146_vm2 = vcmask 3072  }
  0x16   : > { %v137_v2 = vcombine.high %v134_v1, %v134_v1  ;;  %v140_v3 = vsel %vm139_vm1, %v134_v1, 0.0  ;;  %v149_v4 = vmul.f32 %v134_v1, %v134_v1  ;;  %v135_v11 = vld [vmem:[%s271_s1] sm:$0xf] }
  0x17   : > { %v148_v14 = vld [vmem:[%s272_s2] sm:$0xf] }
  0x18   : > { %v141_v5 = vsel %vm139_vm1, %v137_v2, 0.0  ;;  %v151_v6 = vcombine.high %v149_v4, %v149_v4  ;;  %v153_v7 = vsel %vm139_vm1, %v149_v4, 0.0 }
  0x19   : > { %v142_v8 = vadd.f32 %v141_v5, %v140_v3 }
  0x1a   : > { %v154_v9 = vsel %vm139_vm1, %v151_v6, 0.0 }
  0x1b   : > { %143 = vadd.xlane.f32.xlu0 %v142_v8  ;;  %v155_v10 = vadd.f32 %v154_v9, %v153_v7 }
  0x1f   : > { %156 = vadd.xlane.f32.xlu0 %v155_v10 }
  0xa8   : > { %v144_v12 = vpop.xlane.xlu0 %143 }
  0xa9   : > { %v145_v13 = vadd.f32 %v144_v12, %v135_v11 }
  0xab   : > { %147 = vst.msk [vmem:[%s271_s1] sm:$0xf] %vm146_vm2, %v145_v13 }
  0xac   : > { %v157_v15 = vpop.xlane.xlu0 %156 }
  0xad   : > { %v158_v16 = vadd.f32 %v157_v15, %v148_v14 }
  0xaf   : > { %159 = vst.msk [vmem:[%s272_s2] sm:$0xf] %vm146_vm2, %v158_v16 }
  0xb0 PF: > { %s13_s9 = sadd.s32 1, %s220_s9  }
  0xb1   : > { %p10_p5 = scmp.ge.s32.totalorder %s13_s9, 4  }
  0xb3   :  { %12 = sbr.rel (!%p10_p5) target bundleno = 1 (0x1), region = 62 }

// kernel: _lambda_.66
= control target key start
LH: loop header
LB: loop body
LE: loop exit
PB: predicated region body
PF: predicated region fallthrough
CT: control target
= control target key end

     0   :  { %s306_s12 = smov 0   ;;  %s341_s0 = inlined_call_operand.vmem [shape: f32[2,4,256], index: 0, kind: input, shape index: {}]   ;;  %s342_s1 = inlined_call_operand.vmem [shape: f32[2,4,256], index: 1, kind: input, shape index: {}]   ;;  %s343_s2 = inlined_call_operand.vmem [shape: f32[4,1], index: 2, kind: output, shape index: {0}]   ;;  %s344_s3 = inlined_call_operand.vmem [shape: f32[4,1], index: 3, kind: output, shape index: {1}]  }
   0x1 LB: > { %s255_s13 = sadd.s32 4294967295, %s283_s12   ;;  %p258_p0 = scmp.ge.s32.totalorder %s283_s12, 1  ;;  %s283_s12 = sphi %s306_s12, %s14_s12  }
   0x2   : > { %p140_p1 = scmp.lt.s32.totalorder %s283_s12, 3 }
   0x4   : > { %p141_p2 = pnand %p258_p0, %p140_p1 }
   0x5   : > { %p164_p3 = scmp.lt.s32.totalorder (!%p141_p2), %s255_s13, 1  ;;  %p263_p4 = scmp.ne.s32.totalorder (!%p141_p2), %s255_s13, 0 }
   0x6   : > { %144 = sbr.rel (%p141_p2) target bundleno = 179 (0xb3), region = 28 }
   0xd   : > { %s165_s14 = scalar_select %p164_p3, %s255_s13, 1 }
   0xe   : > { %177 = sbr.rel (%p263_p4) target bundleno = 21 (0x15), region = 32  ;;  %vm178_vm0 = vcmask (!%p263_p4), 3072   ;;  %v285_v0 = vmov (!%p263_p4), 0.0  }
   0xf   : > { %s266_s15 = sshll.u32 %s165_s14, 3  ;;  %179 = vst.msk [vmem:[%s343_s2] sm:$0xf] (!%p263_p4), %vm178_vm0, %v285_v0  ;;  %180 = vst.msk [vmem:[%s344_s3] sm:$0xf] (!%p263_p4), %vm178_vm0, %v285_v0 }
  0x10   : > { %s168_s18 = scalar_lea.vmem %s341_s0, %s266_s15  ;;  %s173_s21 = scalar_lea.vmem %s342_s1, %s266_s15 }
  0x15 PF: > { %v181_v1 = vld [vmem:[%s168_s18] sm:$0xff]  ;;  %vm188_vm1 = vcmask 1043456   ;;  %vm195_vm2 = vcmask 3072  }
  0x16   : > { %v182_v2 = vld [vmem:[%s173_s21] sm:$0xff] }
  0x17   : > { %v183_v3 = vadd.f32 %v182_v2, %v181_v1  ;;  %v184_v13 = vld [vmem:[%s343_s2] sm:$0xf] }
  0x18   : > { %v197_v16 = vld [vmem:[%s344_s3] sm:$0xf] }
  0x19   : > { %v186_v4 = vcombine.high %v183_v3, %v183_v3  ;;  %v189_v5 = vsel %vm188_vm1, %v183_v3, 0.0  ;;  %v198_v6 = vmul.f32 %v183_v3, %v183_v3 }
  0x1b   : > { %v190_v7 = vsel %vm188_vm1, %v186_v4, 0.0  ;;  %v200_v8 = vcombine.high %v198_v6, %v198_v6  ;;  %v202_v9 = vsel %vm188_vm1, %v198_v6, 0.0 }
  0x1c   : > { %v191_v10 = vadd.f32 %v190_v7, %v189_v5 }
  0x1d   : > { %v203_v11 = vsel %vm188_vm1, %v200_v8, 0.0 }
  0x1e   : > { %192 = vadd.xlane.f32.xlu0 %v191_v10  ;;  %v204_v12 = vadd.f32 %v203_v11, %v202_v9 }
  0x22   : > { %205 = vadd.xlane.f32.xlu0 %v204_v12 }
  0xab   : > { %v193_v14 = vpop.xlane.xlu0 %192 }
  0xac   : > { %v194_v15 = vadd.f32 %v193_v14, %v184_v13 }
  0xae   : > { %196 = vst.msk [vmem:[%s343_s2] sm:$0xf] %vm195_vm2, %v194_v15 }
  0xaf   : > { %v206_v17 = vpop.xlane.xlu0 %205 }
  0xb0   : > { %v207_v18 = vadd.f32 %v206_v17, %v197_v16 }
  0xb2   : > { %208 = vst.msk [vmem:[%s344_s3] sm:$0xf] %vm195_vm2, %v207_v18 }
  0xb3 PF: > { %s14_s12 = sadd.s32 1, %s283_s12  }
  0xb4   : > { %p11_p5 = scmp.ge.s32.totalorder %s14_s12, 4  }
  0xb6   :  { %13 = sbr.rel (!%p11_p5) target bundleno = 1 (0x1), region = 69 }

// kernel: _lambda_.62
= control target key start
LH: loop header
LB: loop body
LE: loop exit
PB: predicated region body
PF: predicated region fallthrough
CT: control target
= control target key end

     0   :  { %s1949_s12 = smov 0   ;;  %s2122_s0 = inlined_call_operand.vmem [shape: f32[2,4,326], index: 0, kind: input, shape index: {}]   ;;  %s2123_s1 = inlined_call_operand.vmem [shape: f32[9,4,4], index: 1, kind: input, shape index: {}]   ;;  %s2124_s2 = inlined_call_operand.vmem [shape: f32[4,1], index: 2, kind: input, shape index: {}]   ;;  %s2125_s3 = inlined_call_operand.vmem [shape: f32[2,4,288], index: 3, kind: output, shape index: {}]  }
   0x1 LB: > { %s1747_s13 = sadd.s32 4294967295, %s1916_s12   ;;  %p1751_p0 = scmp.ge.s32.totalorder %s1916_s12, 1  ;;  %s1916_s12 = sphi %s1949_s12, %s13_s12  }
   0x2   : > { %p137_p1 = scmp.lt.s32.totalorder %s1916_s12, 3 }
   0x4   : > { %p138_p2 = pnand %p1751_p0, %p137_p1 }
   0x5   : > { %p161_p3 = scmp.lt.s32.totalorder (!%p138_p2), %s1747_s13, 1  ;;  %v1918_v0 = vmov (!%p138_p2), 0.0   ;;  %vm1919_vm0 = vmmov (!%p138_p2), 0   ;;  %s1920_s18 = smov (!%p138_p2), 127   ;;  %v1673_v11 = vld [vmem:[%s2124_s2] sm:$0xf] (!%p138_p2) }
   0x6   : > { %141 = sbr.rel (%p138_p2) target bundleno = 426 (0x1aa), region = 32  ;;  %1827 = vmatprep.subr.mxu1 (!%p138_p2), %v1918_v0  ;;  %263 = vmatprep.mubr.f32.mxu0 (!%p138_p2), %v1918_v0  ;;  %s1921_s19 = smov (!%p138_p2), 126   ;;  %v1928_v12 = vmov (!%p138_p2), 0   ;;  %vm192_vm1 = vcmask (!%p138_p2), 1043456   ;;  %vm185_vm2 = vcmask (!%p138_p2), 1039360   ;;  %vm188_vm3 = vcmask (!%p138_p2), 31744  }
   0x7   : > { %1829 = vmatprep.mubr.msk.f32.mxu1 (!%p138_p2), %vm1919_vm0, %v1918_v0  ;;  %s1922_s20 = smov (!%p138_p2), 110   ;;  %s1923_s21 = smov (!%p138_p2), 109   ;;  %1908 = vset.pattern.permute.xlu0 (!%p138_p2), %v1928_v12  ;;  %v1754_v18 = vld [vmem:[%s2123_s1 + $0x4] sm:$0xf] (!%p138_p2)  ;;  %vm503_vm4 = vcmask (!%p138_p2), 1031168   ;;  %vm672_vm5 = vcmask (!%p138_p2), 900096  }
   0x8   : > { %s1924_s22 = smov (!%p138_p2), 108   ;;  %s1925_s23 = smov (!%p138_p2), 92   ;;  %v173_v24 = vld [vmem:[%s2123_s1] sm:$0xf] (!%p138_p2)  ;;  %v1765_v29 = vld [vmem:[%s2123_s1 + $0x8] sm:$0xf] (!%p138_p2) }
   0x9   : > { %s1926_s24 = smov (!%p138_p2), 91   ;;  %s1927_s25 = smov (!%p138_p2), 90   ;;  %v1771_v32 = vld [vmem:[%s2123_s1 + $0xc] sm:$0xf] (!%p138_p2)  ;;  %vm841_vm6 = vcmask (!%p138_p2), 891904   ;;  %vm1010_vm7 = vcmask (!%p138_p2), 883712  }
   0xa   : > { %v1777_v34 = vld [vmem:[%s2123_s1 + $0x10] sm:$0xf] (!%p138_p2)  ;;  %v1783_v39 = vld [vmem:[%s2123_s1 + $0x14] sm:$0xf] (!%p138_p2)  ;;  %v1789_v46 = vld [vmem:[%s2123_s1 + $0x18] sm:$0xf] (!%p138_p2) }
   0xb   : > { %vm1179_vm8 = vcmask (!%p138_p2), 752640   ;;  %v1795_v49 = vld [vmem:[%s2123_s1 + $0x1c] sm:$0xf] (!%p138_p2)  ;;  %v1801_v53 = vld [vmem:[%s2123_s1 + $0x20] sm:$0xf] (!%p138_p2)  ;;  %vm1348_vm9 = vcmask (!%p138_p2), 744448  }
   0xc   : > { %vm1517_vm10 = vcmask (!%p138_p2), 736256   ;;  %vm1690_vm11 = vcmask (!%p138_p2), 257024  }
   0xd   : > { %s2127_s13 = smov (!%p161_p3, %s1747_s13), 1 }
   0xe   : > { %s1888_s14 = smul.u32 12, %s2127_s13 }
  0x10   : > { %s1967_s17 = scalar_lea.vmem %s2122_s0, %s1888_s14 }
  0x11   : > { %v1972_v1 = vld [vmem:[%s1967_s17] sm:$0xff]  ;;  %v1978_v3 = vld [vmem:[%s1967_s17 + $0x8] sm:$0xf] }
  0x12   : > { %179 = vrot.lane.b32.xlu1 %v1972_v1, %s1920_s18  ;;  %v178_v2 = vcombine.high %v1972_v1, %v1972_v1  ;;  %v491_v4 = vld [vmem:[%s1967_s17 + $0x8] sm:$0xf] }
  0x13   : > { %v660_v5 = vld [vmem:[%s1967_s17 + $0x8] sm:$0xf] }
  0x14   : > { %181 = vrot.lane.b32.xlu0 %v178_v2, %s1920_s18  ;;  %v829_v6 = vld [vmem:[%s1967_s17 + $0x8] sm:$0xf] }
  0x15   : > { %v998_v7 = vld [vmem:[%s1967_s17 + $0x8] sm:$0xf] }
  0x16   : > { %499 = vrot.lane.b32.xlu1 %v178_v2, %s1921_s19  ;;  %v1167_v8 = vld [vmem:[%s1967_s17 + $0x8] sm:$0xf] }
  0x17   : > { %v1336_v9 = vld [vmem:[%s1967_s17 + $0x8] sm:$0xf] }
  0x18   : > { %183 = vrot.lane.b32.xlu0 %v1978_v3, %s1920_s18  ;;  %v1505_v10 = vld [vmem:[%s1967_s17 + $0x8] sm:$0xf] }
  0x1a   : > { %497 = vrot.lane.b32.xlu1 %v1972_v1, %s1921_s19 }
  0x1c   : > { %501 = vrot.lane.b32.xlu0 %v491_v4, %s1921_s19 }
  0x1e   : > { %670 = vrot.lane.b32.xlu1 %v660_v5, %s1922_s20 }
  0x20   : > { %668 = vrot.lane.b32.xlu0 %v178_v2, %s1922_s20 }
  0x22   : > { %837 = vrot.lane.b32.xlu1 %v178_v2, %s1923_s21 }
  0x24   : > { %666 = vrot.lane.b32.xlu0 %v1972_v1, %s1922_s20 }
  0x26   : > { %835 = vrot.lane.b32.xlu1 %v1972_v1, %s1923_s21 }
  0x28   : > { %839 = vrot.lane.b32.xlu0 %v829_v6, %s1923_s21 }
  0x2a   : > { %1008 = vrot.lane.b32.xlu1 %v998_v7, %s1924_s22 }
  0x2c   : > { %1006 = vrot.lane.b32.xlu0 %v178_v2, %s1924_s22 }
  0x2e   : > { %1175 = vrot.lane.b32.xlu1 %v178_v2, %s1925_s23 }
  0x30   : > { %1004 = vrot.lane.b32.xlu0 %v1972_v1, %s1924_s22 }
  0x32   : > { %1173 = vrot.lane.b32.xlu1 %v1972_v1, %s1925_s23 }
  0x34   : > { %1177 = vrot.lane.b32.xlu0 %v1167_v8, %s1925_s23 }
  0x36   : > { %1346 = vrot.lane.b32.xlu1 %v1336_v9, %s1926_s24 }
  0x38   : > { %1344 = vrot.lane.b32.xlu0 %v178_v2, %s1926_s24 }
  0x3a   : > { %1513 = vrot.lane.b32.xlu1 %v178_v2, %s1927_s25 }
  0x3c   : > { %1342 = vrot.lane.b32.xlu0 %v1972_v1, %s1926_s24  ;;  %s170_s24 = scalar_lea.vmem %s2125_s3, %s1888_s14 }
  0x3e   : > { %1511 = vrot.lane.b32.xlu1 %v1972_v1, %s1927_s25 }
  0x40   : > { %1515 = vrot.lane.b32.xlu0 %v1505_v10, %s1927_s25 }
  0x44   : > { %1676 = vperm.xlu0 %1908, %v1673_v11  }
  0x84   : > { %v180_v13 = vpop.permute.xlu1 %179 }
  0x86   : > { %v182_v14 = vpop.permute.xlu0 %181 }
  0x87   : > { %v186_v19 = vsel %vm185_vm2, %v180_v13, %v182_v14 }
  0x88   : > { %v500_v15 = vpop.permute.xlu1 %499 }
  0x8a   : > { %v184_v16 = vpop.permute.xlu0 %183 }
  0x8b   : > { %1828 = vmatpush3.msk.msra.mxu1 %vm192_vm1, %v184_v16  ;;  %v187_v17 = vsel %vm185_vm2, %v182_v14, %v184_v16 }
  0x8c   : > { %1755 = vmatprep.subr.msk.mxu0 %vm192_vm1, %v187_v17  ;;  %v498_v20 = vpop.permute.xlu1 %497  ;;  %1830 = vmatmul.mubr.msk.f32.vlgmr.msra.gmra.mrb[0].mxu1 %vm188_vm3, %v1754_v18 }
  0x8d   : > { %1756 = vmatpush1.msk.msra.mxu0 %vm192_vm1, %v186_v19  ;;  %1832 = vmatprep.subr.mxu1 %v1918_v0  ;;  %v504_v26 = vsel %vm503_vm4, %v498_v20, %v500_v15 }
  0x8e   : > { %1757 = vmatmul.mubr.msk.f32.vlgmr.msra.gmra.mrb[0].mxu0 %vm188_vm3, %v1754_v18  ;;  %1760 = vmatprep.subr.msk.mxu0 %vm192_vm1, %v178_v2  ;;  %v502_v21 = vpop.permute.xlu0 %501 }
  0x8f   : > { %1761 = vmatpush1.msk.msra.mxu0 %vm192_vm1, %v1972_v1  ;;  %v505_v22 = vsel %vm503_vm4, %v500_v15, %v502_v21  ;;  %1833 = vmatpush3.msk.msra.mxu1 %vm192_vm1, %v1978_v3 }
  0x90   : > { %1766 = vmatprep.subr.msk.mxu0 %vm192_vm1, %v505_v22  ;;  %1834 = vmatprep.mubr.msk.f32.mxu1 %vm1919_vm0, %v1918_v0  ;;  %v671_v23 = vpop.permute.xlu1 %670 }
  0x91   : > { %1837 = vmatprep.subr.mxu1 %v1918_v0  ;;  %413 = vmatprep.mubr.f32.mxu0 %v1918_v0 }
  0x92   : > { %1835 = vmatmul.mubr.msk.f32.vlgmr.msra.gmra.mrb[2].mxu1 %vm188_vm3, %v173_v24  ;;  %v669_v25 = vpop.permute.xlu0 %668 }
  0x93   : > { %1838 = vmatpush3.msk.msra.mxu1 %vm192_vm1, %v502_v21  ;;  %1839 = vmatprep.mubr.msk.f32.mxu1 %vm1919_vm0, %v1918_v0  ;;  %v674_v28 = vsel %vm672_vm5, %v669_v25, %v671_v23 }
  0x94   : > { %1842 = vmatprep.subr.mxu1 %v1918_v0  ;;  %v838_v27 = vpop.permute.xlu1 %837 }
  0x96   : > { %1762 = vmatmul.mubr.msk.f32.vlgmr.msra.gmra.mrb[0].mxu0 %vm188_vm3, %v173_v24  ;;  %v667_v30 = vpop.permute.xlu0 %666  ;;  %1840 = vmatmul.mubr.msk.f32.vlgmr.msra.gmra.mrb[4].mxu1 %vm188_vm3, %v1765_v29 }
  0x97   : > { %1767 = vmatpush1.msk.msra.mxu0 %vm192_vm1, %v504_v26  ;;  %579 = vmatprep.mubr.f32.mxu0 %v1918_v0  ;;  %v673_v35 = vsel %vm672_vm5, %v667_v30, %v669_v25 }
  0x98   : > { %1772 = vmatprep.subr.msk.mxu0 %vm192_vm1, %v674_v28  ;;  %1843 = vmatpush3.msk.msra.mxu1 %vm192_vm1, %v671_v23  ;;  %v836_v31 = vpop.permute.xlu1 %835 }
  0x99   : > { %1844 = vmatprep.mubr.msk.f32.mxu1 %vm1919_vm0, %v1918_v0  ;;  %1847 = vmatprep.subr.mxu1 %v1918_v0  ;;  %v842_v42 = vsel %vm841_vm6, %v836_v31, %v838_v27 }
  0x9a   : > { %v840_v33 = vpop.permute.xlu0 %839  ;;  %1845 = vmatmul.mubr.msk.f32.vlgmr.msra.gmra.mrb[6].mxu1 %vm188_vm3, %v1771_v32 }
  0x9b   : > { %1848 = vmatpush3.msk.msra.mxu1 %vm192_vm1, %v840_v33  ;;  %1849 = vmatprep.mubr.msk.f32.mxu1 %vm1919_vm0, %v1918_v0  ;;  %v843_v37 = vsel %vm841_vm6, %v838_v27, %v840_v33 }
  0x9c   : > { %v1009_v36 = vpop.permute.xlu1 %1008  ;;  %1852 = vmatprep.subr.mxu1 %v1918_v0 }
  0x9e   : > { %1768 = vmatmul.mubr.msk.f32.vlgmr.msra.gmra.mrb[0].mxu0 %vm188_vm3, %v1765_v29  ;;  %v1007_v38 = vpop.permute.xlu0 %1006  ;;  %1850 = vmatmul.mubr.msk.f32.vlgmr.msra.gmra.mrb[8].mxu1 %vm188_vm3, %v1777_v34 }
  0x9f   : > { %1773 = vmatpush1.msk.msra.mxu0 %vm192_vm1, %v673_v35  ;;  %748 = vmatprep.mubr.f32.mxu0 %v1918_v0  ;;  %v1012_v44 = vsel %vm1010_vm7, %v1007_v38, %v1009_v36 }
  0xa0   : > { %1778 = vmatprep.subr.msk.mxu0 %vm192_vm1, %v843_v37  ;;  %v1176_v40 = vpop.permute.xlu1 %1175  ;;  %1853 = vmatpush3.msk.msra.mxu1 %vm192_vm1, %v1009_v36 }
  0xa1   : > { %1854 = vmatprep.mubr.msk.f32.mxu1 %vm1919_vm0, %v1918_v0  ;;  %1857 = vmatprep.subr.mxu1 %v1918_v0 }
  0xa2   : > { %v1005_v41 = vpop.permute.xlu0 %1004  ;;  %1855 = vmatmul.mubr.msk.f32.vlgmr.msra.gmra.mrb[10].mxu1 %vm188_vm3, %v1783_v39 }
  0xa3   : > { %1859 = vmatprep.mubr.msk.f32.mxu1 %vm1919_vm0, %v1918_v0  ;;  %v1011_v50 = vsel %vm1010_vm7, %v1005_v41, %v1007_v38 }
  0xa4   : > { %v1174_v43 = vpop.permute.xlu1 %1173 }
  0xa5   : > { %v1180_v55 = vsel %vm1179_vm8, %v1174_v43, %v1176_v40 }
  0xa6   : > { %1774 = vmatmul.mubr.msk.f32.vlgmr.msra.gmra.mrb[0].mxu0 %vm188_vm3, %v1771_v32  ;;  %v1178_v45 = vpop.permute.xlu0 %1177 }
  0xa7   : > { %1779 = vmatpush1.msk.msra.mxu0 %vm192_vm1, %v842_v42  ;;  %917 = vmatprep.mubr.f32.mxu0 %v1918_v0  ;;  %v1181_v51 = vsel %vm1179_vm8, %v1176_v40, %v1178_v45 }
  0xa8   : > { %1784 = vmatprep.subr.msk.mxu0 %vm192_vm1, %v1012_v44  ;;  %1858 = vmatpush3.msk.msra.mxu1 %vm192_vm1, %v1178_v45  ;;  %v1347_v47 = vpop.permute.xlu1 %1346 }
  0xa9   : > { %1860 = vmatmul.mubr.msk.f32.vlgmr.msra.gmra.mrb[12].mxu1 %vm188_vm3, %v1789_v46  ;;  %1862 = vmatprep.subr.mxu1 %v1918_v0 }
  0xaa   : > { %v1345_v48 = vpop.permute.xlu0 %1344  ;;  %1863 = vmatpush3.msk.msra.mxu1 %vm192_vm1, %v1347_v47  ;;  %1864 = vmatprep.mubr.msk.f32.mxu1 %vm1919_vm0, %v1918_v0 }
  0xab   : > { %1867 = vmatprep.subr.mxu1 %v1918_v0  ;;  %v1350_v56 = vsel %vm1348_vm9, %v1345_v48, %v1347_v47 }
  0xac   : > { %v1514_v57 = vpop.permute.xlu1 %1513 }
  0xad   : > { %1865 = vmatmul.mubr.msk.f32.vlgmr.msra.gmra.mrb[14].mxu1 %vm188_vm3, %v1795_v49 }
  0xae   : > { %1780 = vmatmul.mubr.msk.f32.vlgmr.msra.gmra.mrb[0].mxu0 %vm188_vm3, %v1777_v34  ;;  %v1343_v52 = vpop.permute.xlu0 %1342  ;;  %1869 = vmatprep.mubr.msk.f32.mxu1 %vm1919_vm0, %v1918_v0 }
  0xaf   : > { %1785 = vmatpush1.msk.msra.mxu0 %vm192_vm1, %v1011_v50  ;;  %1086 = vmatprep.mubr.f32.mxu0 %v1918_v0  ;;  %v1349_v58 = vsel %vm1348_vm9, %v1343_v52, %v1345_v48 }
  0xb0   : > { %1790 = vmatprep.subr.msk.mxu0 %vm192_vm1, %v1181_v51  ;;  %v1512_v60 = vpop.permute.xlu1 %1511 }
  0xb1   : > { %v1518_v61 = vsel %vm1517_vm10, %v1512_v60, %v1514_v57 }
  0xb2   : > { %v1516_v54 = vpop.permute.xlu0 %1515 }
  0xb3   : > { %1868 = vmatpush3.msk.msra.mxu1 %vm192_vm1, %v1516_v54  ;;  %v1519_v59 = vsel %vm1517_vm10, %v1514_v57, %v1516_v54 }
  0xb4   : > { %1870 = vmatmul.mubr.msk.f32.vlgmr.msra.gmra.mrb[16].mxu1 %vm188_vm3, %v1801_v53 }
  0xb6   : > { %1786 = vmatmul.mubr.msk.f32.vlgmr.msra.gmra.mrb[0].mxu0 %vm188_vm3, %v1783_v39 }
  0xb7   : > { %1791 = vmatpush1.msk.msra.mxu0 %vm192_vm1, %v1180_v55  ;;  %1255 = vmatprep.mubr.f32.mxu0 %v1918_v0 }
  0xb8   : > { %1796 = vmatprep.subr.msk.mxu0 %vm192_vm1, %v1350_v56 }
  0xbe   : > { %1792 = vmatmul.mubr.msk.f32.vlgmr.msra.gmra.mrb[0].mxu0 %vm188_vm3, %v1789_v46 }
  0xbf   : > { %1797 = vmatpush1.msk.msra.mxu0 %vm192_vm1, %v1349_v58  ;;  %1424 = vmatprep.mubr.f32.mxu0 %v1918_v0 }
  0xc0   : > { %1802 = vmatprep.subr.msk.mxu0 %vm192_vm1, %v1519_v59 }
  0xc3   : > { %v1677_v22 = vpop.permute.xlu0 %1676 }
  0xc6   : > { %1798 = vmatmul.mubr.msk.f32.vlgmr.msra.gmra.mrb[0].mxu0 %vm188_vm3, %v1795_v49 }
  0xc7   : > { %1803 = vmatpush1.msk.msra.mxu0 %vm192_vm1, %v1518_v61  ;;  %1593 = vmatprep.mubr.f32.mxu0 %v1918_v0 }
  0xce   : > { %1804 = vmatmul.mubr.msk.f32.vlgmr.msra.gmra.mrb[0].mxu0 %vm188_vm3, %v1801_v53 }
 0x15f   : > { %v336_v62 = vpop.f32.mrb[0].mxu1 }
 0x160   : > { %v1831_v63 = vpop.f32.mrb[1].mxu1 }
 0x165   : > { %v486_v1 = vpop.f32.mrb[2].mxu1 }
 0x166   : > { %v487_v2 = vadd.f32 %v486_v1, %v336_v62  ;;  %v1836_v3 = vpop.f32.mrb[3].mxu1 }
 0x169   : > { %v652_v4 = vpop.f32.mrb[4].mxu1 }
 0x16a   : > { %v658_v5 = vadd.f32 %v652_v4, %v487_v2  ;;  %v1841_v6 = vpop.f32.mrb[5].mxu1 }
 0x16d   : > { %v821_v7 = vpop.f32.mrb[6].mxu1 }
 0x16e   : > { %v827_v8 = vadd.f32 %v821_v7, %v658_v5  ;;  %v1846_v9 = vpop.f32.mrb[7].mxu1 }
 0x171   : > { %v990_v10 = vpop.f32.mrb[8].mxu1 }
 0x172   : > { %v996_v11 = vadd.f32 %v990_v10, %v827_v8  ;;  %v1851_v12 = vpop.f32.mrb[9].mxu1 }
 0x175   : > { %v1159_v13 = vpop.f32.mrb[10].mxu1 }
 0x176   : > { %v1165_v14 = vadd.f32 %v1159_v13, %v996_v11  ;;  %v1856_v0 = vpop.f32.mrb[11].mxu1 }
 0x17c   : > { %v1328_v15 = vpop.f32.mrb[12].mxu1 }
 0x17d   : > { %v1334_v16 = vadd.f32 %v1328_v15, %v1165_v14  ;;  %v1861_v17 = vpop.f32.mrb[13].mxu1 }
 0x180   : > { %v1497_v18 = vpop.f32.mrb[14].mxu1 }
 0x181   : > { %v1503_v19 = vadd.f32 %v1497_v18, %v1334_v16  ;;  %v1866_v20 = vpop.f32.mrb[15].mxu1 }
 0x187   : > { %v1666_v21 = vpop.f32.mrb[16].mxu1 }
 0x188   : > { %v1672_v23 = vadd.f32 %v1666_v21, %v1503_v19  ;;  %v1871_v24 = vpop.f32.mrb[17].mxu1 }
 0x18a   : > { %v1681_v25 = vadd.f32 %v1677_v22, %v1672_v23 }
 0x18c   : > { %v1684_v26 = vmax.f32 %v1681_v25, 0.0 }
 0x18e   : > { %1691 = vst.msk [vmem:[%s170_s24 + $0x8] sm:$0xf] %vm1690_vm11, %v1684_v26 }
 0x1a1   : > { %v1595_v27 = vpop.f32.mrb[0].mxu0 }
 0x1a2   : > { %v1679_v28 = vadd.f32 %v1677_v22, %v1595_v27  ;;  %v1597_v29 = vpop.f32.mrb[1].mxu0 }
 0x1a3   : > { %v1680_v30 = vadd.f32 %v1677_v22, %v1597_v29 }
 0x1a4   : > { %v1682_v31 = vmax.f32 %v1679_v28, 0.0 }
 0x1a5   : > { %v1683_v32 = vmax.f32 %v1680_v30, 0.0 }
 0x1a7   : > { %v1687_v33 = vcombine.low %v1682_v31, %v1683_v32 }
 0x1a9   : > { %1689 = vst [vmem:[%s170_s24] sm:$0xff] %v1687_v33 }
 0x1aa PF: > { %s13_s12 = sadd.s32 1, %s1916_s12  }
 0x1ab   : > { %p10_p4 = scmp.ge.s32.totalorder %s13_s12, 4  }
 0x1ad   :  { %12 = sbr.rel (!%p10_p4) target bundleno = 1 (0x1), region = 70 }

// kernel: _lambda_.67
= control target key start
LH: loop header
LB: loop body
LE: loop exit
PB: predicated region body
PF: predicated region fallthrough
CT: control target
= control target key end

     0   :  { %s380_s15 = smov 0   ;;  %s406_s0 = inlined_call_operand.vmem [shape: f32[2,4,256], index: 0, kind: input, shape index: {}]   ;;  %s407_s1 = inlined_call_operand.vmem [shape: f32[2,4,256], index: 1, kind: input, shape index: {}]   ;;  %s408_s2 = inlined_call_operand.vmem [shape: f32[4,1], index: 2, kind: input, shape index: {}]   ;;  %s409_s3 = inlined_call_operand.vmem [shape: f32[4,1], index: 3, kind: input, shape index: {}]   ;;  %s410_s4 = inlined_call_operand.vmem [shape: f32[2,4,256], index: 4, kind: output, shape index: {}]  }
   0x1 LB: > { %s318_s16 = sadd.s32 4294967295, %s351_s15   ;;  %p322_p0 = scmp.ge.s32.totalorder %s351_s15, 1  ;;  %s351_s15 = sphi %s380_s15, %s14_s15  }
   0x2   : > { %p172_p1 = scmp.lt.s32.totalorder %s351_s15, 3 }
   0x4   : > { %p173_p2 = pnand %p322_p0, %p172_p1 }
   0x5   : > { %v221_v0 = vld [vmem:[%s408_s2] sm:$0xf] (!%p173_p2)  ;;  %v353_v1 = vmov (!%p173_p2), 0   ;;  %p203_p3 = scmp.lt.s32.totalorder (!%p173_p2), %s318_s16, 1  ;;  %v354_v3 = vmov (!%p173_p2), 839922192   ;;  %v229_v5 = vlaneseq (!%p173_p2) }
   0x6   : > { %176 = sbr.rel (%p173_p2) target bundleno = 146 (0x92), region = 36  ;;  %344 = vset.pattern.permute.xlu0 (!%p173_p2), %v353_v1  ;;  %v235_v2 = vld [vmem:[%s409_s3] sm:$0xf] (!%p173_p2)  ;;  %v227_v4 = vunpack.c.l.s4 (!%p173_p2), %v354_v3 }
   0x7   : > { %224 = vperm.xlu0 (!%p173_p2), %344, %v221_v0   ;;  %v230_v7 = vshrl.u32 (!%p173_p2), %v229_v5, 7 }
   0x8   : > { %v228_v6 = vunpack.c.0.s8 (!%p173_p2), %v227_v4 }
   0xa   : > { %v231_v8 = vsub.s32 (!%p173_p2), %v228_v6, %v230_v7 }
   0xb   : > { %238 = vperm.xlu0 (!%p173_p2), %344, %v235_v2  }
   0xd   : > { %s412_s16 = smov (!%p203_p3, %s318_s16), 1 }
   0xe   : > { %s331_s21 = sshll.u32 %s412_s16, 3 }
   0xf   : > { %s207_s24 = scalar_lea.vmem %s406_s0, %s331_s21  ;;  %s212_s27 = scalar_lea.vmem %s407_s1, %s331_s21 }
  0x10   : > { %v218_v9 = vld [vmem:[%s207_s24] sm:$0xff]  ;;  %s217_s30 = scalar_lea.vmem %s410_s4, %s331_s21 }
  0x11   : > { %v219_v10 = vld [vmem:[%s212_s27] sm:$0xff] }
  0x12   : > { %v220_v12 = vadd.f32 %v219_v10, %v218_v9 }
  0x86   : > { %v225_v11 = vpop.permute.xlu0 %224 }
  0x87   : > { %v232_v13 = vrot.slane %v225_v11, %v231_v8 }
  0x89   : > { %v234_v15 = vmul.f32 %v232_v13, %v220_v12 }
  0x8a   : > { %v239_v14 = vpop.permute.xlu0 %238 }
  0x8b   : > { %v246_v16 = vrot.slane %v239_v14, %v231_v8 }
  0x8d   : > { %v248_v17 = vadd.f32 %v246_v16, %v234_v15 }
  0x8f   : > { %v249_v18 = vmax.f32 %v248_v17, 0.0 }
  0x91   : > { %250 = vst [vmem:[%s217_s30] sm:$0xff] %v249_v18 }
  0x92 PF: > { %s14_s15 = sadd.s32 1, %s351_s15  }
  0x93   : > { %p11_p4 = scmp.ge.s32.totalorder %s14_s15, 4  }
  0x95   :  { %13 = sbr.rel (!%p11_p4) target bundleno = 1 (0x1), region = 69 }

// kernel: _lambda_.68
= control target key start
LH: loop header
LB: loop body
LE: loop exit
PB: predicated region body
PF: predicated region fallthrough
CT: control target
= control target key end

     0   :  { %s918_s11 = smov 0   ;;  %s981_s0 = inlined_call_operand.vmem [shape: f32[2,4,256], index: 0, kind: input, shape index: {}]   ;;  %s982_s1 = inlined_call_operand.vmem [shape: f32[2,4], index: 1, kind: input, shape index: {}]   ;;  %s983_s2 = inlined_call_operand.vmem [shape: f32[2,1], index: 2, kind: input, shape index: {}]   ;;  %s984_s3 = inlined_call_operand.vmem [shape: f32[1,2], index: 3, kind: input, shape index: {}]   ;;  %s985_s4 = inlined_call_operand.<no memory space> [shape: f32[1,1], index: 4, kind: input, shape index: {}]   ;;  %s986_s5 = inlined_call_operand.vmem [shape: f32[2,4], index: 5, kind: input, shape index: {}]   ;;  %s987_s6 = inlined_call_operand.vmem [shape: f32[2,1], index: 6, kind: input, shape index: {}]   ;;  %s988_s7 = inlined_call_operand.vmem [shape: f32[4,2], index: 7, kind: input, shape index: {}]   ;;  %s989_s8 = inlined_call_operand.vmem [shape: f32[4,1], index: 8, kind: input, shape index: {}]   ;;  %s990_s9 = inlined_call_operand.vmem [shape: f32[2,4,256], index: 9, kind: output, shape index: {}]  }
   0x1   :  { %v14_v0 = vstv %s985_s4 }
   0x2   :  { %15 = vst [vmem:[#allocation2] sm:$0x1] %v14_v0 }
   0x3 LB: > { %s786_s12 = sadd.s32 4294967295, %s859_s11   ;;  %p790_p0 = scmp.ge.s32.totalorder %s859_s11, 1  ;;  %s859_s11 = sphi %s918_s11, %s21_s11  }
   0x4   : > { %p289_p1 = scmp.lt.s32.totalorder %s859_s11, 3 }
   0x6   : > { %p290_p2 = pnand %p790_p0, %p289_p1 }
   0x7   : > { %p325_p3 = scmp.lt.s32.totalorder (!%p290_p2), %s786_s12, 1  ;;  %v861_v1 = vmov (!%p290_p2), 0.0   ;;  %v337_v2 = vld [vmem:[%s983_s2] sm:$0x3] (!%p290_p2)  ;;  %v862_v3 = vmov (!%p290_p2), 0   ;;  %vm349_vm0 = vcmask (!%p290_p2), 1043456   ;;  %v434_v16 = vlaneseq (!%p290_p2) }
   0x8   : > { %293 = sbr.rel (%p290_p2) target bundleno = 1229 (0x4cd), region = 56  ;;  %418 = vmatprep.mubr.f32.mxu0 (!%p290_p2), %v861_v1  ;;  %513 = vmatprep.mubr.f32.mxu1 (!%p290_p2), %v861_v1  ;;  %v336_v7 = vld [vmem:[%s982_s1] sm:$0x3] (!%p290_p2)  ;;  %vm345_vm1 = vcmask (!%p290_p2), 31744   ;;  %vm442_vm2 = vcmask (!%p290_p2), 1041408   ;;  %vm438_vm3 = vcmask (!%p290_p2), 15360  }
   0x9   : > { %838 = vset.pattern.permute.xlu0 (!%p290_p2), %v862_v3  ;;  %839 = vset.pattern.permute.xlu1 (!%p290_p2), %v862_v3  ;;  %v428_v4 = vld [vmem:[#allocation2] sm:$0x1] (!%p290_p2)  ;;  %v435_v17 = vshrl.u32 (!%p290_p2), %v434_v16, 7  ;;  %vm863_vm4 = vmmov (!%p290_p2), 0   ;;  %v864_v58 = vmov (!%p290_p2), 839922192  }
   0xa   : > { %340 = vperm.xlu0 (!%p290_p2), %838, %v337_v2   ;;  %v427_v15 = vld [vmem:[%s984_s3] sm:$0x1] (!%p290_p2)  ;;  %v722_v59 = vunpack.c.l.s4 (!%p290_p2), %v864_v58 }
   0xb   : > { %v436_v18 = vsub.s32 (!%p290_p2), 0, %v435_v17  ;;  %v554_v43 = vld [vmem:[%s986_s5] sm:$0x3] (!%p290_p2) }
   0xc   : > { %v555_v44 = vld [vmem:[%s987_s6] sm:$0x3] (!%p290_p2)  ;;  %v723_v60 = vunpack.c.0.s8 (!%p290_p2), %v722_v59 }
   0xd   : > { %v633_v49 = vld [vmem:[%s988_s7] sm:$0xf] (!%p290_p2) }
   0xe   : > { %431 = vperm.xlu0 (!%p290_p2), %838, %v428_v4   ;;  %v634_v50 = vld [vmem:[%s989_s8] sm:$0xf] (!%p290_p2)  ;;  %v726_v61 = vsub.s32 (!%p290_p2), %v723_v60, %v435_v17 }
   0xf   : > { %s992_s12 = smov (!%p325_p3, %s786_s12), 1 }
  0x10   : > { %s810_s14 = sshll.u32 %s992_s12, 3 }
  0x11   : > { %s329_s17 = scalar_lea.vmem %s981_s0, %s810_s14  ;;  %s334_s4 = scalar_lea.vmem %s990_s9, %s810_s14 }
  0x12   : > { %v335_v5 = vld [vmem:[%s329_s17] sm:$0xff] }
  0x13   : > { %v344_v6 = vcombine.high %v335_v5, %v335_v5 }
  0x15   : > { %795 = vmatprep.subr.msk.mxu0 %vm349_vm0, %v344_v6 }
  0x16   : > { %796 = vmatpush1.msk.msra.mxu0 %vm349_vm0, %v335_v5 }
  0x17   : > { %797 = vmatmul.mubr.msk.f32.vlgmr.msra.gmra.mrb[0].mxu0 %vm345_vm1, %v336_v7  ;;  %816 = vmatprep.subr.mxu0 %v861_v1 }
  0x18   : > { %818 = vmatprep.mubr.msk.f32.mxu0 %vm863_vm4, %v861_v1 }
  0x89   : > { %v341_v8 = vpop.permute.xlu0 %340 }
  0x8d   : > { %v432_v19 = vpop.permute.xlu0 %431 }
  0x8e   : > { %v437_v20 = vrot.slane %v432_v19, %v436_v18 }
  0xea   : > { %v420_v9 = vpop.f32.mrb[0].mxu0 }
  0xeb   : > { %v421_v10 = vadd.f32 %v420_v9, %v341_v8  ;;  %v422_v11 = vpop.f32.mrb[1].mxu0 }
  0xec   : > { %v423_v12 = vadd.f32 %v422_v11, %v341_v8 }
  0xed   : > { %v425_v14 = vmax.f32 %v421_v10, 0.0 }
  0xee   : > { %v426_v13 = vmax.f32 %v423_v12, 0.0 }
  0xf0   : > { %798 = vmatprep.subr.msk.mxu1 %vm442_vm2, %v426_v13 }
  0xf1   : > { %799 = vmatpush1.msk.msra.mxu1 %vm442_vm2, %v425_v14 }
  0xf2   : > { %800 = vmatmul.mubr.msk.f32.vlgmr.msra.gmra.mrb[0].mxu1 %vm438_vm3, %v427_v15  ;;  %821 = vmatprep.subr.mxu1 %v861_v1 }
  0xf3   : > { %823 = vmatprep.mubr.msk.f32.mxu1 %vm863_vm4, %v861_v1 }
 0x1c5   : > { %v515_v21 = vpop.f32.mrb[0].mxu1 }
 0x1c6   : > { %v516_v22 = vadd.f32 %v515_v21, %v437_v20  ;;  %v517_v23 = vpop.f32.mrb[1].mxu1 }
 0x1c7   : > { %v518_v24 = vadd.f32 %v517_v23, %v437_v20 }
 0x1c8   : > { %v801_v25 = vmul.f32 -1.442695, %v516_v22 }
 0x1c9   : > { %v802_v26 = vmul.f32 -1.442695, %v518_v24 }
 0x1ca   : > { %841 = vpow2.f32 %v801_v25 }
 0x1cb   : > { %843 = vpow2.f32 %v802_v26 }
 0x1d4   : > { %v842_v27 = vpop.eup %841 }
 0x1d5   : > { %v844_v28 = vpop.eup %843  ;;  %v526_v29 = vadd.f32 1.0, %v842_v27 }
 0x1d6   : > { %v527_v30 = vadd.f32 1.0, %v844_v28 }
 0x1d7   : > { %845 = vrcp.f32 %v526_v29 }
 0x1d8   : > { %847 = vrcp.f32 %v527_v30 }
 0x1e1   : > { %v846_v31 = vpop.eup %845 }
 0x1e2   : > { %v848_v32 = vpop.eup %847  ;;  %v535_v33 = vrot.slane %v846_v31, %v436_v18 }
 0x1e3   : > { %v539_v34 = vrot.slane %v848_v32, %v436_v18 }
 0x1e5   : > { %v542_v35 = vcombine.low %v535_v33, %v539_v34 }
 0x1e7   : > { %v544_v36 = vmul.f32 %v542_v35, %v335_v5 }
 0x1e9   : > { %v546_v37 = vcombine.high %v544_v36, %v544_v36  ;;  %v548_v38 = vsel %vm349_vm0, %v544_v36, 0.0 }
 0x1eb   : > { %v549_v39 = vsel %vm349_vm0, %v546_v37, 0.0 }
 0x1ec   : > { %v550_v40 = vadd.f32 %v549_v39, %v548_v38 }
 0x1ee   : > { %551 = vadd.xlane.f32.xlu1 %v550_v40 }
 0x27b   : > { %v552_v41 = vpop.xlane.xlu1 %551 }
 0x27c   : > { %v553_v42 = vmul.f32 0.00390625, %v552_v41 }
 0x27e   : > { %817 = vmatpush3.msk.msra.mxu0 %vm349_vm0, %v553_v42 }
 0x27f   : > { %819 = vmatmul.mubr.msk.f32.vlgmr.msra.gmra.mrb[2].mxu0 %vm345_vm1, %v554_v43 }
 0x352   : > { %v628_v45 = vpop.f32.mrb[2].mxu0 }
 0x353   : > { %v629_v46 = vadd.f32 %v628_v45, %v555_v44  ;;  %v820_v47 = vpop.f32.mrb[3].mxu0 }
 0x355   : > { %v632_v48 = vmax.f32 %v629_v46, 0.0 }
 0x357   : > { %822 = vmatpush3.msk.msra.mxu1 %vm442_vm2, %v632_v48 }
 0x358   : > { %824 = vmatmul.mubr.msk.f32.vlgmr.msra.gmra.mrb[2].mxu1 %vm438_vm3, %v633_v49 }
 0x42b   : > { %v707_v51 = vpop.f32.mrb[2].mxu1 }
 0x42c   : > { %v708_v52 = vadd.f32 %v707_v51, %v634_v50  ;;  %v825_v53 = vpop.f32.mrb[3].mxu1 }
 0x42e   : > { %v807_v54 = vmul.f32 -1.442695, %v708_v52 }
 0x430   : > { %849 = vpow2.f32 %v807_v54 }
 0x43a   : > { %v850_v55 = vpop.eup %849 }
 0x43b   : > { %v714_v56 = vadd.f32 1.0, %v850_v55 }
 0x43d   : > { %851 = vrcp.f32 %v714_v56 }
 0x447   : > { %v852_v57 = vpop.eup %851 }
 0x448   : > { %719 = vperm.xlu1 %839, %v852_v57  }
 0x4c7   : > { %v720_v62 = vpop.permute.xlu1 %719 }
 0x4c8   : > { %v727_v63 = vrot.slane %v720_v62, %v726_v61 }
 0x4ca   : > { %v729_v0 = vmul.f32 %v727_v63, %v544_v36 }
 0x4cc   : > { %730 = vst [vmem:[%s334_s4] sm:$0xff] %v729_v0 }
 0x4cd PF: > { %s21_s11 = sadd.s32 1, %s859_s11  }
 0x4ce   : > { %p18_p4 = scmp.ge.s32.totalorder %s21_s11, 4  }
 0x4d0   :  { %20 = sbr.rel (!%p18_p4) target bundleno = 3 (0x3), region = 86 }

// kernel: _lambda_.83
= control target key start
LH: loop header
LB: loop body
LE: loop exit
PB: predicated region body
PF: predicated region fallthrough
CT: control target
= control target key end

     0   :  { %s336_s6 = smov 0   ;;  %s368_s0 = inlined_call_operand.vmem [shape: f32[2,4,326], index: 0, kind: input, shape index: {}]   ;;  %s369_s1 = inlined_call_operand.vmem [shape: f32[2,4,288], index: 1, kind: output, shape index: {}]  }
   0x1 LB: > { %s284_s7 = sadd.s32 4294967295, %s316_s6   ;;  %p288_p0 = scmp.ge.s32.totalorder %s316_s6, 1  ;;  %s316_s6 = sphi %s336_s6, %s11_s6  }
   0x2   : > { %p87_p1 = scmp.lt.s32.totalorder %s316_s6, 3 }
   0x4   : > { %p88_p2 = pnand %p288_p0, %p87_p1 }
   0x5   : > { %p107_p3 = scmp.lt.s32.totalorder (!%p88_p2), %s284_s7, 1  ;;  %s318_s12 = smov (!%p88_p2), 126   ;;  %vm127_vm0 = vcmask (!%p88_p2), 1043456   ;;  %vm129_vm1 = vcmask (!%p88_p2), 1039360   ;;  %vm142_vm2 = vcmask (!%p88_p2), 1031168   ;;  %vm155_vm3 = vcmask (!%p88_p2), 900096  }
   0x6   : > { %91 = sbr.rel (%p88_p2) target bundleno = 168 (0xa8), region = 24  ;;  %s319_s13 = smov (!%p88_p2), 127   ;;  %vm168_vm4 = vcmask (!%p88_p2), 891904   ;;  %vm181_vm5 = vcmask (!%p88_p2), 883712   ;;  %vm194_vm6 = vcmask (!%p88_p2), 752640   ;;  %vm207_vm7 = vcmask (!%p88_p2), 744448  }
   0x7   : > { %s320_s14 = smov (!%p88_p2), 110   ;;  %s321_s15 = smov (!%p88_p2), 109   ;;  %vm227_vm8 = vcmask (!%p88_p2), 257024   ;;  %vm220_vm9 = vcmask (!%p88_p2), 736256  }
   0x8   : > { %s322_s16 = smov (!%p88_p2), 108   ;;  %s323_s17 = smov (!%p88_p2), 92  }
   0x9   : > { %s324_s18 = smov (!%p88_p2), 91   ;;  %s325_s19 = smov (!%p88_p2), 90  }
   0xd   : > { %s371_s7 = smov (!%p107_p3, %s284_s7), 1 }
   0xe   : > { %s293_s8 = smul.u32 12, %s371_s7 }
  0x10   : > { %s111_s11 = scalar_lea.vmem %s368_s0, %s293_s8  ;;  %s116_s22 = scalar_lea.vmem %s369_s1, %s293_s8 }
  0x11   : > { %v117_v0 = vld [vmem:[%s111_s11] sm:$0xff]  ;;  %v118_v1 = vld [vmem:[%s111_s11 + $0x8] sm:$0xf] }
  0x12   : > { %135 = vrot.lane.b32.xlu1 %v117_v0, %s318_s12  ;;  %121 = vrot.lane.b32.xlu0 %v117_v0, %s319_s13 }
  0x16   : > { %137 = vrot.lane.b32.xlu1 %v118_v1, %s318_s12  ;;  %123 = vrot.lane.b32.xlu0 %v118_v1, %s319_s13 }
  0x1a   : > { %150 = vrot.lane.b32.xlu1 %v118_v1, %s320_s14  ;;  %148 = vrot.lane.b32.xlu0 %v117_v0, %s320_s14 }
  0x1e   : > { %163 = vrot.lane.b32.xlu1 %v118_v1, %s321_s15  ;;  %161 = vrot.lane.b32.xlu0 %v117_v0, %s321_s15 }
  0x22   : > { %176 = vrot.lane.b32.xlu1 %v118_v1, %s322_s16  ;;  %174 = vrot.lane.b32.xlu0 %v117_v0, %s322_s16 }
  0x26   : > { %189 = vrot.lane.b32.xlu1 %v118_v1, %s323_s17  ;;  %187 = vrot.lane.b32.xlu0 %v117_v0, %s323_s17 }
  0x2a   : > { %202 = vrot.lane.b32.xlu1 %v118_v1, %s324_s18  ;;  %200 = vrot.lane.b32.xlu0 %v117_v0, %s324_s18 }
  0x2e   : > { %215 = vrot.lane.b32.xlu1 %v118_v1, %s325_s19  ;;  %213 = vrot.lane.b32.xlu0 %v117_v0, %s325_s19 }
  0x84   : > { %v136_v2 = vpop.permute.xlu1 %135  ;;  %v122_v3 = vpop.permute.xlu0 %121 }
  0x85   : > { %v125_v7 = vrot.slane %v122_v3, 4  ;;  %v139_v13 = vrot.slane %v136_v2, 4 }
  0x88   : > { %v138_v4 = vpop.permute.xlu1 %137  ;;  %v124_v5 = vpop.permute.xlu0 %123 }
  0x89   : > { %v126_v6 = vrot.slane %v124_v5, 4  ;;  %v140_v11 = vrot.slane %v138_v4, 4  ;;  %v134_v12 = vmax.f32 %v118_v1, %v124_v5 }
  0x8b   : > { %v128_v10 = vsel %vm127_vm0, %v125_v7, %v126_v6  ;;  %v141_v19 = vsel %vm127_vm0, %v139_v13, %v140_v11  ;;  %v147_v20 = vmax.f32 %v134_v12, %v138_v4 }
  0x8c   : > { %v151_v8 = vpop.permute.xlu1 %150  ;;  %v149_v9 = vpop.permute.xlu0 %148  ;;  %v130_v14 = vsel %vm129_vm1, %v122_v3, %v128_v10  ;;  %v143_v29 = vsel %vm142_vm2, %v136_v2, %v141_v19 }
  0x8d   : > { %v153_v17 = vrot.slane %v151_v8, 4  ;;  %v152_v18 = vrot.slane %v149_v9, 4  ;;  %v133_v21 = vmax.f32 %v117_v0, %v130_v14  ;;  %v160_v30 = vmax.f32 %v147_v20, %v151_v8 }
  0x8f   : > { %v154_v26 = vsel %vm127_vm0, %v152_v18, %v153_v17  ;;  %v146_v31 = vmax.f32 %v133_v21, %v143_v29 }
  0x90   : > { %v164_v15 = vpop.permute.xlu1 %163  ;;  %v162_v16 = vpop.permute.xlu0 %161  ;;  %v156_v33 = vsel %vm155_vm3, %v149_v9, %v154_v26 }
  0x91   : > { %v166_v22 = vrot.slane %v164_v15, 4  ;;  %v165_v23 = vrot.slane %v162_v16, 4  ;;  %v173_v36 = vmax.f32 %v160_v30, %v164_v15  ;;  %v159_v41 = vmax.f32 %v146_v31, %v156_v33 }
  0x93   : > { %v167_v32 = vsel %vm127_vm0, %v165_v23, %v166_v22 }
  0x94   : > { %v177_v24 = vpop.permute.xlu1 %176  ;;  %v175_v25 = vpop.permute.xlu0 %174  ;;  %v169_v40 = vsel %vm168_vm4, %v162_v16, %v167_v32 }
  0x95   : > { %v179_v27 = vrot.slane %v177_v24, 4  ;;  %v178_v28 = vrot.slane %v175_v25, 4  ;;  %v186_v42 = vmax.f32 %v173_v36, %v177_v24  ;;  %v172_v47 = vmax.f32 %v159_v41, %v169_v40 }
  0x97   : > { %v180_v37 = vsel %vm127_vm0, %v178_v28, %v179_v27 }
  0x98   : > { %v190_v34 = vpop.permute.xlu1 %189  ;;  %v188_v35 = vpop.permute.xlu0 %187  ;;  %v182_v44 = vsel %vm181_vm5, %v175_v25, %v180_v37 }
  0x99   : > { %v192_v38 = vrot.slane %v190_v34, 4  ;;  %v191_v39 = vrot.slane %v188_v35, 4  ;;  %v199_v48 = vmax.f32 %v186_v42, %v190_v34  ;;  %v185_v52 = vmax.f32 %v172_v47, %v182_v44 }
  0x9b   : > { %v193_v43 = vsel %vm127_vm0, %v191_v39, %v192_v38 }
  0x9c   : > { %v203_v45 = vpop.permute.xlu1 %202  ;;  %v201_v46 = vpop.permute.xlu0 %200  ;;  %v195_v51 = vsel %vm194_vm6, %v188_v35, %v193_v43 }
  0x9d   : > { %v205_v49 = vrot.slane %v203_v45, 4  ;;  %v204_v50 = vrot.slane %v201_v46, 4  ;;  %v212_v53 = vmax.f32 %v199_v48, %v203_v45  ;;  %v198_v58 = vmax.f32 %v185_v52, %v195_v51 }
  0x9f   : > { %v206_v54 = vsel %vm127_vm0, %v204_v50, %v205_v49 }
  0xa0   : > { %v208_v55 = vsel %vm207_vm7, %v201_v46, %v206_v54  ;;  %v216_v56 = vpop.permute.xlu1 %215  ;;  %v214_v57 = vpop.permute.xlu0 %213 }
  0xa1   : > { %v218_v59 = vrot.slane %v216_v56, 4  ;;  %v225_v60 = vmax.f32 %v212_v53, %v216_v56  ;;  %v217_v61 = vrot.slane %v214_v57, 4  ;;  %v211_v62 = vmax.f32 %v198_v58, %v208_v55 }
  0xa3   : > { %228 = vst.msk [vmem:[%s116_s22 + $0x8] sm:$0xf] %vm227_vm8, %v225_v60  ;;  %v219_v63 = vsel %vm127_vm0, %v217_v61, %v218_v59 }
  0xa4   : > { %v221_v0 = vsel %vm220_vm9, %v214_v57, %v219_v63 }
  0xa5   : > { %v224_v1 = vmax.f32 %v211_v62, %v221_v0 }
  0xa7   : > { %226 = vst [vmem:[%s116_s22] sm:$0xff] %v224_v1 }
  0xa8 PF: > { %s11_s6 = sadd.s32 1, %s316_s6  }
  0xa9   : > { %p8_p4 = scmp.ge.s32.totalorder %s11_s6, 4  }
  0xab   :  { %10 = sbr.rel (!%p8_p4) target bundleno = 1 (0x1), region = 54 }

// kernel: _lambda_.86
= control target key start
LH: loop header
LB: loop body
LE: loop exit
PB: predicated region body
PF: predicated region fallthrough
CT: control target
= control target key end

     0   :  { %s285_s12 = smov 0   ;;  %s302_s0 = inlined_call_operand.vmem [shape: f32[2,4,64], index: 0, kind: input, shape index: {}]   ;;  %s303_s1 = inlined_call_operand.vmem [shape: f32[4,1], index: 1, kind: input, shape index: {}]   ;;  %s304_s2 = inlined_call_operand.vmem [shape: f32[4,1], index: 2, kind: input, shape index: {}]   ;;  %s305_s3 = inlined_call_operand.vmem [shape: f32[2,4,64], index: 3, kind: output, shape index: {}]  }
   0x1 LB: > { %s237_s13 = sadd.s32 4294967295, %s262_s12   ;;  %p241_p0 = scmp.ge.s32.totalorder %s262_s12, 1  ;;  %s262_s12 = sphi %s285_s12, %s13_s12  }
   0x2   : > { %p136_p1 = scmp.lt.s32.totalorder %s262_s12, 3 }
   0x4   : > { %p137_p2 = pnand %p241_p0, %p136_p1 }
   0x5   : > { %v167_v0 = vld [vmem:[%s303_s1] sm:$0xf] (!%p137_p2)  ;;  %v264_v1 = vmov (!%p137_p2), 0   ;;  %p158_p3 = scmp.lt.s32.totalorder (!%p137_p2), %s237_s13, 1  ;;  %vm182_vm0 = vcmask (!%p137_p2), 519168  }
   0x6   : > { %140 = sbr.rel (%p137_p2) target bundleno = 144 (0x90), region = 32  ;;  %255 = vset.pattern.permute.xlu0 (!%p137_p2), %v264_v1  ;;  %v174_v2 = vld [vmem:[%s304_s2] sm:$0xf] (!%p137_p2) }
   0x7   : > { %170 = vperm.xlu0 (!%p137_p2), %255, %v167_v0  }
   0xb   : > { %177 = vperm.xlu0 (!%p137_p2), %255, %v174_v2  }
   0xd   : > { %s307_s13 = smov (!%p158_p3, %s237_s13), 1 }
   0xe   : > { %s242_s18 = sshll.u32 %s307_s13, 2 }
   0xf   : > { %s161_s21 = scalar_lea.vmem %s302_s0, %s242_s18  ;;  %s165_s24 = scalar_lea.vmem %s305_s3, %s242_s18 }
  0x10   : > { %v166_v4 = vld [vmem:[%s161_s21] sm:$0xf] }
  0x86   : > { %v171_v3 = vpop.permute.xlu0 %170 }
  0x87   : > { %v173_v5 = vmul.f32 %v171_v3, %v166_v4 }
  0x8a   : > { %v178_v6 = vpop.permute.xlu0 %177 }
  0x8b   : > { %v180_v7 = vadd.f32 %v178_v6, %v173_v5 }
  0x8d   : > { %v181_v8 = vmax.f32 %v180_v7, 0.0 }
  0x8f   : > { %183 = vst.msk [vmem:[%s165_s24] sm:$0xf] %vm182_vm0, %v181_v8 }
  0x90 PF: > { %s13_s12 = sadd.s32 1, %s262_s12  }
  0x91   : > { %p10_p4 = scmp.ge.s32.totalorder %s13_s12, 4  }
  0x93   :  { %12 = sbr.rel (!%p10_p4) target bundleno = 1 (0x1), region = 62 }

// kernel: _lambda_.88
= control target key start
LH: loop header
LB: loop body
LE: loop exit
PB: predicated region body
PF: predicated region fallthrough
CT: control target
= control target key end

     0   :  { %s286_s12 = smov 0   ;;  %s321_s0 = inlined_call_operand.vmem [shape: f32[2,4,64], index: 0, kind: input, shape index: {}]   ;;  %s322_s1 = inlined_call_operand.vmem [shape: f32[2,4,64], index: 1, kind: input, shape index: {}]   ;;  %s323_s2 = inlined_call_operand.vmem [shape: f32[4,1], index: 2, kind: output, shape index: {0}]   ;;  %s324_s3 = inlined_call_operand.vmem [shape: f32[4,1], index: 3, kind: output, shape index: {1}]  }
   0x1 LB: > { %s239_s13 = sadd.s32 4294967295, %s263_s12   ;;  %p242_p0 = scmp.ge.s32.totalorder %s263_s12, 1  ;;  %s263_s12 = sphi %s286_s12, %s14_s12  }
   0x2   : > { %p138_p1 = scmp.lt.s32.totalorder %s263_s12, 3 }
   0x4   : > { %p139_p2 = pnand %p242_p0, %p138_p1 }
   0x5   : > { %p160_p3 = scmp.lt.s32.totalorder (!%p139_p2), %s239_s13, 1  ;;  %p245_p4 = scmp.ne.s32.totalorder (!%p139_p2), %s239_s13, 0 }
   0x6   : > { %142 = sbr.rel (%p139_p2) target bundleno = 175 (0xaf), region = 28 }
   0xd   : > { %s161_s14 = scalar_select %p160_p3, %s239_s13, 1 }
   0xe   : > { %171 = sbr.rel (%p245_p4) target bundleno = 21 (0x15), region = 32  ;;  %vm172_vm0 = vcmask (!%p245_p4), 3072   ;;  %v265_v0 = vmov (!%p245_p4), 0.0  }
   0xf   : > { %s243_s15 = sshll.u32 %s161_s14, 2  ;;  %173 = vst.msk [vmem:[%s323_s2] sm:$0xf] (!%p245_p4), %vm172_vm0, %v265_v0  ;;  %174 = vst.msk [vmem:[%s324_s3] sm:$0xf] (!%p245_p4), %vm172_vm0, %v265_v0 }
  0x10   : > { %s163_s18 = scalar_lea.vmem %s321_s0, %s243_s15  ;;  %s167_s21 = scalar_lea.vmem %s322_s1, %s243_s15 }
  0x15 PF: > { %v175_v1 = vld [vmem:[%s163_s18] sm:$0xf]  ;;  %vm179_vm1 = vcmask 519168   ;;  %vm184_vm2 = vcmask 3072  }
  0x16   : > { %v176_v2 = vld [vmem:[%s167_s21] sm:$0xf] }
  0x17   : > { %v177_v3 = vadd.f32 %v176_v2, %v175_v1  ;;  %v178_v7 = vld [vmem:[%s323_s2] sm:$0xf] }
  0x18   : > { %v186_v10 = vld [vmem:[%s324_s3] sm:$0xf] }
  0x19   : > { %v180_v4 = vsel %vm179_vm1, %v177_v3, 0.0  ;;  %v187_v5 = vmul.f32 %v177_v3, %v177_v3 }
  0x1a   : > { %181 = vadd.xlane.f32.xlu0 %v180_v4 }
  0x1b   : > { %v188_v6 = vsel %vm179_vm1, %v187_v5, 0.0 }
  0x1e   : > { %189 = vadd.xlane.f32.xlu0 %v188_v6 }
  0xa7   : > { %v182_v8 = vpop.xlane.xlu0 %181 }
  0xa8   : > { %v183_v9 = vadd.f32 %v182_v8, %v178_v7 }
  0xaa   : > { %185 = vst.msk [vmem:[%s323_s2] sm:$0xf] %vm184_vm2, %v183_v9 }
  0xab   : > { %v190_v11 = vpop.xlane.xlu0 %189 }
  0xac   : > { %v191_v12 = vadd.f32 %v190_v11, %v186_v10 }
  0xae   : > { %192 = vst.msk [vmem:[%s324_s3] sm:$0xf] %vm184_vm2, %v191_v12 }
  0xaf PF: > { %s14_s12 = sadd.s32 1, %s263_s12  }
  0xb0   : > { %p11_p5 = scmp.ge.s32.totalorder %s14_s12, 4  }
  0xb2   :  { %13 = sbr.rel (!%p11_p5) target bundleno = 1 (0x1), region = 69 }

// kernel: _lambda_.85
= control target key start
LH: loop header
LB: loop body
LE: loop exit
PB: predicated region body
PF: predicated region fallthrough
CT: control target
= control target key end

     0   :  { %s222_s9 = smov 0   ;;  %s254_s0 = inlined_call_operand.vmem [shape: f32[2,4,64], index: 0, kind: input, shape index: {}]   ;;  %s255_s1 = inlined_call_operand.vmem [shape: f32[4,1], index: 1, kind: output, shape index: {0}]   ;;  %s256_s2 = inlined_call_operand.vmem [shape: f32[4,1], index: 2, kind: output, shape index: {1}]  }
   0x1 LB: > { %s181_s10 = sadd.s32 4294967295, %s204_s9   ;;  %p184_p0 = scmp.ge.s32.totalorder %s204_s9, 1  ;;  %s204_s9 = sphi %s222_s9, %s13_s9  }
   0x2   : > { %p104_p1 = scmp.lt.s32.totalorder %s204_s9, 3 }
   0x4   : > { %p105_p2 = pnand %p184_p0, %p104_p1 }
   0x5   : > { %p120_p3 = scmp.lt.s32.totalorder (!%p105_p2), %s181_s10, 1  ;;  %p186_p4 = scmp.ne.s32.totalorder (!%p105_p2), %s181_s10, 0 }
   0x6   : > { %108 = sbr.rel (%p105_p2) target bundleno = 172 (0xac), region = 24 }
   0xd   : > { %s121_s11 = scalar_select %p120_p3, %s181_s10, 1 }
   0xe   : > { %127 = sbr.rel (%p186_p4) target bundleno = 21 (0x15), region = 28  ;;  %vm128_vm0 = vcmask (!%p186_p4), 3072   ;;  %v206_v0 = vmov (!%p186_p4), 0.0  }
   0xf   : > { %s185_s12 = sshll.u32 %s121_s11, 2  ;;  %129 = vst.msk [vmem:[%s255_s1] sm:$0xf] (!%p186_p4), %vm128_vm0, %v206_v0  ;;  %130 = vst.msk [vmem:[%s256_s2] sm:$0xf] (!%p186_p4), %vm128_vm0, %v206_v0 }
  0x10   : > { %s123_s15 = scalar_lea.vmem %s254_s0, %s185_s12 }
  0x15 PF: > { %v131_v1 = vld [vmem:[%s123_s15] sm:$0xf]  ;;  %vm133_vm1 = vcmask 519168   ;;  %vm138_vm2 = vcmask 3072  }
  0x16   : > { %v134_v2 = vsel %vm133_vm1, %v131_v1, 0.0  ;;  %v141_v3 = vmul.f32 %v131_v1, %v131_v1  ;;  %v132_v5 = vld [vmem:[%s255_s1] sm:$0xf] }
  0x17   : > { %135 = vadd.xlane.f32.xlu0 %v134_v2  ;;  %v140_v8 = vld [vmem:[%s256_s2] sm:$0xf] }
  0x18   : > { %v142_v4 = vsel %vm133_vm1, %v141_v3, 0.0 }
  0x1b   : > { %143 = vadd.xlane.f32.xlu0 %v142_v4 }
  0xa4   : > { %v136_v6 = vpop.xlane.xlu0 %135 }
  0xa5   : > { %v137_v7 = vadd.f32 %v136_v6, %v132_v5 }
  0xa7   : > { %139 = vst.msk [vmem:[%s255_s1] sm:$0xf] %vm138_vm2, %v137_v7 }
  0xa8   : > { %v144_v9 = vpop.xlane.xlu0 %143 }
  0xa9   : > { %v145_v10 = vadd.f32 %v144_v9, %v140_v8 }
  0xab   : > { %146 = vst.msk [vmem:[%s256_s2] sm:$0xf] %vm138_vm2, %v145_v10 }
  0xac PF: > { %s13_s9 = sadd.s32 1, %s204_s9  }
  0xad   : > { %p10_p5 = scmp.ge.s32.totalorder %s13_s9, 4  }
  0xaf   :  { %12 = sbr.rel (!%p10_p5) target bundleno = 1 (0x1), region = 62 }

// kernel: _lambda_.84
= control target key start
LH: loop header
LB: loop body
LE: loop exit
PB: predicated region body
PF: predicated region fallthrough
CT: control target
= control target key end

     0   :  { %s1105_s12 = smov 0   ;;  %s1204_s0 = inlined_call_operand.vmem [shape: f32[2,4,102], index: 0, kind: input, shape index: {}]   ;;  %s1205_s1 = inlined_call_operand.vmem [shape: f32[9,4,4], index: 1, kind: input, shape index: {}]   ;;  %s1206_s2 = inlined_call_operand.vmem [shape: f32[4,1], index: 2, kind: input, shape index: {}]   ;;  %s1207_s3 = inlined_call_operand.vmem [shape: f32[2,4,80], index: 3, kind: output, shape index: {}]  }
   0x1 LB: > { %s948_s13 = sadd.s32 4294967295, %s1072_s12   ;;  %p952_p0 = scmp.ge.s32.totalorder %s1072_s12, 1  ;;  %s1072_s12 = sphi %s1105_s12, %s13_s12  }
   0x2   : > { %p136_p1 = scmp.lt.s32.totalorder %s1072_s12, 3 }
   0x4   : > { %p137_p2 = pnand %p952_p0, %p136_p1 }
   0x5   : > { %p158_p3 = scmp.lt.s32.totalorder (!%p137_p2), %s948_s13, 1  ;;  %v1074_v0 = vmov (!%p137_p2), 0.0   ;;  %vm1075_vm0 = vmmov (!%p137_p2), 0   ;;  %vm177_vm1 = vcmask (!%p137_p2), 1043456   ;;  %vm173_vm2 = vcmask (!%p137_p2), 31744   ;;  %s1076_s20 = smov (!%p137_p2), 127  }
   0x6   : > { %140 = sbr.rel (%p137_p2) target bundleno = 368 (0x170), region = 32  ;;  %1001 = vmatprep.subr.mxu0 (!%p137_p2), %v1074_v0  ;;  %1003 = vmatprep.mubr.msk.f32.mxu0 (!%p137_p2), %vm1075_vm0, %v1074_v0  ;;  %v167_v2 = vld [vmem:[%s1205_s1] sm:$0xf] (!%p137_p2)  ;;  %s1077_s21 = smov (!%p137_p2), 118   ;;  %v1080_v3 = vmov (!%p137_p2), 0   ;;  %vm893_vm3 = vcmask (!%p137_p2), 650240  }
   0x7   : > { %1006 = vmatprep.subr.mxu1 (!%p137_p2), %v1074_v0  ;;  %1008 = vmatprep.mubr.msk.f32.mxu1 (!%p137_p2), %vm1075_vm0, %v1074_v0  ;;  %s1078_s22 = smov (!%p137_p2), 126   ;;  %s1079_s23 = smov (!%p137_p2), 117   ;;  %v885_v4 = vld [vmem:[%s1206_s2] sm:$0xf] (!%p137_p2)  ;;  %v955_v5 = vld [vmem:[%s1205_s1 + $0x4] sm:$0xf] (!%p137_p2) }
   0x8   : > { %1065 = vset.pattern.permute.xlu0 (!%p137_p2), %v1080_v3  ;;  %s1081_s24 = smov (!%p137_p2), 116   ;;  %s1082_s25 = smov (!%p137_p2), 108   ;;  %v963_v8 = vld [vmem:[%s1205_s1 + $0xc] sm:$0xf] (!%p137_p2)  ;;  %v960_v9 = vld [vmem:[%s1205_s1 + $0x8] sm:$0xf] (!%p137_p2) }
   0x9   : > { %s1083_s26 = smov (!%p137_p2), 107   ;;  %s1084_s27 = smov (!%p137_p2), 106   ;;  %v966_v12 = vld [vmem:[%s1205_s1 + $0x10] sm:$0xf] (!%p137_p2)  ;;  %v969_v13 = vld [vmem:[%s1205_s1 + $0x14] sm:$0xf] (!%p137_p2) }
   0xa   : > { %v972_v16 = vld [vmem:[%s1205_s1 + $0x18] sm:$0xf] (!%p137_p2)  ;;  %v975_v17 = vld [vmem:[%s1205_s1 + $0x1c] sm:$0xf] (!%p137_p2)  ;;  %v978_v20 = vld [vmem:[%s1205_s1 + $0x20] sm:$0xf] (!%p137_p2) }
   0xd   : > { %s1209_s13 = smov (!%p158_p3, %s948_s13), 1 }
   0xe   : > { %s953_s14 = sshll.u32 %s1209_s13, 2 }
   0xf   : > { %s161_s17 = scalar_lea.vmem %s1204_s0, %s953_s14 }
  0x10   : > { %v166_v1 = vld [vmem:[%s161_s17] sm:$0xf] }
  0x11   : > { %171 = vrot.lane.b32.xlu0 %v166_v1, %s1076_s20  ;;  %407 = vrot.lane.b32.xlu1 %v166_v1, %s1077_s21 }
  0x12   : > { %1007 = vmatpush3.msk.msra.mxu1 %vm177_vm1, %v166_v1 }
  0x13   : > { %1016 = vmatprep.subr.mxu1 %v1074_v0  ;;  %1009 = vmatmul.mubr.msk.f32.vlgmr.msra.gmra.mrb[0].mxu1 %vm173_vm2, %v167_v2 }
  0x14   : > { %1018 = vmatprep.mubr.msk.f32.mxu1 %vm1075_vm0, %v1074_v0 }
  0x15   : > { %327 = vrot.lane.b32.xlu0 %v166_v1, %s1078_s22  ;;  %487 = vrot.lane.b32.xlu1 %v166_v1, %s1079_s23 }
  0x19   : > { %567 = vrot.lane.b32.xlu0 %v166_v1, %s1081_s24  ;;  %647 = vrot.lane.b32.xlu1 %v166_v1, %s1082_s25  ;;  %s165_s24 = scalar_lea.vmem %s1207_s3, %s953_s14 }
  0x1d   : > { %727 = vrot.lane.b32.xlu0 %v166_v1, %s1083_s26  ;;  %807 = vrot.lane.b32.xlu1 %v166_v1, %s1084_s27 }
  0x21   : > { %888 = vperm.xlu0 %1065, %v885_v4  }
  0x83   : > { %v172_v6 = vpop.permute.xlu0 %171  ;;  %v408_v7 = vpop.permute.xlu1 %407 }
  0x84   : > { %1002 = vmatpush3.msk.msra.mxu0 %vm177_vm1, %v172_v6  ;;  %1017 = vmatpush3.msk.msra.mxu1 %vm177_vm1, %v408_v7 }
  0x85   : > { %1004 = vmatmul.mubr.msk.f32.vlgmr.msra.gmra.mrb[0].mxu0 %vm173_vm2, %v955_v5  ;;  %1011 = vmatprep.subr.mxu0 %v1074_v0 }
  0x86   : > { %1013 = vmatprep.mubr.msk.f32.mxu0 %vm1075_vm0, %v1074_v0  ;;  %1019 = vmatmul.mubr.msk.f32.vlgmr.msra.gmra.mrb[2].mxu1 %vm173_vm2, %v963_v8 }
  0x87   : > { %v328_v10 = vpop.permute.xlu0 %327  ;;  %v488_v11 = vpop.permute.xlu1 %487  ;;  %1026 = vmatprep.subr.mxu1 %v1074_v0  ;;  %1028 = vmatprep.mubr.msk.f32.mxu1 %vm1075_vm0, %v1074_v0 }
  0x88   : > { %1012 = vmatpush3.msk.msra.mxu0 %vm177_vm1, %v328_v10 }
  0x89   : > { %1014 = vmatmul.mubr.msk.f32.vlgmr.msra.gmra.mrb[2].mxu0 %vm173_vm2, %v960_v9  ;;  %1021 = vmatprep.subr.mxu0 %v1074_v0 }
  0x8a   : > { %1022 = vmatpush3.msk.msra.mxu0 %vm177_vm1, %v488_v11  ;;  %1023 = vmatprep.mubr.msk.f32.mxu0 %vm1075_vm0, %v1074_v0 }
  0x8b   : > { %v568_v14 = vpop.permute.xlu0 %567  ;;  %v648_v15 = vpop.permute.xlu1 %647  ;;  %1031 = vmatprep.subr.mxu0 %v1074_v0 }
  0x8c   : > { %1027 = vmatpush3.msk.msra.mxu1 %vm177_vm1, %v568_v14 }
  0x8d   : > { %1024 = vmatmul.mubr.msk.f32.vlgmr.msra.gmra.mrb[4].mxu0 %vm173_vm2, %v966_v12  ;;  %1029 = vmatmul.mubr.msk.f32.vlgmr.msra.gmra.mrb[4].mxu1 %vm173_vm2, %v969_v13 }
  0x8e   : > { %1032 = vmatpush3.msk.msra.mxu0 %vm177_vm1, %v648_v15  ;;  %1033 = vmatprep.mubr.msk.f32.mxu0 %vm1075_vm0, %v1074_v0 }
  0x8f   : > { %v728_v18 = vpop.permute.xlu0 %727  ;;  %1036 = vmatprep.subr.mxu1 %v1074_v0  ;;  %v808_v19 = vpop.permute.xlu1 %807  ;;  %1038 = vmatprep.mubr.msk.f32.mxu1 %vm1075_vm0, %v1074_v0 }
  0x90   : > { %1037 = vmatpush3.msk.msra.mxu1 %vm177_vm1, %v728_v18  ;;  %1041 = vmatprep.subr.mxu0 %v1074_v0 }
  0x91   : > { %1034 = vmatmul.mubr.msk.f32.vlgmr.msra.gmra.mrb[6].mxu0 %vm173_vm2, %v972_v16  ;;  %1039 = vmatmul.mubr.msk.f32.vlgmr.msra.gmra.mrb[6].mxu1 %vm173_vm2, %v975_v17 }
  0x92   : > { %1042 = vmatpush3.msk.msra.mxu0 %vm177_vm1, %v808_v19  ;;  %1043 = vmatprep.mubr.msk.f32.mxu0 %vm1075_vm0, %v1074_v0 }
  0x95   : > { %1044 = vmatmul.mubr.msk.f32.vlgmr.msra.gmra.mrb[8].mxu0 %vm173_vm2, %v978_v20 }
  0xa0   : > { %v889_v45 = vpop.permute.xlu0 %888 }
  0xe6   : > { %v321_v21 = vpop.f32.mrb[0].mxu1 }
  0xe7   : > { %v1010_v22 = vpop.f32.mrb[1].mxu1 }
 0x158   : > { %v246_v23 = vpop.f32.mrb[0].mxu0 }
 0x159   : > { %v1005_v24 = vpop.f32.mrb[1].mxu0  ;;  %v322_v25 = vadd.f32 %v321_v21, %v246_v23  ;;  %v480_v26 = vpop.f32.mrb[2].mxu1 }
 0x15a   : > { %v1020_v27 = vpop.f32.mrb[3].mxu1 }
 0x15c   : > { %v400_v28 = vpop.f32.mrb[2].mxu0 }
 0x15d   : > { %v404_v29 = vadd.f32 %v400_v28, %v322_v25  ;;  %v1015_v30 = vpop.f32.mrb[3].mxu0 }
 0x15f   : > { %v484_v31 = vadd.f32 %v480_v26, %v404_v29 }
 0x160   : > { %v560_v32 = vpop.f32.mrb[4].mxu0  ;;  %v640_v33 = vpop.f32.mrb[4].mxu1 }
 0x161   : > { %v564_v34 = vadd.f32 %v560_v32, %v484_v31  ;;  %v1025_v35 = vpop.f32.mrb[5].mxu0  ;;  %v1030_v36 = vpop.f32.mrb[5].mxu1 }
 0x163   : > { %v644_v37 = vadd.f32 %v640_v33, %v564_v34 }
 0x164   : > { %v720_v38 = vpop.f32.mrb[6].mxu0  ;;  %v800_v39 = vpop.f32.mrb[6].mxu1 }
 0x165   : > { %v724_v40 = vadd.f32 %v720_v38, %v644_v37  ;;  %v1035_v41 = vpop.f32.mrb[7].mxu0  ;;  %v1040_v42 = vpop.f32.mrb[7].mxu1 }
 0x167   : > { %v804_v43 = vadd.f32 %v800_v39, %v724_v40 }
 0x168   : > { %v880_v44 = vpop.f32.mrb[8].mxu0 }
 0x169   : > { %v884_v46 = vadd.f32 %v880_v44, %v804_v43  ;;  %v1045_v47 = vpop.f32.mrb[9].mxu0 }
 0x16b   : > { %v891_v48 = vadd.f32 %v889_v45, %v884_v46 }
 0x16d   : > { %v892_v49 = vmax.f32 %v891_v48, 0.0 }
 0x16f   : > { %894 = vst.msk [vmem:[%s165_s24] sm:$0xf] %vm893_vm3, %v892_v49 }
 0x170 PF: > { %s13_s12 = sadd.s32 1, %s1072_s12  }
 0x171   : > { %p10_p4 = scmp.ge.s32.totalorder %s13_s12, 4  }
 0x173   :  { %12 = sbr.rel (!%p10_p4) target bundleno = 1 (0x1), region = 70 }

// kernel: _lambda_.89
= control target key start
LH: loop header
LB: loop body
LE: loop exit
PB: predicated region body
PF: predicated region fallthrough
CT: control target
= control target key end

     0   :  { %s349_s15 = smov 0   ;;  %s375_s0 = inlined_call_operand.vmem [shape: f32[2,4,64], index: 0, kind: input, shape index: {}]   ;;  %s376_s1 = inlined_call_operand.vmem [shape: f32[2,4,64], index: 1, kind: input, shape index: {}]   ;;  %s377_s2 = inlined_call_operand.vmem [shape: f32[4,1], index: 2, kind: input, shape index: {}]   ;;  %s378_s3 = inlined_call_operand.vmem [shape: f32[4,1], index: 3, kind: input, shape index: {}]   ;;  %s379_s4 = inlined_call_operand.vmem [shape: f32[2,4,64], index: 4, kind: output, shape index: {}]  }
   0x1 LB: > { %s295_s16 = sadd.s32 4294967295, %s321_s15   ;;  %p299_p0 = scmp.ge.s32.totalorder %s321_s15, 1  ;;  %s321_s15 = sphi %s349_s15, %s14_s15  }
   0x2   : > { %p170_p1 = scmp.lt.s32.totalorder %s321_s15, 3 }
   0x4   : > { %p171_p2 = pnand %p299_p0, %p170_p1 }
   0x5   : > { %v213_v0 = vld [vmem:[%s377_s2] sm:$0xf] (!%p171_p2)  ;;  %v323_v1 = vmov (!%p171_p2), 0   ;;  %p198_p3 = scmp.lt.s32.totalorder (!%p171_p2), %s295_s16, 1  ;;  %vm228_vm0 = vcmask (!%p171_p2), 519168  }
   0x6   : > { %174 = sbr.rel (%p171_p2) target bundleno = 144 (0x90), region = 36  ;;  %314 = vset.pattern.permute.xlu0 (!%p171_p2), %v323_v1  ;;  %v220_v2 = vld [vmem:[%s378_s3] sm:$0xf] (!%p171_p2) }
   0x7   : > { %216 = vperm.xlu0 (!%p171_p2), %314, %v213_v0  }
   0xb   : > { %223 = vperm.xlu0 (!%p171_p2), %314, %v220_v2  }
   0xd   : > { %s381_s16 = smov (!%p198_p3, %s295_s16), 1 }
   0xe   : > { %s300_s21 = sshll.u32 %s381_s16, 2 }
   0xf   : > { %s201_s24 = scalar_lea.vmem %s375_s0, %s300_s21  ;;  %s205_s27 = scalar_lea.vmem %s376_s1, %s300_s21 }
  0x10   : > { %v210_v3 = vld [vmem:[%s201_s24] sm:$0xf]  ;;  %s209_s30 = scalar_lea.vmem %s379_s4, %s300_s21 }
  0x11   : > { %v211_v4 = vld [vmem:[%s205_s27] sm:$0xf] }
  0x12   : > { %v212_v5 = vadd.f32 %v211_v4, %v210_v3 }
  0x86   : > { %v217_v6 = vpop.permute.xlu0 %216 }
  0x87   : > { %v219_v7 = vmul.f32 %v217_v6, %v212_v5 }
  0x8a   : > { %v224_v8 = vpop.permute.xlu0 %223 }
  0x8b   : > { %v226_v9 = vadd.f32 %v224_v8, %v219_v7 }
  0x8d   : > { %v227_v10 = vmax.f32 %v226_v9, 0.0 }
  0x8f   : > { %229 = vst.msk [vmem:[%s209_s30] sm:$0xf] %vm228_vm0, %v227_v10 }
  0x90 PF: > { %s14_s15 = sadd.s32 1, %s321_s15  }
  0x91   : > { %p11_p4 = scmp.ge.s32.totalorder %s14_s15, 4  }
  0x93   :  { %13 = sbr.rel (!%p11_p4) target bundleno = 1 (0x1), region = 69 }

// kernel: _lambda_.98
= control target key start
LH: loop header
LB: loop body
LE: loop exit
PB: predicated region body
PF: predicated region fallthrough
CT: control target
= control target key end

     0   :  { %s252_s6 = smov 0   ;;  %s276_s0 = inlined_call_operand.vmem [shape: f32[2,4,102], index: 0, kind: input, shape index: {}]   ;;  %s277_s1 = inlined_call_operand.vmem [shape: f32[2,4,80], index: 1, kind: output, shape index: {}]  }
   0x1 LB: > { %s201_s7 = sadd.s32 4294967295, %s232_s6   ;;  %p205_p0 = scmp.ge.s32.totalorder %s232_s6, 1  ;;  %s232_s6 = sphi %s252_s6, %s11_s6  }
   0x2   : > { %p86_p1 = scmp.lt.s32.totalorder %s232_s6, 3 }
   0x4   : > { %p87_p2 = pnand %p205_p0, %p86_p1 }
   0x5   : > { %p104_p3 = scmp.lt.s32.totalorder (!%p87_p2), %s201_s7, 1  ;;  %s234_s12 = smov (!%p87_p2), 127   ;;  %vm146_vm0 = vcmask (!%p87_p2), 650240  }
   0x6   : > { %90 = sbr.rel (%p87_p2) target bundleno = 151 (0x97), region = 24  ;;  %s235_s13 = smov (!%p87_p2), 118  }
   0x7   : > { %s236_s14 = smov (!%p87_p2), 126   ;;  %s237_s15 = smov (!%p87_p2), 117  }
   0x8   : > { %s238_s16 = smov (!%p87_p2), 116   ;;  %s239_s17 = smov (!%p87_p2), 108  }
   0x9   : > { %s240_s18 = smov (!%p87_p2), 107   ;;  %s241_s19 = smov (!%p87_p2), 106  }
   0xd   : > { %s279_s7 = smov (!%p104_p3, %s201_s7), 1 }
   0xe   : > { %s206_s8 = sshll.u32 %s279_s7, 2 }
   0xf   : > { %s107_s11 = scalar_lea.vmem %s276_s0, %s206_s8  ;;  %s111_s22 = scalar_lea.vmem %s277_s1, %s206_s8 }
  0x10   : > { %v112_v0 = vld [vmem:[%s107_s11] sm:$0xf] }
  0x11   : > { %114 = vrot.lane.b32.xlu0 %v112_v0, %s234_s12  ;;  %122 = vrot.lane.b32.xlu1 %v112_v0, %s235_s13 }
  0x15   : > { %118 = vrot.lane.b32.xlu0 %v112_v0, %s236_s14  ;;  %126 = vrot.lane.b32.xlu1 %v112_v0, %s237_s15 }
  0x19   : > { %130 = vrot.lane.b32.xlu0 %v112_v0, %s238_s16  ;;  %134 = vrot.lane.b32.xlu1 %v112_v0, %s239_s17 }
  0x1d   : > { %138 = vrot.lane.b32.xlu0 %v112_v0, %s240_s18  ;;  %142 = vrot.lane.b32.xlu1 %v112_v0, %s241_s19 }
  0x83   : > { %v115_v1 = vpop.permute.xlu0 %114  ;;  %v123_v2 = vpop.permute.xlu1 %122 }
  0x84   : > { %v117_v3 = vmax.f32 %v112_v0, %v115_v1 }
  0x87   : > { %v119_v4 = vpop.permute.xlu0 %118  ;;  %v127_v5 = vpop.permute.xlu1 %126 }
  0x88   : > { %v121_v6 = vmax.f32 %v117_v3, %v119_v4 }
  0x8a   : > { %v125_v7 = vmax.f32 %v121_v6, %v123_v2 }
  0x8b   : > { %v131_v8 = vpop.permute.xlu0 %130  ;;  %v135_v9 = vpop.permute.xlu1 %134 }
  0x8c   : > { %v129_v10 = vmax.f32 %v125_v7, %v127_v5 }
  0x8e   : > { %v133_v11 = vmax.f32 %v129_v10, %v131_v8 }
  0x8f   : > { %v139_v12 = vpop.permute.xlu0 %138  ;;  %v143_v14 = vpop.permute.xlu1 %142 }
  0x90   : > { %v137_v13 = vmax.f32 %v133_v11, %v135_v9 }
  0x92   : > { %v141_v15 = vmax.f32 %v137_v13, %v139_v12 }
  0x94   : > { %v145_v16 = vmax.f32 %v141_v15, %v143_v14 }
  0x96   : > { %147 = vst.msk [vmem:[%s111_s22] sm:$0xf] %vm146_vm0, %v145_v16 }
  0x97 PF: > { %s11_s6 = sadd.s32 1, %s232_s6  }
  0x98   : > { %p8_p4 = scmp.ge.s32.totalorder %s11_s6, 4  }
  0x9a   :  { %10 = sbr.rel (!%p8_p4) target bundleno = 1 (0x1), region = 54 }

// kernel: _lambda_.90
= control target key start
LH: loop header
LB: loop body
LE: loop exit
PB: predicated region body
PF: predicated region fallthrough
CT: control target
= control target key end

     0   :  { %s877_s11 = smov 0   ;;  %s936_s0 = inlined_call_operand.vmem [shape: f32[2,4,64], index: 0, kind: input, shape index: {}]   ;;  %s937_s1 = inlined_call_operand.vmem [shape: f32[2,4], index: 1, kind: input, shape index: {}]   ;;  %s938_s2 = inlined_call_operand.vmem [shape: f32[2,1], index: 2, kind: input, shape index: {}]   ;;  %s939_s3 = inlined_call_operand.vmem [shape: f32[1,2], index: 3, kind: input, shape index: {}]   ;;  %s940_s4 = inlined_call_operand.<no memory space> [shape: f32[1,1], index: 4, kind: input, shape index: {}]   ;;  %s941_s5 = inlined_call_operand.vmem [shape: f32[2,4], index: 5, kind: input, shape index: {}]   ;;  %s942_s6 = inlined_call_operand.vmem [shape: f32[2,1], index: 6, kind: input, shape index: {}]   ;;  %s943_s7 = inlined_call_operand.vmem [shape: f32[4,2], index: 7, kind: input, shape index: {}]   ;;  %s944_s8 = inlined_call_operand.vmem [shape: f32[4,1], index: 8, kind: input, shape index: {}]   ;;  %s945_s9 = inlined_call_operand.vmem [shape: f32[2,4,64], index: 9, kind: output, shape index: {}]  }
   0x1   :  { %v14_v0 = vstv %s940_s4 }
   0x2   :  { %15 = vst [vmem:[#allocation2] sm:$0x1] %v14_v0 }
   0x3 LB: > { %s745_s12 = sadd.s32 4294967295, %s819_s11   ;;  %p749_p0 = scmp.ge.s32.totalorder %s819_s11, 1  ;;  %s819_s11 = sphi %s877_s11, %s21_s11  }
   0x4   : > { %p288_p1 = scmp.lt.s32.totalorder %s819_s11, 3 }
   0x6   : > { %p289_p2 = pnand %p749_p0, %p288_p1 }
   0x7   : > { %p322_p3 = scmp.lt.s32.totalorder (!%p289_p2), %s745_s12, 1  ;;  %v821_v1 = vmov (!%p289_p2), 0.0   ;;  %vm822_vm0 = vmmov (!%p289_p2), 0   ;;  %v332_v2 = vld [vmem:[%s938_s2] sm:$0x3] (!%p289_p2)  ;;  %v823_v3 = vmov (!%p289_p2), 0   ;;  %v424_v13 = vlaneseq (!%p289_p2) }
   0x8   : > { %292 = sbr.rel (%p289_p2) target bundleno = 1215 (0x4bf), region = 56  ;;  %772 = vmatprep.subr.mxu0 (!%p289_p2), %v821_v1  ;;  %774 = vmatprep.mubr.msk.f32.mxu0 (!%p289_p2), %vm822_vm0, %v821_v1  ;;  %vm342_vm1 = vcmask (!%p289_p2), 1043456   ;;  %v331_v5 = vld [vmem:[%s937_s1] sm:$0x3] (!%p289_p2)  ;;  %vm338_vm2 = vcmask (!%p289_p2), 31744   ;;  %vm432_vm3 = vcmask (!%p289_p2), 1041408  }
   0x9   : > { %803 = vset.pattern.permute.xlu0 (!%p289_p2), %v823_v3  ;;  %777 = vmatprep.subr.mxu1 (!%p289_p2), %v821_v1  ;;  %v418_v4 = vld [vmem:[#allocation2] sm:$0x1] (!%p289_p2)  ;;  %vm428_vm4 = vcmask (!%p289_p2), 15360   ;;  %v425_v14 = vshrl.u32 (!%p289_p2), %v424_v13, 7  ;;  %vm517_vm5 = vcmask (!%p289_p2), 519168  }
   0xa   : > { %335 = vperm.xlu0 (!%p289_p2), %803, %v332_v2   ;;  %779 = vmatprep.mubr.msk.f32.mxu1 (!%p289_p2), %vm822_vm0, %v821_v1  ;;  %v417_v12 = vld [vmem:[%s939_s3] sm:$0x1] (!%p289_p2) }
   0xb   : > { %804 = vset.pattern.permute.xlu1 (!%p289_p2), %v823_v3  ;;  %v426_v15 = vsub.s32 (!%p289_p2), 0, %v425_v14  ;;  %v522_v30 = vld [vmem:[%s941_s5] sm:$0x3] (!%p289_p2) }
   0xc   : > { %v523_v31 = vld [vmem:[%s942_s6] sm:$0x3] (!%p289_p2) }
   0xd   : > { %v601_v36 = vld [vmem:[%s943_s7] sm:$0xf] (!%p289_p2) }
   0xe   : > { %421 = vperm.xlu0 (!%p289_p2), %803, %v418_v4   ;;  %v602_v37 = vld [vmem:[%s944_s8] sm:$0xf] (!%p289_p2) }
   0xf   : > { %s947_s12 = smov (!%p322_p3, %s745_s12), 1 }
  0x10   : > { %s750_s14 = sshll.u32 %s947_s12, 2 }
  0x11   : > { %s325_s17 = scalar_lea.vmem %s936_s0, %s750_s14  ;;  %s329_s4 = scalar_lea.vmem %s945_s9, %s750_s14 }
  0x12   : > { %v330_v6 = vld [vmem:[%s325_s17] sm:$0xf] }
  0x13   : > { %773 = vmatpush3.msk.msra.mxu0 %vm342_vm1, %v330_v6 }
  0x14   : > { %775 = vmatmul.mubr.msk.f32.vlgmr.msra.gmra.mrb[0].mxu0 %vm338_vm2, %v331_v5  ;;  %782 = vmatprep.subr.mxu0 %v821_v1 }
  0x15   : > { %784 = vmatprep.mubr.msk.f32.mxu0 %vm822_vm0, %v821_v1 }
  0x89   : > { %v336_v7 = vpop.permute.xlu0 %335 }
  0x8d   : > { %v422_v16 = vpop.permute.xlu0 %421 }
  0x8e   : > { %v427_v17 = vrot.slane %v422_v16, %v426_v15 }
  0xe7   : > { %v412_v8 = vpop.f32.mrb[0].mxu0 }
  0xe8   : > { %v413_v9 = vadd.f32 %v412_v8, %v336_v7  ;;  %v776_v10 = vpop.f32.mrb[1].mxu0 }
  0xea   : > { %v416_v11 = vmax.f32 %v413_v9, 0.0 }
  0xec   : > { %778 = vmatpush3.msk.msra.mxu1 %vm432_vm3, %v416_v11 }
  0xed   : > { %780 = vmatmul.mubr.msk.f32.vlgmr.msra.gmra.mrb[0].mxu1 %vm428_vm4, %v417_v12  ;;  %787 = vmatprep.subr.mxu1 %v821_v1 }
  0xee   : > { %789 = vmatprep.mubr.msk.f32.mxu1 %vm822_vm0, %v821_v1 }
 0x1c0   : > { %v502_v18 = vpop.f32.mrb[0].mxu1 }
 0x1c1   : > { %v503_v19 = vadd.f32 %v502_v18, %v427_v17  ;;  %v781_v20 = vpop.f32.mrb[1].mxu1 }
 0x1c3   : > { %v756_v21 = vmul.f32 -1.442695, %v503_v19 }
 0x1c5   : > { %805 = vpow2.f32 %v756_v21 }
 0x1cf   : > { %v806_v22 = vpop.eup %805 }
 0x1d0   : > { %v509_v23 = vadd.f32 1.0, %v806_v22 }
 0x1d2   : > { %807 = vrcp.f32 %v509_v23 }
 0x1dc   : > { %v808_v24 = vpop.eup %807 }
 0x1dd   : > { %v515_v25 = vrot.slane %v808_v24, %v426_v15 }
 0x1df   : > { %v516_v26 = vmul.f32 %v515_v25, %v330_v6 }
 0x1e1   : > { %v518_v27 = vsel %vm517_vm5, %v516_v26, 0.0 }
 0x1e2   : > { %519 = vadd.xlane.f32.xlu1 %v518_v27 }
 0x26f   : > { %v520_v28 = vpop.xlane.xlu1 %519 }
 0x270   : > { %v521_v29 = vmul.f32 0.015625, %v520_v28 }
 0x272   : > { %783 = vmatpush3.msk.msra.mxu0 %vm342_vm1, %v521_v29 }
 0x273   : > { %785 = vmatmul.mubr.msk.f32.vlgmr.msra.gmra.mrb[2].mxu0 %vm338_vm2, %v522_v30 }
 0x346   : > { %v596_v32 = vpop.f32.mrb[2].mxu0 }
 0x347   : > { %v597_v33 = vadd.f32 %v596_v32, %v523_v31  ;;  %v786_v34 = vpop.f32.mrb[3].mxu0 }
 0x349   : > { %v600_v35 = vmax.f32 %v597_v33, 0.0 }
 0x34b   : > { %788 = vmatpush3.msk.msra.mxu1 %vm432_vm3, %v600_v35 }
 0x34c   : > { %790 = vmatmul.mubr.msk.f32.vlgmr.msra.gmra.mrb[2].mxu1 %vm428_vm4, %v601_v36 }
 0x41f   : > { %v675_v38 = vpop.f32.mrb[2].mxu1 }
 0x420   : > { %v676_v39 = vadd.f32 %v675_v38, %v602_v37  ;;  %v791_v40 = vpop.f32.mrb[3].mxu1 }
 0x422   : > { %v761_v41 = vmul.f32 -1.442695, %v676_v39 }
 0x424   : > { %809 = vpow2.f32 %v761_v41 }
 0x42e   : > { %v810_v42 = vpop.eup %809 }
 0x42f   : > { %v682_v43 = vadd.f32 1.0, %v810_v42 }
 0x431   : > { %811 = vrcp.f32 %v682_v43 }
 0x43b   : > { %v812_v44 = vpop.eup %811 }
 0x43c   : > { %687 = vperm.xlu1 %804, %v812_v44  }
 0x4bb   : > { %v688_v45 = vpop.permute.xlu1 %687 }
 0x4bc   : > { %v690_v46 = vmul.f32 %v688_v45, %v516_v26 }
 0x4be   : > { %691 = vst.msk [vmem:[%s329_s4] sm:$0xf] %vm517_vm5, %v690_v46 }
 0x4bf PF: > { %s21_s11 = sadd.s32 1, %s819_s11  }
 0x4c0   : > { %p18_p4 = scmp.ge.s32.totalorder %s21_s11, 4  }
 0x4c2   :  { %20 = sbr.rel (!%p18_p4) target bundleno = 3 (0x3), region = 86 }

// kernel: _lambda_.100
= control target key start
LH: loop header
LB: loop body
LE: loop exit
PB: predicated region body
PF: predicated region fallthrough
CT: control target
= control target key end

     0   :  { %s222_s9 = smov 0   ;;  %s254_s0 = inlined_call_operand.vmem [shape: f32[2,4,16], index: 0, kind: input, shape index: {}]   ;;  %s255_s1 = inlined_call_operand.vmem [shape: f32[4,1], index: 1, kind: output, shape index: {0}]   ;;  %s256_s2 = inlined_call_operand.vmem [shape: f32[4,1], index: 2, kind: output, shape index: {1}]  }
   0x1 LB: > { %s181_s10 = sadd.s32 4294967295, %s204_s9   ;;  %p184_p0 = scmp.ge.s32.totalorder %s204_s9, 1  ;;  %s204_s9 = sphi %s222_s9, %s13_s9  }
   0x2   : > { %p104_p1 = scmp.lt.s32.totalorder %s204_s9, 3 }
   0x4   : > { %p105_p2 = pnand %p184_p0, %p104_p1 }
   0x5   : > { %p120_p3 = scmp.lt.s32.totalorder (!%p105_p2), %s181_s10, 1  ;;  %p186_p4 = scmp.ne.s32.totalorder (!%p105_p2), %s181_s10, 0 }
   0x6   : > { %108 = sbr.rel (%p105_p2) target bundleno = 172 (0xac), region = 24 }
   0xd   : > { %s121_s11 = scalar_select %p120_p3, %s181_s10, 1 }
   0xe   : > { %127 = sbr.rel (%p186_p4) target bundleno = 21 (0x15), region = 28  ;;  %vm128_vm0 = vcmask (!%p186_p4), 3072   ;;  %v206_v0 = vmov (!%p186_p4), 0.0  }
   0xf   : > { %s185_s12 = sshll.u32 %s121_s11, 2  ;;  %129 = vst.msk [vmem:[%s255_s1] sm:$0xf] (!%p186_p4), %vm128_vm0, %v206_v0  ;;  %130 = vst.msk [vmem:[%s256_s2] sm:$0xf] (!%p186_p4), %vm128_vm0, %v206_v0 }
  0x10   : > { %s123_s15 = scalar_lea.vmem %s254_s0, %s185_s12 }
  0x15 PF: > { %v131_v1 = vld [vmem:[%s123_s15] sm:$0xf]  ;;  %vm133_vm1 = vcmask 125952   ;;  %vm138_vm2 = vcmask 3072  }
  0x16   : > { %v134_v2 = vsel %vm133_vm1, %v131_v1, 0.0  ;;  %v141_v3 = vmul.f32 %v131_v1, %v131_v1  ;;  %v132_v5 = vld [vmem:[%s255_s1] sm:$0xf] }
  0x17   : > { %135 = vadd.xlane.f32.xlu0 %v134_v2  ;;  %v140_v8 = vld [vmem:[%s256_s2] sm:$0xf] }
  0x18   : > { %v142_v4 = vsel %vm133_vm1, %v141_v3, 0.0 }
  0x1b   : > { %143 = vadd.xlane.f32.xlu0 %v142_v4 }
  0xa4   : > { %v136_v6 = vpop.xlane.xlu0 %135 }
  0xa5   : > { %v137_v7 = vadd.f32 %v136_v6, %v132_v5 }
  0xa7   : > { %139 = vst.msk [vmem:[%s255_s1] sm:$0xf] %vm138_vm2, %v137_v7 }
  0xa8   : > { %v144_v9 = vpop.xlane.xlu0 %143 }
  0xa9   : > { %v145_v10 = vadd.f32 %v144_v9, %v140_v8 }
  0xab   : > { %146 = vst.msk [vmem:[%s256_s2] sm:$0xf] %vm138_vm2, %v145_v10 }
  0xac PF: > { %s13_s9 = sadd.s32 1, %s204_s9  }
  0xad   : > { %p10_p5 = scmp.ge.s32.totalorder %s13_s9, 4  }
  0xaf   :  { %12 = sbr.rel (!%p10_p5) target bundleno = 1 (0x1), region = 62 }

// kernel: _lambda_.99
= control target key start
LH: loop header
LB: loop body
LE: loop exit
PB: predicated region body
PF: predicated region fallthrough
CT: control target
= control target key end

     0   :  { %s1105_s12 = smov 0   ;;  %s1204_s0 = inlined_call_operand.vmem [shape: f32[2,4,38], index: 0, kind: input, shape index: {}]   ;;  %s1205_s1 = inlined_call_operand.vmem [shape: f32[9,4,4], index: 1, kind: input, shape index: {}]   ;;  %s1206_s2 = inlined_call_operand.vmem [shape: f32[4,1], index: 2, kind: input, shape index: {}]   ;;  %s1207_s3 = inlined_call_operand.vmem [shape: f32[2,4,24], index: 3, kind: output, shape index: {}]  }
   0x1 LB: > { %s948_s13 = sadd.s32 4294967295, %s1072_s12   ;;  %p952_p0 = scmp.ge.s32.totalorder %s1072_s12, 1  ;;  %s1072_s12 = sphi %s1105_s12, %s13_s12  }
   0x2   : > { %p136_p1 = scmp.lt.s32.totalorder %s1072_s12, 3 }
   0x4   : > { %p137_p2 = pnand %p952_p0, %p136_p1 }
   0x5   : > { %p158_p3 = scmp.lt.s32.totalorder (!%p137_p2), %s948_s13, 1  ;;  %v1074_v0 = vmov (!%p137_p2), 0.0   ;;  %vm1075_vm0 = vmmov (!%p137_p2), 0   ;;  %vm177_vm1 = vcmask (!%p137_p2), 1043456   ;;  %vm173_vm2 = vcmask (!%p137_p2), 31744   ;;  %s1076_s20 = smov (!%p137_p2), 127  }
   0x6   : > { %140 = sbr.rel (%p137_p2) target bundleno = 368 (0x170), region = 32  ;;  %1001 = vmatprep.subr.mxu0 (!%p137_p2), %v1074_v0  ;;  %1003 = vmatprep.mubr.msk.f32.mxu0 (!%p137_p2), %vm1075_vm0, %v1074_v0  ;;  %v167_v2 = vld [vmem:[%s1205_s1] sm:$0xf] (!%p137_p2)  ;;  %s1077_s21 = smov (!%p137_p2), 122   ;;  %v1080_v3 = vmov (!%p137_p2), 0   ;;  %vm893_vm3 = vcmask (!%p137_p2), 191488  }
   0x7   : > { %1006 = vmatprep.subr.mxu1 (!%p137_p2), %v1074_v0  ;;  %1008 = vmatprep.mubr.msk.f32.mxu1 (!%p137_p2), %vm1075_vm0, %v1074_v0  ;;  %s1078_s22 = smov (!%p137_p2), 126   ;;  %s1079_s23 = smov (!%p137_p2), 121   ;;  %v885_v4 = vld [vmem:[%s1206_s2] sm:$0xf] (!%p137_p2)  ;;  %v955_v5 = vld [vmem:[%s1205_s1 + $0x4] sm:$0xf] (!%p137_p2) }
   0x8   : > { %1065 = vset.pattern.permute.xlu0 (!%p137_p2), %v1080_v3  ;;  %s1081_s24 = smov (!%p137_p2), 120   ;;  %s1082_s25 = smov (!%p137_p2), 116   ;;  %v963_v8 = vld [vmem:[%s1205_s1 + $0xc] sm:$0xf] (!%p137_p2)  ;;  %v960_v9 = vld [vmem:[%s1205_s1 + $0x8] sm:$0xf] (!%p137_p2) }
   0x9   : > { %s1083_s26 = smov (!%p137_p2), 115   ;;  %s1084_s27 = smov (!%p137_p2), 114   ;;  %v966_v12 = vld [vmem:[%s1205_s1 + $0x10] sm:$0xf] (!%p137_p2)  ;;  %v969_v13 = vld [vmem:[%s1205_s1 + $0x14] sm:$0xf] (!%p137_p2) }
   0xa   : > { %v972_v16 = vld [vmem:[%s1205_s1 + $0x18] sm:$0xf] (!%p137_p2)  ;;  %v975_v17 = vld [vmem:[%s1205_s1 + $0x1c] sm:$0xf] (!%p137_p2)  ;;  %v978_v20 = vld [vmem:[%s1205_s1 + $0x20] sm:$0xf] (!%p137_p2) }
   0xd   : > { %s1209_s13 = smov (!%p158_p3, %s948_s13), 1 }
   0xe   : > { %s953_s14 = sshll.u32 %s1209_s13, 2 }
   0xf   : > { %s161_s17 = scalar_lea.vmem %s1204_s0, %s953_s14 }
  0x10   : > { %v166_v1 = vld [vmem:[%s161_s17] sm:$0xf] }
  0x11   : > { %171 = vrot.lane.b32.xlu0 %v166_v1, %s1076_s20  ;;  %407 = vrot.lane.b32.xlu1 %v166_v1, %s1077_s21 }
  0x12   : > { %1007 = vmatpush3.msk.msra.mxu1 %vm177_vm1, %v166_v1 }
  0x13   : > { %1016 = vmatprep.subr.mxu1 %v1074_v0  ;;  %1009 = vmatmul.mubr.msk.f32.vlgmr.msra.gmra.mrb[0].mxu1 %vm173_vm2, %v167_v2 }
  0x14   : > { %1018 = vmatprep.mubr.msk.f32.mxu1 %vm1075_vm0, %v1074_v0 }
  0x15   : > { %327 = vrot.lane.b32.xlu0 %v166_v1, %s1078_s22  ;;  %487 = vrot.lane.b32.xlu1 %v166_v1, %s1079_s23 }
  0x19   : > { %567 = vrot.lane.b32.xlu0 %v166_v1, %s1081_s24  ;;  %647 = vrot.lane.b32.xlu1 %v166_v1, %s1082_s25  ;;  %s165_s24 = scalar_lea.vmem %s1207_s3, %s953_s14 }
  0x1d   : > { %727 = vrot.lane.b32.xlu0 %v166_v1, %s1083_s26  ;;  %807 = vrot.lane.b32.xlu1 %v166_v1, %s1084_s27 }
  0x21   : > { %888 = vperm.xlu0 %1065, %v885_v4  }
  0x83   : > { %v172_v6 = vpop.permute.xlu0 %171  ;;  %v408_v7 = vpop.permute.xlu1 %407 }
  0x84   : > { %1002 = vmatpush3.msk.msra.mxu0 %vm177_vm1, %v172_v6  ;;  %1017 = vmatpush3.msk.msra.mxu1 %vm177_vm1, %v408_v7 }
  0x85   : > { %1004 = vmatmul.mubr.msk.f32.vlgmr.msra.gmra.mrb[0].mxu0 %vm173_vm2, %v955_v5  ;;  %1011 = vmatprep.subr.mxu0 %v1074_v0 }
  0x86   : > { %1013 = vmatprep.mubr.msk.f32.mxu0 %vm1075_vm0, %v1074_v0  ;;  %1019 = vmatmul.mubr.msk.f32.vlgmr.msra.gmra.mrb[2].mxu1 %vm173_vm2, %v963_v8 }
  0x87   : > { %v328_v10 = vpop.permute.xlu0 %327  ;;  %v488_v11 = vpop.permute.xlu1 %487  ;;  %1026 = vmatprep.subr.mxu1 %v1074_v0  ;;  %1028 = vmatprep.mubr.msk.f32.mxu1 %vm1075_vm0, %v1074_v0 }
  0x88   : > { %1012 = vmatpush3.msk.msra.mxu0 %vm177_vm1, %v328_v10 }
  0x89   : > { %1014 = vmatmul.mubr.msk.f32.vlgmr.msra.gmra.mrb[2].mxu0 %vm173_vm2, %v960_v9  ;;  %1021 = vmatprep.subr.mxu0 %v1074_v0 }
  0x8a   : > { %1022 = vmatpush3.msk.msra.mxu0 %vm177_vm1, %v488_v11  ;;  %1023 = vmatprep.mubr.msk.f32.mxu0 %vm1075_vm0, %v1074_v0 }
  0x8b   : > { %v568_v14 = vpop.permute.xlu0 %567  ;;  %v648_v15 = vpop.permute.xlu1 %647  ;;  %1031 = vmatprep.subr.mxu0 %v1074_v0 }
  0x8c   : > { %1027 = vmatpush3.msk.msra.mxu1 %vm177_vm1, %v568_v14 }
  0x8d   : > { %1024 = vmatmul.mubr.msk.f32.vlgmr.msra.gmra.mrb[4].mxu0 %vm173_vm2, %v966_v12  ;;  %1029 = vmatmul.mubr.msk.f32.vlgmr.msra.gmra.mrb[4].mxu1 %vm173_vm2, %v969_v13 }
  0x8e   : > { %1032 = vmatpush3.msk.msra.mxu0 %vm177_vm1, %v648_v15  ;;  %1033 = vmatprep.mubr.msk.f32.mxu0 %vm1075_vm0, %v1074_v0 }
  0x8f   : > { %v728_v18 = vpop.permute.xlu0 %727  ;;  %1036 = vmatprep.subr.mxu1 %v1074_v0  ;;  %v808_v19 = vpop.permute.xlu1 %807  ;;  %1038 = vmatprep.mubr.msk.f32.mxu1 %vm1075_vm0, %v1074_v0 }
  0x90   : > { %1037 = vmatpush3.msk.msra.mxu1 %vm177_vm1, %v728_v18  ;;  %1041 = vmatprep.subr.mxu0 %v1074_v0 }
  0x91   : > { %1034 = vmatmul.mubr.msk.f32.vlgmr.msra.gmra.mrb[6].mxu0 %vm173_vm2, %v972_v16  ;;  %1039 = vmatmul.mubr.msk.f32.vlgmr.msra.gmra.mrb[6].mxu1 %vm173_vm2, %v975_v17 }
  0x92   : > { %1042 = vmatpush3.msk.msra.mxu0 %vm177_vm1, %v808_v19  ;;  %1043 = vmatprep.mubr.msk.f32.mxu0 %vm1075_vm0, %v1074_v0 }
  0x95   : > { %1044 = vmatmul.mubr.msk.f32.vlgmr.msra.gmra.mrb[8].mxu0 %vm173_vm2, %v978_v20 }
  0xa0   : > { %v889_v45 = vpop.permute.xlu0 %888 }
  0xe6   : > { %v321_v21 = vpop.f32.mrb[0].mxu1 }
  0xe7   : > { %v1010_v22 = vpop.f32.mrb[1].mxu1 }
 0x158   : > { %v246_v23 = vpop.f32.mrb[0].mxu0 }
 0x159   : > { %v1005_v24 = vpop.f32.mrb[1].mxu0  ;;  %v322_v25 = vadd.f32 %v321_v21, %v246_v23  ;;  %v480_v26 = vpop.f32.mrb[2].mxu1 }
 0x15a   : > { %v1020_v27 = vpop.f32.mrb[3].mxu1 }
 0x15c   : > { %v400_v28 = vpop.f32.mrb[2].mxu0 }
 0x15d   : > { %v404_v29 = vadd.f32 %v400_v28, %v322_v25  ;;  %v1015_v30 = vpop.f32.mrb[3].mxu0 }
 0x15f   : > { %v484_v31 = vadd.f32 %v480_v26, %v404_v29 }
 0x160   : > { %v560_v32 = vpop.f32.mrb[4].mxu0  ;;  %v640_v33 = vpop.f32.mrb[4].mxu1 }
 0x161   : > { %v564_v34 = vadd.f32 %v560_v32, %v484_v31  ;;  %v1025_v35 = vpop.f32.mrb[5].mxu0  ;;  %v1030_v36 = vpop.f32.mrb[5].mxu1 }
 0x163   : > { %v644_v37 = vadd.f32 %v640_v33, %v564_v34 }
 0x164   : > { %v720_v38 = vpop.f32.mrb[6].mxu0  ;;  %v800_v39 = vpop.f32.mrb[6].mxu1 }
 0x165   : > { %v724_v40 = vadd.f32 %v720_v38, %v644_v37  ;;  %v1035_v41 = vpop.f32.mrb[7].mxu0  ;;  %v1040_v42 = vpop.f32.mrb[7].mxu1 }
 0x167   : > { %v804_v43 = vadd.f32 %v800_v39, %v724_v40 }
 0x168   : > { %v880_v44 = vpop.f32.mrb[8].mxu0 }
 0x169   : > { %v884_v46 = vadd.f32 %v880_v44, %v804_v43  ;;  %v1045_v47 = vpop.f32.mrb[9].mxu0 }
 0x16b   : > { %v891_v48 = vadd.f32 %v889_v45, %v884_v46 }
 0x16d   : > { %v892_v49 = vmax.f32 %v891_v48, 0.0 }
 0x16f   : > { %894 = vst.msk [vmem:[%s165_s24] sm:$0xf] %vm893_vm3, %v892_v49 }
 0x170 PF: > { %s13_s12 = sadd.s32 1, %s1072_s12  }
 0x171   : > { %p10_p4 = scmp.ge.s32.totalorder %s13_s12, 4  }
 0x173   :  { %12 = sbr.rel (!%p10_p4) target bundleno = 1 (0x1), region = 70 }

// kernel: _lambda_.101
= control target key start
LH: loop header
LB: loop body
LE: loop exit
PB: predicated region body
PF: predicated region fallthrough
CT: control target
= control target key end

     0   :  { %s285_s12 = smov 0   ;;  %s302_s0 = inlined_call_operand.vmem [shape: f32[2,4,16], index: 0, kind: input, shape index: {}]   ;;  %s303_s1 = inlined_call_operand.vmem [shape: f32[4,1], index: 1, kind: input, shape index: {}]   ;;  %s304_s2 = inlined_call_operand.vmem [shape: f32[4,1], index: 2, kind: input, shape index: {}]   ;;  %s305_s3 = inlined_call_operand.vmem [shape: f32[2,4,16], index: 3, kind: output, shape index: {}]  }
   0x1 LB: > { %s237_s13 = sadd.s32 4294967295, %s262_s12   ;;  %p241_p0 = scmp.ge.s32.totalorder %s262_s12, 1  ;;  %s262_s12 = sphi %s285_s12, %s13_s12  }
   0x2   : > { %p136_p1 = scmp.lt.s32.totalorder %s262_s12, 3 }
   0x4   : > { %p137_p2 = pnand %p241_p0, %p136_p1 }
   0x5   : > { %v167_v0 = vld [vmem:[%s303_s1] sm:$0xf] (!%p137_p2)  ;;  %v264_v1 = vmov (!%p137_p2), 0   ;;  %p158_p3 = scmp.lt.s32.totalorder (!%p137_p2), %s237_s13, 1  ;;  %vm182_vm0 = vcmask (!%p137_p2), 125952  }
   0x6   : > { %140 = sbr.rel (%p137_p2) target bundleno = 144 (0x90), region = 32  ;;  %255 = vset.pattern.permute.xlu0 (!%p137_p2), %v264_v1  ;;  %v174_v2 = vld [vmem:[%s304_s2] sm:$0xf] (!%p137_p2) }
   0x7   : > { %170 = vperm.xlu0 (!%p137_p2), %255, %v167_v0  }
   0xb   : > { %177 = vperm.xlu0 (!%p137_p2), %255, %v174_v2  }
   0xd   : > { %s307_s13 = smov (!%p158_p3, %s237_s13), 1 }
   0xe   : > { %s242_s18 = sshll.u32 %s307_s13, 2 }
   0xf   : > { %s161_s21 = scalar_lea.vmem %s302_s0, %s242_s18  ;;  %s165_s24 = scalar_lea.vmem %s305_s3, %s242_s18 }
  0x10   : > { %v166_v4 = vld [vmem:[%s161_s21] sm:$0xf] }
  0x86   : > { %v171_v3 = vpop.permute.xlu0 %170 }
  0x87   : > { %v173_v5 = vmul.f32 %v171_v3, %v166_v4 }
  0x8a   : > { %v178_v6 = vpop.permute.xlu0 %177 }
  0x8b   : > { %v180_v7 = vadd.f32 %v178_v6, %v173_v5 }
  0x8d   : > { %v181_v8 = vmax.f32 %v180_v7, 0.0 }
  0x8f   : > { %183 = vst.msk [vmem:[%s165_s24] sm:$0xf] %vm182_vm0, %v181_v8 }
  0x90 PF: > { %s13_s12 = sadd.s32 1, %s262_s12  }
  0x91   : > { %p10_p4 = scmp.ge.s32.totalorder %s13_s12, 4  }
  0x93   :  { %12 = sbr.rel (!%p10_p4) target bundleno = 1 (0x1), region = 62 }

// kernel: _lambda_.103
= control target key start
LH: loop header
LB: loop body
LE: loop exit
PB: predicated region body
PF: predicated region fallthrough
CT: control target
= control target key end

     0   :  { %s286_s12 = smov 0   ;;  %s321_s0 = inlined_call_operand.vmem [shape: f32[2,4,16], index: 0, kind: input, shape index: {}]   ;;  %s322_s1 = inlined_call_operand.vmem [shape: f32[2,4,16], index: 1, kind: input, shape index: {}]   ;;  %s323_s2 = inlined_call_operand.vmem [shape: f32[4,1], index: 2, kind: output, shape index: {0}]   ;;  %s324_s3 = inlined_call_operand.vmem [shape: f32[4,1], index: 3, kind: output, shape index: {1}]  }
   0x1 LB: > { %s239_s13 = sadd.s32 4294967295, %s263_s12   ;;  %p242_p0 = scmp.ge.s32.totalorder %s263_s12, 1  ;;  %s263_s12 = sphi %s286_s12, %s14_s12  }
   0x2   : > { %p138_p1 = scmp.lt.s32.totalorder %s263_s12, 3 }
   0x4   : > { %p139_p2 = pnand %p242_p0, %p138_p1 }
   0x5   : > { %p160_p3 = scmp.lt.s32.totalorder (!%p139_p2), %s239_s13, 1  ;;  %p245_p4 = scmp.ne.s32.totalorder (!%p139_p2), %s239_s13, 0 }
   0x6   : > { %142 = sbr.rel (%p139_p2) target bundleno = 175 (0xaf), region = 28 }
   0xd   : > { %s161_s14 = scalar_select %p160_p3, %s239_s13, 1 }
   0xe   : > { %171 = sbr.rel (%p245_p4) target bundleno = 21 (0x15), region = 32  ;;  %vm172_vm0 = vcmask (!%p245_p4), 3072   ;;  %v265_v0 = vmov (!%p245_p4), 0.0  }
   0xf   : > { %s243_s15 = sshll.u32 %s161_s14, 2  ;;  %173 = vst.msk [vmem:[%s323_s2] sm:$0xf] (!%p245_p4), %vm172_vm0, %v265_v0  ;;  %174 = vst.msk [vmem:[%s324_s3] sm:$0xf] (!%p245_p4), %vm172_vm0, %v265_v0 }
  0x10   : > { %s163_s18 = scalar_lea.vmem %s321_s0, %s243_s15  ;;  %s167_s21 = scalar_lea.vmem %s322_s1, %s243_s15 }
  0x15 PF: > { %v175_v1 = vld [vmem:[%s163_s18] sm:$0xf]  ;;  %vm179_vm1 = vcmask 125952   ;;  %vm184_vm2 = vcmask 3072  }
  0x16   : > { %v176_v2 = vld [vmem:[%s167_s21] sm:$0xf] }
  0x17   : > { %v177_v3 = vadd.f32 %v176_v2, %v175_v1  ;;  %v178_v7 = vld [vmem:[%s323_s2] sm:$0xf] }
  0x18   : > { %v186_v10 = vld [vmem:[%s324_s3] sm:$0xf] }
  0x19   : > { %v180_v4 = vsel %vm179_vm1, %v177_v3, 0.0  ;;  %v187_v5 = vmul.f32 %v177_v3, %v177_v3 }
  0x1a   : > { %181 = vadd.xlane.f32.xlu0 %v180_v4 }
  0x1b   : > { %v188_v6 = vsel %vm179_vm1, %v187_v5, 0.0 }
  0x1e   : > { %189 = vadd.xlane.f32.xlu0 %v188_v6 }
  0xa7   : > { %v182_v8 = vpop.xlane.xlu0 %181 }
  0xa8   : > { %v183_v9 = vadd.f32 %v182_v8, %v178_v7 }
  0xaa   : > { %185 = vst.msk [vmem:[%s323_s2] sm:$0xf] %vm184_vm2, %v183_v9 }
  0xab   : > { %v190_v11 = vpop.xlane.xlu0 %189 }
  0xac   : > { %v191_v12 = vadd.f32 %v190_v11, %v186_v10 }
  0xae   : > { %192 = vst.msk [vmem:[%s324_s3] sm:$0xf] %vm184_vm2, %v191_v12 }
  0xaf PF: > { %s14_s12 = sadd.s32 1, %s263_s12  }
  0xb0   : > { %p11_p5 = scmp.ge.s32.totalorder %s14_s12, 4  }
  0xb2   :  { %13 = sbr.rel (!%p11_p5) target bundleno = 1 (0x1), region = 69 }

// kernel: _lambda_.104
= control target key start
LH: loop header
LB: loop body
LE: loop exit
PB: predicated region body
PF: predicated region fallthrough
CT: control target
= control target key end

     0   :  { %s349_s15 = smov 0   ;;  %s375_s0 = inlined_call_operand.vmem [shape: f32[2,4,16], index: 0, kind: input, shape index: {}]   ;;  %s376_s1 = inlined_call_operand.vmem [shape: f32[2,4,16], index: 1, kind: input, shape index: {}]   ;;  %s377_s2 = inlined_call_operand.vmem [shape: f32[4,1], index: 2, kind: input, shape index: {}]   ;;  %s378_s3 = inlined_call_operand.vmem [shape: f32[4,1], index: 3, kind: input, shape index: {}]   ;;  %s379_s4 = inlined_call_operand.vmem [shape: f32[2,4,16], index: 4, kind: output, shape index: {}]  }
   0x1 LB: > { %s295_s16 = sadd.s32 4294967295, %s321_s15   ;;  %p299_p0 = scmp.ge.s32.totalorder %s321_s15, 1  ;;  %s321_s15 = sphi %s349_s15, %s14_s15  }
   0x2   : > { %p170_p1 = scmp.lt.s32.totalorder %s321_s15, 3 }
   0x4   : > { %p171_p2 = pnand %p299_p0, %p170_p1 }
   0x5   : > { %v213_v0 = vld [vmem:[%s377_s2] sm:$0xf] (!%p171_p2)  ;;  %v323_v1 = vmov (!%p171_p2), 0   ;;  %p198_p3 = scmp.lt.s32.totalorder (!%p171_p2), %s295_s16, 1  ;;  %vm228_vm0 = vcmask (!%p171_p2), 125952  }
   0x6   : > { %174 = sbr.rel (%p171_p2) target bundleno = 144 (0x90), region = 36  ;;  %314 = vset.pattern.permute.xlu0 (!%p171_p2), %v323_v1  ;;  %v220_v2 = vld [vmem:[%s378_s3] sm:$0xf] (!%p171_p2) }
   0x7   : > { %216 = vperm.xlu0 (!%p171_p2), %314, %v213_v0  }
   0xb   : > { %223 = vperm.xlu0 (!%p171_p2), %314, %v220_v2  }
   0xd   : > { %s381_s16 = smov (!%p198_p3, %s295_s16), 1 }
   0xe   : > { %s300_s21 = sshll.u32 %s381_s16, 2 }
   0xf   : > { %s201_s24 = scalar_lea.vmem %s375_s0, %s300_s21  ;;  %s205_s27 = scalar_lea.vmem %s376_s1, %s300_s21 }
  0x10   : > { %v210_v3 = vld [vmem:[%s201_s24] sm:$0xf]  ;;  %s209_s30 = scalar_lea.vmem %s379_s4, %s300_s21 }
  0x11   : > { %v211_v4 = vld [vmem:[%s205_s27] sm:$0xf] }
  0x12   : > { %v212_v5 = vadd.f32 %v211_v4, %v210_v3 }
  0x86   : > { %v217_v6 = vpop.permute.xlu0 %216 }
  0x87   : > { %v219_v7 = vmul.f32 %v217_v6, %v212_v5 }
  0x8a   : > { %v224_v8 = vpop.permute.xlu0 %223 }
  0x8b   : > { %v226_v9 = vadd.f32 %v224_v8, %v219_v7 }
  0x8d   : > { %v227_v10 = vmax.f32 %v226_v9, 0.0 }
  0x8f   : > { %229 = vst.msk [vmem:[%s209_s30] sm:$0xf] %vm228_vm0, %v227_v10 }
  0x90 PF: > { %s14_s15 = sadd.s32 1, %s321_s15  }
  0x91   : > { %p11_p4 = scmp.ge.s32.totalorder %s14_s15, 4  }
  0x93   :  { %13 = sbr.rel (!%p11_p4) target bundleno = 1 (0x1), region = 69 }

// kernel: _lambda_.105
= control target key start
LH: loop header
LB: loop body
LE: loop exit
PB: predicated region body
PF: predicated region fallthrough
CT: control target
= control target key end

     0   :  { %s877_s11 = smov 0   ;;  %s936_s0 = inlined_call_operand.vmem [shape: f32[2,4,16], index: 0, kind: input, shape index: {}]   ;;  %s937_s1 = inlined_call_operand.vmem [shape: f32[2,4], index: 1, kind: input, shape index: {}]   ;;  %s938_s2 = inlined_call_operand.vmem [shape: f32[2,1], index: 2, kind: input, shape index: {}]   ;;  %s939_s3 = inlined_call_operand.vmem [shape: f32[1,2], index: 3, kind: input, shape index: {}]   ;;  %s940_s4 = inlined_call_operand.<no memory space> [shape: f32[1,1], index: 4, kind: input, shape index: {}]   ;;  %s941_s5 = inlined_call_operand.vmem [shape: f32[2,4], index: 5, kind: input, shape index: {}]   ;;  %s942_s6 = inlined_call_operand.vmem [shape: f32[2,1], index: 6, kind: input, shape index: {}]   ;;  %s943_s7 = inlined_call_operand.vmem [shape: f32[4,2], index: 7, kind: input, shape index: {}]   ;;  %s944_s8 = inlined_call_operand.vmem [shape: f32[4,1], index: 8, kind: input, shape index: {}]   ;;  %s945_s9 = inlined_call_operand.vmem [shape: f32[2,4,16], index: 9, kind: output, shape index: {}]  }
   0x1   :  { %v14_v0 = vstv %s940_s4 }
   0x2   :  { %15 = vst [vmem:[#allocation2] sm:$0x1] %v14_v0 }
   0x3 LB: > { %s745_s12 = sadd.s32 4294967295, %s819_s11   ;;  %p749_p0 = scmp.ge.s32.totalorder %s819_s11, 1  ;;  %s819_s11 = sphi %s877_s11, %s21_s11  }
   0x4   : > { %p288_p1 = scmp.lt.s32.totalorder %s819_s11, 3 }
   0x6   : > { %p289_p2 = pnand %p749_p0, %p288_p1 }
   0x7   : > { %p322_p3 = scmp.lt.s32.totalorder (!%p289_p2), %s745_s12, 1  ;;  %v821_v1 = vmov (!%p289_p2), 0.0   ;;  %vm822_vm0 = vmmov (!%p289_p2), 0   ;;  %v332_v2 = vld [vmem:[%s938_s2] sm:$0x3] (!%p289_p2)  ;;  %v823_v3 = vmov (!%p289_p2), 0   ;;  %v424_v13 = vlaneseq (!%p289_p2) }
   0x8   : > { %292 = sbr.rel (%p289_p2) target bundleno = 1215 (0x4bf), region = 56  ;;  %772 = vmatprep.subr.mxu0 (!%p289_p2), %v821_v1  ;;  %774 = vmatprep.mubr.msk.f32.mxu0 (!%p289_p2), %vm822_vm0, %v821_v1  ;;  %vm342_vm1 = vcmask (!%p289_p2), 1043456   ;;  %v331_v5 = vld [vmem:[%s937_s1] sm:$0x3] (!%p289_p2)  ;;  %vm338_vm2 = vcmask (!%p289_p2), 31744   ;;  %vm432_vm3 = vcmask (!%p289_p2), 1041408  }
   0x9   : > { %803 = vset.pattern.permute.xlu0 (!%p289_p2), %v823_v3  ;;  %777 = vmatprep.subr.mxu1 (!%p289_p2), %v821_v1  ;;  %v418_v4 = vld [vmem:[#allocation2] sm:$0x1] (!%p289_p2)  ;;  %vm428_vm4 = vcmask (!%p289_p2), 15360   ;;  %v425_v14 = vshrl.u32 (!%p289_p2), %v424_v13, 7  ;;  %vm517_vm5 = vcmask (!%p289_p2), 125952  }
   0xa   : > { %335 = vperm.xlu0 (!%p289_p2), %803, %v332_v2   ;;  %779 = vmatprep.mubr.msk.f32.mxu1 (!%p289_p2), %vm822_vm0, %v821_v1  ;;  %v417_v12 = vld [vmem:[%s939_s3] sm:$0x1] (!%p289_p2) }
   0xb   : > { %804 = vset.pattern.permute.xlu1 (!%p289_p2), %v823_v3  ;;  %v426_v15 = vsub.s32 (!%p289_p2), 0, %v425_v14  ;;  %v522_v30 = vld [vmem:[%s941_s5] sm:$0x3] (!%p289_p2) }
   0xc   : > { %v523_v31 = vld [vmem:[%s942_s6] sm:$0x3] (!%p289_p2) }
   0xd   : > { %v601_v36 = vld [vmem:[%s943_s7] sm:$0xf] (!%p289_p2) }
   0xe   : > { %421 = vperm.xlu0 (!%p289_p2), %803, %v418_v4   ;;  %v602_v37 = vld [vmem:[%s944_s8] sm:$0xf] (!%p289_p2) }
   0xf   : > { %s947_s12 = smov (!%p322_p3, %s745_s12), 1 }
  0x10   : > { %s750_s14 = sshll.u32 %s947_s12, 2 }
  0x11   : > { %s325_s17 = scalar_lea.vmem %s936_s0, %s750_s14  ;;  %s329_s4 = scalar_lea.vmem %s945_s9, %s750_s14 }
  0x12   : > { %v330_v6 = vld [vmem:[%s325_s17] sm:$0xf] }
  0x13   : > { %773 = vmatpush3.msk.msra.mxu0 %vm342_vm1, %v330_v6 }
  0x14   : > { %775 = vmatmul.mubr.msk.f32.vlgmr.msra.gmra.mrb[0].mxu0 %vm338_vm2, %v331_v5  ;;  %782 = vmatprep.subr.mxu0 %v821_v1 }
  0x15   : > { %784 = vmatprep.mubr.msk.f32.mxu0 %vm822_vm0, %v821_v1 }
  0x89   : > { %v336_v7 = vpop.permute.xlu0 %335 }
  0x8d   : > { %v422_v16 = vpop.permute.xlu0 %421 }
  0x8e   : > { %v427_v17 = vrot.slane %v422_v16, %v426_v15 }
  0xe7   : > { %v412_v8 = vpop.f32.mrb[0].mxu0 }
  0xe8   : > { %v413_v9 = vadd.f32 %v412_v8, %v336_v7  ;;  %v776_v10 = vpop.f32.mrb[1].mxu0 }
  0xea   : > { %v416_v11 = vmax.f32 %v413_v9, 0.0 }
  0xec   : > { %778 = vmatpush3.msk.msra.mxu1 %vm432_vm3, %v416_v11 }
  0xed   : > { %780 = vmatmul.mubr.msk.f32.vlgmr.msra.gmra.mrb[0].mxu1 %vm428_vm4, %v417_v12  ;;  %787 = vmatprep.subr.mxu1 %v821_v1 }
  0xee   : > { %789 = vmatprep.mubr.msk.f32.mxu1 %vm822_vm0, %v821_v1 }
 0x1c0   : > { %v502_v18 = vpop.f32.mrb[0].mxu1 }
 0x1c1   : > { %v503_v19 = vadd.f32 %v502_v18, %v427_v17  ;;  %v781_v20 = vpop.f32.mrb[1].mxu1 }
 0x1c3   : > { %v756_v21 = vmul.f32 -1.442695, %v503_v19 }
 0x1c5   : > { %805 = vpow2.f32 %v756_v21 }
 0x1cf   : > { %v806_v22 = vpop.eup %805 }
 0x1d0   : > { %v509_v23 = vadd.f32 1.0, %v806_v22 }
 0x1d2   : > { %807 = vrcp.f32 %v509_v23 }
 0x1dc   : > { %v808_v24 = vpop.eup %807 }
 0x1dd   : > { %v515_v25 = vrot.slane %v808_v24, %v426_v15 }
 0x1df   : > { %v516_v26 = vmul.f32 %v515_v25, %v330_v6 }
 0x1e1   : > { %v518_v27 = vsel %vm517_vm5, %v516_v26, 0.0 }
 0x1e2   : > { %519 = vadd.xlane.f32.xlu1 %v518_v27 }
 0x26f   : > { %v520_v28 = vpop.xlane.xlu1 %519 }
 0x270   : > { %v521_v29 = vmul.f32 0.0625, %v520_v28 }
 0x272   : > { %783 = vmatpush3.msk.msra.mxu0 %vm342_vm1, %v521_v29 }
 0x273   : > { %785 = vmatmul.mubr.msk.f32.vlgmr.msra.gmra.mrb[2].mxu0 %vm338_vm2, %v522_v30 }
 0x346   : > { %v596_v32 = vpop.f32.mrb[2].mxu0 }
 0x347   : > { %v597_v33 = vadd.f32 %v596_v32, %v523_v31  ;;  %v786_v34 = vpop.f32.mrb[3].mxu0 }
 0x349   : > { %v600_v35 = vmax.f32 %v597_v33, 0.0 }
 0x34b   : > { %788 = vmatpush3.msk.msra.mxu1 %vm432_vm3, %v600_v35 }
 0x34c   : > { %790 = vmatmul.mubr.msk.f32.vlgmr.msra.gmra.mrb[2].mxu1 %vm428_vm4, %v601_v36 }
 0x41f   : > { %v675_v38 = vpop.f32.mrb[2].mxu1 }
 0x420   : > { %v676_v39 = vadd.f32 %v675_v38, %v602_v37  ;;  %v791_v40 = vpop.f32.mrb[3].mxu1 }
 0x422   : > { %v761_v41 = vmul.f32 -1.442695, %v676_v39 }
 0x424   : > { %809 = vpow2.f32 %v761_v41 }
 0x42e   : > { %v810_v42 = vpop.eup %809 }
 0x42f   : > { %v682_v43 = vadd.f32 1.0, %v810_v42 }
 0x431   : > { %811 = vrcp.f32 %v682_v43 }
 0x43b   : > { %v812_v44 = vpop.eup %811 }
 0x43c   : > { %687 = vperm.xlu1 %804, %v812_v44  }
 0x4bb   : > { %v688_v45 = vpop.permute.xlu1 %687 }
 0x4bc   : > { %v690_v46 = vmul.f32 %v688_v45, %v516_v26 }
 0x4be   : > { %691 = vst.msk [vmem:[%s329_s4] sm:$0xf] %vm517_vm5, %v690_v46 }
 0x4bf PF: > { %s21_s11 = sadd.s32 1, %s819_s11  }
 0x4c0   : > { %p18_p4 = scmp.ge.s32.totalorder %s21_s11, 4  }
 0x4c2   :  { %20 = sbr.rel (!%p18_p4) target bundleno = 3 (0x3), region = 86 }

// kernel: _lambda_.113
= control target key start
LH: loop header
LB: loop body
LE: loop exit
PB: predicated region body
PF: predicated region fallthrough
CT: control target
= control target key end

     0   :  { %s309_s6 = smov 0   ;;  %s345_s0 = inlined_call_operand.vmem [shape: f32[2,4,38], index: 0, kind: input, shape index: {}]   ;;  %s346_s1 = inlined_call_operand.vmem [shape: f32[2,4,4,24], index: 1, kind: output, shape index: {}]  }
   0x1 LB: > { %s263_s7 = sadd.s32 4294967295, %s294_s6   ;;  %p267_p0 = scmp.ge.s32.totalorder %s294_s6, 1  ;;  %s294_s6 = sphi %s309_s6, %s11_s6  }
   0x2   : > { %p86_p1 = scmp.lt.s32.totalorder %s294_s6, 3 }
   0x4   : > { %p87_p2 = pnand %p267_p0, %p86_p1 }
   0x5   : > { %p105_p3 = scmp.lt.s32.totalorder (!%p87_p2), %s263_s7, 1  ;;  %s296_s12 = smov (!%p87_p2), 127   ;;  %vm132_vm0 = vcmask (!%p87_p2), 191488  }
   0x6   : > { %90 = sbr.rel (%p87_p2) target bundleno = 269 (0x10d), region = 24  ;;  %s297_s13 = smov (!%p87_p2), 122  }
   0x7   : > { %s298_s14 = smov (!%p87_p2), 121  }
   0xd   : > { %s348_s7 = smov (!%p105_p3, %s263_s7), 1 }
   0xe   : > { %s268_s8 = sshll.u32 %s348_s7, 2  ;;  %s276_s15 = sshll.u32 %s348_s7, 4 }
   0xf   : > { %s108_s11 = scalar_lea.vmem %s345_s0, %s268_s8  ;;  %s113_s18 = scalar_lea.vmem %s346_s1, %s276_s15 }
  0x10   : > { %v184_v0 = vld [vmem:[%s108_s11] sm:$0xf] }
  0x11   : > { %v134_v1 = vld [vmem:[%s108_s11] sm:$0xf]  ;;  %v186_v3 = vmul.f32 0.1875, %v184_v0  ;;  %v196_v11 = vmul.f32 0.0625, %v184_v0  ;;  %v185_v20 = vmul.f32 0.5625, %v184_v0 }
  0x12   : > { %v159_v2 = vld [vmem:[%s108_s11] sm:$0xf]  ;;  %v136_v4 = vmul.f32 0.0625, %v134_v1  ;;  %v142_v5 = vmul.f32 0.5625, %v134_v1  ;;  %v135_v9 = vmul.f32 0.1875, %v134_v1 }
  0x13   : > { %188 = vrot.lane.b32.xlu1 %v186_v3, %s296_s12  ;;  %v161_v6 = vmul.f32 0.5625, %v159_v2  ;;  %v167_v7 = vmul.f32 0.0625, %v159_v2  ;;  %v160_v8 = vmul.f32 0.1875, %v159_v2  ;;  %v114_v10 = vld [vmem:[%s108_s11] sm:$0xf] }
  0x14   : > { %138 = vrot.lane.b32.xlu0 %v136_v4, %s296_s12  ;;  %v116_v12 = vmul.f32 0.1875, %v114_v10  ;;  %v126_v13 = vmul.f32 0.5625, %v114_v10  ;;  %v115_v30 = vmul.f32 0.0625, %v114_v10 }
  0x17   : > { %144 = vrot.lane.b32.xlu1 %v142_v5, %s297_s13 }
  0x18   : > { %163 = vrot.lane.b32.xlu0 %v161_v6, %s296_s12 }
  0x1b   : > { %192 = vrot.lane.b32.xlu1 %v186_v3, %s297_s13 }
  0x1c   : > { %169 = vrot.lane.b32.xlu0 %v167_v7, %s297_s13 }
  0x1f   : > { %174 = vrot.lane.b32.xlu1 %v160_v8, %s298_s14 }
  0x20   : > { %149 = vrot.lane.b32.xlu0 %v135_v9, %s298_s14 }
  0x23   : > { %118 = vrot.lane.b32.xlu1 %v116_v12, %s296_s12 }
  0x24   : > { %198 = vrot.lane.b32.xlu0 %v196_v11, %s298_s14 }
  0x27   : > { %128 = vrot.lane.b32.xlu1 %v126_v13, %s298_s14 }
  0x28   : > { %122 = vrot.lane.b32.xlu0 %v116_v12, %s297_s13 }
  0x85   : > { %v189_v14 = vpop.permute.xlu1 %188 }
  0x86   : > { %v139_v15 = vpop.permute.xlu0 %138  ;;  %v191_v27 = vadd.f32 %v189_v14, %v185_v20 }
  0x87   : > { %v141_v21 = vadd.f32 %v139_v15, %v135_v9 }
  0x89   : > { %v145_v16 = vpop.permute.xlu1 %144 }
  0x8a   : > { %v164_v17 = vpop.permute.xlu0 %163  ;;  %v147_v23 = vadd.f32 %v145_v16, %v141_v21 }
  0x8b   : > { %v166_v22 = vadd.f32 %v164_v17, %v160_v8 }
  0x8d   : > { %v193_v18 = vpop.permute.xlu1 %192 }
  0x8e   : > { %v170_v19 = vpop.permute.xlu0 %169  ;;  %v195_v31 = vadd.f32 %v193_v18, %v191_v27 }
  0x8f   : > { %v172_v24 = vadd.f32 %v170_v19, %v166_v22 }
  0x91   : > { %v175_v25 = vpop.permute.xlu1 %174 }
  0x92   : > { %v150_v26 = vpop.permute.xlu0 %149  ;;  %v177_v28 = vadd.f32 %v175_v25, %v172_v24 }
  0x93   : > { %v152_v29 = vadd.f32 %v150_v26, %v147_v23 }
  0x94   : > { %179 = vrot.lane.b32.xlu1 %v177_v28, %s297_s13 }
  0x95   : > { %154 = vrot.lane.b32.xlu0 %v152_v29, %s296_s12  ;;  %v119_v33 = vpop.permute.xlu1 %118 }
  0x96   : > { %v199_v32 = vpop.permute.xlu0 %198  ;;  %v121_v35 = vadd.f32 %v119_v33, %v115_v30 }
  0x97   : > { %v201_v34 = vadd.f32 %v199_v32, %v195_v31 }
  0x99   : > { %203 = vrot.lane.b32.xlu0 %v201_v34, %s298_s14  ;;  %v129_v38 = vpop.permute.xlu1 %128 }
  0x9a   : > { %v123_v36 = vpop.permute.xlu0 %122 }
  0x9b   : > { %v125_v37 = vadd.f32 %v123_v36, %v121_v35 }
  0x9d   : > { %v131_v39 = vadd.f32 %v129_v38, %v125_v37 }
  0x9f   : > { %133 = vst.msk [vmem:[%s113_s18] sm:$0xf] %vm132_vm0, %v131_v39 }
 0x106   : > { %v180_v41 = vpop.permute.xlu1 %179 }
 0x107   : > { %v155_v40 = vpop.permute.xlu0 %154  ;;  %272 = vst.msk [vmem:[%s113_s18 + $0x8] sm:$0xf] %vm132_vm0, %v180_v41 }
 0x108   : > { %271 = vst.msk [vmem:[%s113_s18 + $0x4] sm:$0xf] %vm132_vm0, %v155_v40 }
 0x10b   : > { %v204_v42 = vpop.permute.xlu0 %203 }
 0x10c   : > { %273 = vst.msk [vmem:[%s113_s18 + $0xc] sm:$0xf] %vm132_vm0, %v204_v42 }
 0x10d PF: > { %s11_s6 = sadd.s32 1, %s294_s6  }
 0x10e   : > { %p8_p4 = scmp.ge.s32.totalorder %s11_s6, 4  }
 0x110   :  { %10 = sbr.rel (!%p8_p4) target bundleno = 1 (0x1), region = 57 }

// kernel: _lambda_.114
= control target key start
LH: loop header
LB: loop body
LE: loop exit
PB: predicated region body
PF: predicated region fallthrough
CT: control target
= control target key end

     0   :  { %s248_s9 = smov 0   ;;  %s276_s0 = inlined_call_operand.vmem [shape: f32[2,4,64], index: 0, kind: input, shape index: {}]   ;;  %s277_s1 = inlined_call_operand.vmem [shape: f32[2,4,64], index: 1, kind: input, shape index: {}]   ;;  %s278_s2 = inlined_call_operand.vmem [shape: f32[2,4,64], index: 2, kind: output, shape index: {}]  }
   0x1 LB: > { %s226_s10 = sadd.s32 4294967295, %s250_s9   ;;  %p230_p0 = scmp.ge.s32.totalorder %s250_s9, 1  ;;  %s250_s9 = sphi %s248_s9, %s12_s9  }
   0x2   : > { %p120_p1 = scmp.lt.s32.totalorder %s250_s9, 3 }
   0x4   : > { %p121_p2 = pnand %p230_p0, %p120_p1 }
   0x5   : > { %p144_p3 = scmp.lt.s32.totalorder (!%p121_p2), %s226_s10, 1  ;;  %vm159_vm0 = vcmask (!%p121_p2), 519168  }
   0x6   : > { %124 = sbr.rel (%p121_p2) target bundleno = 21 (0x15), region = 28 }
   0xd   : > { %s280_s10 = smov (!%p144_p3, %s226_s10), 1 }
   0xe   : > { %s231_s11 = sshll.u32 %s280_s10, 2 }
   0xf   : > { %s147_s14 = scalar_lea.vmem %s276_s0, %s231_s11  ;;  %s151_s17 = scalar_lea.vmem %s277_s1, %s231_s11 }
  0x10   : > { %s155_s20 = scalar_lea.vmem %s278_s2, %s231_s11  ;;  %v156_v0 = vld [vmem:[%s147_s14] sm:$0xf] }
  0x11   : > { %v157_v1 = vld [vmem:[%s151_s17] sm:$0xf] }
  0x12   : > { %v158_v2 = vadd.f32 %v157_v1, %v156_v0 }
  0x14   : > { %160 = vst.msk [vmem:[%s155_s20] sm:$0xf] %vm159_vm0, %v158_v2 }
  0x15 PF: > { %s12_s9 = sadd.s32 1, %s250_s9  }
  0x16   : > { %p9_p4 = scmp.ge.s32.totalorder %s12_s9, 4  }
  0x18   :  { %11 = sbr.rel (!%p9_p4) target bundleno = 1 (0x1), region = 61 }

// kernel: _lambda_.122
= control target key start
LH: loop header
LB: loop body
LE: loop exit
PB: predicated region body
PF: predicated region fallthrough
CT: control target
= control target key end

     0   :  { %s309_s6 = smov 0   ;;  %s345_s0 = inlined_call_operand.vmem [shape: f32[2,4,102], index: 0, kind: input, shape index: {}]   ;;  %s346_s1 = inlined_call_operand.vmem [shape: f32[2,4,4,80], index: 1, kind: output, shape index: {}]  }
   0x1 LB: > { %s263_s7 = sadd.s32 4294967295, %s294_s6   ;;  %p267_p0 = scmp.ge.s32.totalorder %s294_s6, 1  ;;  %s294_s6 = sphi %s309_s6, %s11_s6  }
   0x2   : > { %p86_p1 = scmp.lt.s32.totalorder %s294_s6, 3 }
   0x4   : > { %p87_p2 = pnand %p267_p0, %p86_p1 }
   0x5   : > { %p105_p3 = scmp.lt.s32.totalorder (!%p87_p2), %s263_s7, 1  ;;  %s296_s12 = smov (!%p87_p2), 127   ;;  %vm132_vm0 = vcmask (!%p87_p2), 650240  }
   0x6   : > { %90 = sbr.rel (%p87_p2) target bundleno = 269 (0x10d), region = 24  ;;  %s297_s13 = smov (!%p87_p2), 118  }
   0x7   : > { %s298_s14 = smov (!%p87_p2), 117  }
   0xd   : > { %s348_s7 = smov (!%p105_p3, %s263_s7), 1 }
   0xe   : > { %s268_s8 = sshll.u32 %s348_s7, 2  ;;  %s276_s15 = sshll.u32 %s348_s7, 4 }
   0xf   : > { %s108_s11 = scalar_lea.vmem %s345_s0, %s268_s8  ;;  %s113_s18 = scalar_lea.vmem %s346_s1, %s276_s15 }
  0x10   : > { %v184_v0 = vld [vmem:[%s108_s11] sm:$0xf] }
  0x11   : > { %v134_v1 = vld [vmem:[%s108_s11] sm:$0xf]  ;;  %v186_v3 = vmul.f32 0.1875, %v184_v0  ;;  %v196_v11 = vmul.f32 0.0625, %v184_v0  ;;  %v185_v20 = vmul.f32 0.5625, %v184_v0 }
  0x12   : > { %v159_v2 = vld [vmem:[%s108_s11] sm:$0xf]  ;;  %v136_v4 = vmul.f32 0.0625, %v134_v1  ;;  %v142_v5 = vmul.f32 0.5625, %v134_v1  ;;  %v135_v9 = vmul.f32 0.1875, %v134_v1 }
  0x13   : > { %188 = vrot.lane.b32.xlu1 %v186_v3, %s296_s12  ;;  %v161_v6 = vmul.f32 0.5625, %v159_v2  ;;  %v167_v7 = vmul.f32 0.0625, %v159_v2  ;;  %v160_v8 = vmul.f32 0.1875, %v159_v2  ;;  %v114_v10 = vld [vmem:[%s108_s11] sm:$0xf] }
  0x14   : > { %138 = vrot.lane.b32.xlu0 %v136_v4, %s296_s12  ;;  %v116_v12 = vmul.f32 0.1875, %v114_v10  ;;  %v126_v13 = vmul.f32 0.5625, %v114_v10  ;;  %v115_v30 = vmul.f32 0.0625, %v114_v10 }
  0x17   : > { %144 = vrot.lane.b32.xlu1 %v142_v5, %s297_s13 }
  0x18   : > { %163 = vrot.lane.b32.xlu0 %v161_v6, %s296_s12 }
  0x1b   : > { %192 = vrot.lane.b32.xlu1 %v186_v3, %s297_s13 }
  0x1c   : > { %169 = vrot.lane.b32.xlu0 %v167_v7, %s297_s13 }
  0x1f   : > { %174 = vrot.lane.b32.xlu1 %v160_v8, %s298_s14 }
  0x20   : > { %149 = vrot.lane.b32.xlu0 %v135_v9, %s298_s14 }
  0x23   : > { %118 = vrot.lane.b32.xlu1 %v116_v12, %s296_s12 }
  0x24   : > { %198 = vrot.lane.b32.xlu0 %v196_v11, %s298_s14 }
  0x27   : > { %128 = vrot.lane.b32.xlu1 %v126_v13, %s298_s14 }
  0x28   : > { %122 = vrot.lane.b32.xlu0 %v116_v12, %s297_s13 }
  0x85   : > { %v189_v14 = vpop.permute.xlu1 %188 }
  0x86   : > { %v139_v15 = vpop.permute.xlu0 %138  ;;  %v191_v27 = vadd.f32 %v189_v14, %v185_v20 }
  0x87   : > { %v141_v21 = vadd.f32 %v139_v15, %v135_v9 }
  0x89   : > { %v145_v16 = vpop.permute.xlu1 %144 }
  0x8a   : > { %v164_v17 = vpop.permute.xlu0 %163  ;;  %v147_v23 = vadd.f32 %v145_v16, %v141_v21 }
  0x8b   : > { %v166_v22 = vadd.f32 %v164_v17, %v160_v8 }
  0x8d   : > { %v193_v18 = vpop.permute.xlu1 %192 }
  0x8e   : > { %v170_v19 = vpop.permute.xlu0 %169  ;;  %v195_v31 = vadd.f32 %v193_v18, %v191_v27 }
  0x8f   : > { %v172_v24 = vadd.f32 %v170_v19, %v166_v22 }
  0x91   : > { %v175_v25 = vpop.permute.xlu1 %174 }
  0x92   : > { %v150_v26 = vpop.permute.xlu0 %149  ;;  %v177_v28 = vadd.f32 %v175_v25, %v172_v24 }
  0x93   : > { %v152_v29 = vadd.f32 %v150_v26, %v147_v23 }
  0x94   : > { %179 = vrot.lane.b32.xlu1 %v177_v28, %s297_s13 }
  0x95   : > { %154 = vrot.lane.b32.xlu0 %v152_v29, %s296_s12  ;;  %v119_v33 = vpop.permute.xlu1 %118 }
  0x96   : > { %v199_v32 = vpop.permute.xlu0 %198  ;;  %v121_v35 = vadd.f32 %v119_v33, %v115_v30 }
  0x97   : > { %v201_v34 = vadd.f32 %v199_v32, %v195_v31 }
  0x99   : > { %203 = vrot.lane.b32.xlu0 %v201_v34, %s298_s14  ;;  %v129_v38 = vpop.permute.xlu1 %128 }
  0x9a   : > { %v123_v36 = vpop.permute.xlu0 %122 }
  0x9b   : > { %v125_v37 = vadd.f32 %v123_v36, %v121_v35 }
  0x9d   : > { %v131_v39 = vadd.f32 %v129_v38, %v125_v37 }
  0x9f   : > { %133 = vst.msk [vmem:[%s113_s18] sm:$0xf] %vm132_vm0, %v131_v39 }
 0x106   : > { %v180_v41 = vpop.permute.xlu1 %179 }
 0x107   : > { %v155_v40 = vpop.permute.xlu0 %154  ;;  %272 = vst.msk [vmem:[%s113_s18 + $0x8] sm:$0xf] %vm132_vm0, %v180_v41 }
 0x108   : > { %271 = vst.msk [vmem:[%s113_s18 + $0x4] sm:$0xf] %vm132_vm0, %v155_v40 }
 0x10b   : > { %v204_v42 = vpop.permute.xlu0 %203 }
 0x10c   : > { %273 = vst.msk [vmem:[%s113_s18 + $0xc] sm:$0xf] %vm132_vm0, %v204_v42 }
 0x10d PF: > { %s11_s6 = sadd.s32 1, %s294_s6  }
 0x10e   : > { %p8_p4 = scmp.ge.s32.totalorder %s11_s6, 4  }
 0x110   :  { %10 = sbr.rel (!%p8_p4) target bundleno = 1 (0x1), region = 57 }

// kernel: _lambda_.123
= control target key start
LH: loop header
LB: loop body
LE: loop exit
PB: predicated region body
PF: predicated region fallthrough
CT: control target
= control target key end

     0   :  { %s628_s21 = smov 0   ;;  %s669_s0 = inlined_call_operand.vmem [shape: f32[2,4,256], index: 0, kind: input, shape index: {}]   ;;  %s670_s1 = inlined_call_operand.vmem [shape: f32[2,4,256], index: 1, kind: input, shape index: {}]   ;;  %s671_s2 = inlined_call_operand.vmem [shape: f32[4,4], index: 2, kind: input, shape index: {}]   ;;  %s672_s3 = inlined_call_operand.vmem [shape: f32[4,1], index: 3, kind: input, shape index: {}]   ;;  %s673_s4 = inlined_call_operand.vmem [shape: f32[4,4], index: 4, kind: input, shape index: {}]   ;;  %s674_s5 = inlined_call_operand.vmem [shape: f32[4,1], index: 5, kind: input, shape index: {}]   ;;  %s675_s6 = inlined_call_operand.vmem [shape: f32[2,4,256], index: 6, kind: output, shape index: {}]  }
   0x1 LB: > { %s539_s22 = sadd.s32 4294967295, %s589_s21   ;;  %p543_p0 = scmp.ge.s32.totalorder %s589_s21, 1  ;;  %s589_s21 = sphi %s628_s21, %s16_s21  }
   0x2   : > { %p222_p1 = scmp.lt.s32.totalorder %s589_s21, 3 }
   0x4   : > { %p223_p2 = pnand %p543_p0, %p222_p1 }
   0x5   : > { %p257_p3 = scmp.lt.s32.totalorder (!%p223_p2), %s539_s22, 1  ;;  %v591_v0 = vmov (!%p223_p2), 0.0   ;;  %v274_v1 = vld [vmem:[%s672_s3] sm:$0xf] (!%p223_p2)  ;;  %v592_v2 = vmov (!%p223_p2), 0   ;;  %vm286_vm0 = vcmask (!%p223_p2), 1043456  }
   0x6   : > { %226 = sbr.rel (%p223_p2) target bundleno = 488 (0x1e8), region = 44  ;;  %355 = vmatprep.mubr.f32.mxu0 (!%p223_p2), %v591_v0  ;;  %444 = vmatprep.mubr.f32.mxu1 (!%p223_p2), %v591_v0  ;;  %v365_v3 = vld [vmem:[%s674_s5] sm:$0xf] (!%p223_p2)  ;;  %vm282_vm1 = vcmask (!%p223_p2), 31744  }
   0x7   : > { %573 = vset.pattern.permute.xlu0 (!%p223_p2), %v592_v2  ;;  %v273_v6 = vld [vmem:[%s671_s2] sm:$0xf] (!%p223_p2) }
   0x8   : > { %277 = vperm.xlu0 (!%p223_p2), %573, %v274_v1   ;;  %v364_v14 = vld [vmem:[%s673_s4] sm:$0xf] (!%p223_p2) }
   0xc   : > { %368 = vperm.xlu0 (!%p223_p2), %573, %v365_v3  }
   0xd   : > { %s677_s22 = smov (!%p257_p3, %s539_s22), 1 }
   0xe   : > { %s639_s25 = sshll.u32 %s677_s22, 3 }
   0xf   : > { %s261_s30 = scalar_lea.vmem %s669_s0, %s639_s25  ;;  %s266_s13 = scalar_lea.vmem %s670_s1, %s639_s25 }
  0x10   : > { %v272_v4 = vld [vmem:[%s261_s30] sm:$0xff]  ;;  %s271_s16 = scalar_lea.vmem %s675_s6, %s639_s25 }
  0x11   : > { %v281_v5 = vcombine.high %v272_v4, %v272_v4  ;;  %v463_v30 = vld [vmem:[%s266_s13] sm:$0xff] }
  0x13   : > { %550 = vmatprep.subr.msk.mxu0 %vm286_vm0, %v281_v5 }
  0x14   : > { %551 = vmatpush1.msk.msra.mxu0 %vm286_vm0, %v272_v4 }
  0x15   : > { %552 = vmatmul.mubr.msk.f32.vlgmr.msra.gmra.mrb[0].mxu0 %vm282_vm1, %v273_v6 }
  0x87   : > { %v278_v7 = vpop.permute.xlu0 %277 }
  0x8b   : > { %v369_v15 = vpop.permute.xlu0 %368 }
  0xe8   : > { %v357_v8 = vpop.f32.mrb[0].mxu0 }
  0xe9   : > { %v358_v9 = vadd.f32 %v357_v8, %v278_v7  ;;  %v359_v10 = vpop.f32.mrb[1].mxu0 }
  0xea   : > { %v360_v11 = vadd.f32 %v359_v10, %v278_v7 }
  0xeb   : > { %v362_v13 = vmax.f32 %v358_v9, 0.0 }
  0xec   : > { %v363_v12 = vmax.f32 %v360_v11, 0.0 }
  0xee   : > { %553 = vmatprep.subr.msk.mxu1 %vm286_vm0, %v363_v12 }
  0xef   : > { %554 = vmatpush1.msk.msra.mxu1 %vm286_vm0, %v362_v13 }
  0xf0   : > { %555 = vmatmul.mubr.msk.f32.vlgmr.msra.gmra.mrb[0].mxu1 %vm282_vm1, %v364_v14 }
 0x1c3   : > { %v446_v16 = vpop.f32.mrb[0].mxu1 }
 0x1c4   : > { %v447_v17 = vadd.f32 %v446_v16, %v369_v15  ;;  %v448_v18 = vpop.f32.mrb[1].mxu1 }
 0x1c5   : > { %v449_v19 = vadd.f32 %v448_v18, %v369_v15 }
 0x1c6   : > { %v556_v20 = vmul.f32 -1.442695, %v447_v17 }
 0x1c7   : > { %v557_v21 = vmul.f32 -1.442695, %v449_v19 }
 0x1c8   : > { %575 = vpow2.f32 %v556_v20 }
 0x1c9   : > { %577 = vpow2.f32 %v557_v21 }
 0x1d2   : > { %v576_v22 = vpop.eup %575 }
 0x1d3   : > { %v578_v23 = vpop.eup %577  ;;  %v457_v24 = vadd.f32 1.0, %v576_v22 }
 0x1d4   : > { %v458_v25 = vadd.f32 1.0, %v578_v23 }
 0x1d5   : > { %579 = vrcp.f32 %v457_v24 }
 0x1d6   : > { %581 = vrcp.f32 %v458_v25 }
 0x1df   : > { %v580_v26 = vpop.eup %579 }
 0x1e0   : > { %v582_v27 = vpop.eup %581  ;;  %v464_v28 = vadd.f32 1.0, %v580_v26 }
 0x1e1   : > { %v465_v29 = vadd.f32 1.0, %v582_v27 }
 0x1e3   : > { %v468_v31 = vcombine.low %v464_v28, %v465_v29 }
 0x1e5   : > { %v470_v32 = vmul.f32 %v468_v31, %v463_v30 }
 0x1e7   : > { %471 = vst [vmem:[%s271_s16] sm:$0xff] %v470_v32 }
 0x1e8 PF: > { %s16_s21 = sadd.s32 1, %s589_s21  }
 0x1e9   : > { %p13_p4 = scmp.ge.s32.totalorder %s16_s21, 4  }
 0x1eb   :  { %15 = sbr.rel (!%p13_p4) target bundleno = 1 (0x1), region = 77 }

</bundles_post_ra>
